<compile_context>
chip_gen: v7x
topology: tpu7x:2x2x1
jax: 0.10.0
libtpu: 0.0.40
codegen_flags: <defaults>
</compile_context>

<pallas_src>
import jax
import jax.numpy as jnp
from jax.experimental import pallas as pl
from jax.experimental.pallas import tpu as pltpu

# ---------------------------------------------------------------------------
# Problem sizes (small, consistent with a seq2seq forward)
# ---------------------------------------------------------------------------
B = 2                       # batch
T_TGT = 8                   # max_target_length
T_SRC = 8                   # max_source_length
D = 32                      # hidden size
V = 1024                    # vocab size (multiple of TV)
PAD_TOKEN_ID = 0
DECODER_START_TOKEN_ID = 0
TARGET_PAD_ID = -100


def _default_tm():
    # v6e/v7x MXU is 2x256^2 -> TM=256 fills the MXU output width and halves
    # per-token W HBM re-streaming; v5e (4x128^2 MXU, 1 vst slot, no bf16 VPU)
    # stays at 128.
    try:
        kind = jax.devices()[0].device_kind.lower()
        if "v5 lite" in kind or "v5e" in kind or "v5litepod" in kind:
            return 128
    except Exception:
        pass
    return 256


def _pick_tv(v):
    # 512 amortizes the ~0.35 us/grid-step overhead and gives large W DMAs;
    # per-chunk VMEM = 2*TV*D_pad bf16 (double-buffered W) + TV*TM*4B logits.
    for cand in (512, 256, 128):
        if v % cand == 0:
            return cand
    return v


def _vmem_limit_bytes():
    # Generation-aware VMEM budget: ~3/4 of physical (48 MiB on v7x's 64 MiB,
    # 96 MiB on v5e/v6e's 128 MiB). Falls back to a universally-safe 48 MiB.
    try:
        cap = int(pltpu.get_tpu_info().vmem_capacity_bytes)
        if cap > 0:
            return min((cap * 3) // 4, 100 * 1024 * 1024)
    except Exception:
        pass
    return 48 * 1024 * 1024


_TM = _default_tm()


# ---------------------------------------------------------------------------
# Fused kernel: lm-head projection + online-softmax CE / target-prob gather
# Transposed layout: vocab rows on sublanes, tokens on the 128-lane axis, so
# all accumulators and per-token outputs are lane-dense [1, TM] vectors.
# ---------------------------------------------------------------------------
def _fused_lm_ce_kernel(labels_ref, h_t_ref, w_t_ref, ce_ref, prob_ref,
                        m_sc, l_sc, tgt_sc):
    j = pl.program_id(1)                      # vocab-chunk index (reduction axis)
    tv = w_t_ref.shape[0]

    @pl.when(j == 0)
    def _init():
        m_sc[...] = jnp.full(m_sc.shape, -jnp.inf, m_sc.dtype)
        l_sc[...] = jnp.zeros(l_sc.shape, l_sc.dtype)
        tgt_sc[...] = jnp.zeros(tgt_sc.shape, tgt_sc.dtype)

    # Logits chunk (TV, TM) f32: bf16 MXU operands, f32 accumulation.
    s = jnp.dot(w_t_ref[...], h_t_ref[...], preferred_element_type=jnp.float32)

    # Online softmax statistics (single exp pass per chunk).
    m_prev = m_sc[...]                                                 # (1, TM)
    m_new = jnp.maximum(m_prev, jnp.max(s, axis=0, keepdims=True))
    p = jnp.exp(s - m_new)                                             # (TV, TM)
    alpha = jnp.exp(m_prev - m_new)                                    # (1, TM)
    l_sc[...] = alpha * l_sc[...] + jnp.sum(p, axis=0, keepdims=True)
    m_sc[...] = m_new

    # Target-logit gather: narrow (TV, 1) iota broadcast against (1, TM)
    # labels; labels == -100 never match -> zero contribution.
    v_iota = jax.lax.broadcasted_iota(jnp.int32, (tv, 1), 0) + j * tv
    hit = (v_iota == labels_ref[...]).astype(jnp.float32)              # (TV, TM)
    tgt_sc[...] += jnp.sum(hit * s, axis=0, keepdims=True)

    @pl.when(j == pl.num_programs(1) - 1)
    def _finalize():
        lse = m_sc[...] + jnp.log(l_sc[...])
        ce = lse - tgt_sc[...]
        ce_ref[...] = ce
        prob_ref[...] = jnp.exp(-ce)          # softmax prob of target = exp(tgt-lse)


def fused_lm_head_ce(labels2d, hidden_t, w_t, *, tv):
    """labels2d: [NT, TM] i32, hidden_t: [D_pad, NT*TM] bf16, w_t: [V, D_pad] bf16
       -> (per_token_ce [NT, TM] f32, per_token_prob [NT, TM] f32)."""
    nt, tm = labels2d.shape
    d_pad, n_pad = hidden_t.shape
    v, _ = w_t.shape
    assert n_pad == nt * tm
    assert v % tv == 0, "vocab must be a multiple of TV (no ragged-chunk handling)"
    nvc = v // tv

    cost = pl.CostEstimate(
        flops=2 * n_pad * d_pad * v,
        transcendentals=n_pad * v,
        bytes_accessed=(nt * v * d_pad * 2      # W^T re-streamed per token tile
                        + n_pad * d_pad * 2     # hidden^T
                        + nt * tm * 12),        # labels + ce + prob
    )

    return pl.pallas_call(
        _fused_lm_ce_kernel,
        out_shape=(jax.ShapeDtypeStruct((nt, tm), jnp.float32),
                   jax.ShapeDtypeStruct((nt, tm), jnp.float32)),
        grid_spec=pltpu.PrefetchScalarGridSpec(
            num_scalar_prefetch=0,
            grid=(nt, nvc),                      # vocab (reduction) axis last
            in_specs=[
                pl.BlockSpec((1, tm), lambda i, j: (i, 0)),        # labels
                pl.BlockSpec((d_pad, tm), lambda i, j: (0, i)),    # hidden^T tile
                pl.BlockSpec((tv, d_pad), lambda i, j: (j, 0)),    # W^T vocab chunk
            ],
            out_specs=[
                pl.BlockSpec((1, tm), lambda i, j: (i, 0)),        # ce (lane-dense)
                pl.BlockSpec((1, tm), lambda i, j: (i, 0)),        # prob (lane-dense)
            ],
            scratch_shapes=[
                pltpu.VMEM((1, tm), jnp.float32),    # running max
                pltpu.VMEM((1, tm), jnp.float32),    # running sum-exp
                pltpu.VMEM((1, tm), jnp.float32),    # target logit
            ],
        ),
        compiler_params=pltpu.CompilerParams(
            dimension_semantics=("parallel", "arbitrary"),
            vmem_limit_bytes=_vmem_limit_bytes(),
        ),
        cost_estimate=cost,
    )(labels2d, hidden_t, w_t)


# ---------------------------------------------------------------------------
# LG.forward equivalent (synthetic model: embedding -> lm_head)
# ---------------------------------------------------------------------------
def shift_right(target_ids):
    """HF-style decoder input construction."""
    start = jnp.full((target_ids.shape[0], 1), DECODER_START_TOKEN_ID,
                     dtype=target_ids.dtype)
    shifted = jnp.concatenate([start, target_ids[:, :-1]], axis=1)
    return jnp.where(shifted == TARGET_PAD_ID, PAD_TOKEN_ID, shifted)


@jax.jit
def lg_forward_all(params, source_ids, source_mask, target_ids):
    """Runs the fused kernel ONCE and derives all three LG return modes."""
    # TODO(synk): encoder (source_ids/source_mask) is not modeled; only the
    # decoder-side loss/score math of LG.forward is implemented.
    del source_ids, source_mask
    b, t = target_ids.shape
    n = b * t
    tm = _TM
    tv = _pick_tv(params["lm_head"].shape[1])

    dec_in = shift_right(target_ids).astype(jnp.int32)                 # [B, T]
    flat_ids = dec_in.reshape(-1)
    flat_labels = target_ids.reshape(-1).astype(jnp.int32)

    # Pad the flattened token axis to a multiple of TM (padded tokens get
    # label -100 and are masked out below).
    n_pad = pl.cdiv(n, tm) * tm
    flat_ids = jnp.pad(flat_ids, (0, n_pad - n), constant_values=PAD_TOKEN_ID)
    flat_labels = jnp.pad(flat_labels, (0, n_pad - n),
                          constant_values=TARGET_PAD_ID)
    labels2d = flat_labels.reshape(-1, tm)

    emb = params["embedding"]                                          # [V, D] f32
    lm = params["lm_head"]                                             # [D, V] f32
    d = emb.shape[1]
    d_pad = pl.cdiv(d, 128) * 128

    # Embedding-row gather on the XLA side (replaces the in-kernel one-hot
    # matmul + full E^T residency). Hidden enters the kernel transposed
    # [D_pad, N_pad] bf16 so tokens stay on the lane axis; D is zero-padded to
    # a lane multiple so the W^T (tv, d_pad) block is 128-lane dense too.
    hidden = jnp.take(emb, flat_ids, axis=0)                           # [N_pad, D]
    hidden_t = jnp.pad(hidden.T.astype(jnp.bfloat16), ((0, d_pad - d), (0, 0)))
    w_t = jnp.pad(lm.T.astype(jnp.bfloat16), ((0, 0), (0, d_pad - d)))  # [V, D_pad]

    ce_t, prob_t = fused_lm_head_ce(labels2d, hidden_t, w_t, tv=tv)

    ce = ce_t.reshape(-1)[:n].reshape(b, t)
    prob = prob_t.reshape(-1)[:n].reshape(b, t)
    mask = (target_ids != TARGET_PAD_ID).astype(jnp.float32)           # glue-side mask
    ce = ce * mask
    prob = prob * mask

    denom = jnp.maximum(jnp.sum(mask), 1.0)
    per_ex_denom = jnp.maximum(jnp.sum(mask, axis=1), 1.0)
    return {
        "loss": jnp.sum(ce) / denom,                                   # 'loss'
        "batch_loss": jnp.sum(ce, axis=1) / per_ex_denom,              # 'batch_loss'
        "sequence_scores": jnp.sum(prob, axis=1) / per_ex_denom,       # score mode
    }


def lg_forward(params, source_ids, source_mask, target_ids, ret_batch_loss="loss"):
    outs = lg_forward_all(params, source_ids, source_mask, target_ids)
    if ret_batch_loss == "loss":
        return outs["loss"]
    elif ret_batch_loss == "batch_loss":
        return outs["batch_loss"]
    else:
        return outs["sequence_scores"], outs["loss"]


# ---------------------------------------------------------------------------
# Pure-JAX f32 reference (for validation)
# ---------------------------------------------------------------------------
def _reference_all(params, target_ids):
    dec_in = shift_right(target_ids)
    hidden = jnp.take(params["embedding"], dec_in, axis=0)             # [B,T,D]
    logits = jnp.einsum("btd,dv->btv", hidden, params["lm_head"])       # [B,T,V]
    m = jnp.max(logits, axis=-1, keepdims=True)
    lse = m[..., 0] + jnp.log(jnp.sum(jnp.exp(logits - m), axis=-1))
    safe = jnp.where(target_ids == TARGET_PAD_ID, 0, target_ids)
    tgt = jnp.take_along_axis(logits, safe[..., None], axis=-1)[..., 0]
    mask = (target_ids != TARGET_PAD_ID).astype(jnp.float32)
    ce = (lse - tgt) * mask
    prob = jnp.exp(tgt - lse) * mask
    denom = jnp.maximum(jnp.sum(mask), 1.0)
    per_ex = jnp.maximum(jnp.sum(mask, axis=1), 1.0)
    return {"loss": jnp.sum(ce) / denom,
            "batch_loss": jnp.sum(ce, axis=1) / per_ex,
            "sequence_scores": jnp.sum(prob, axis=1) / per_ex}


# ---------------------------------------------------------------------------
# Main
# ---------------------------------------------------------------------------
if __name__ == "__main__":
    key = jax.random.PRNGKey(0)
    k_emb, k_lm, k_src, k_tgt = jax.random.split(key, 4)

    params = {
        "embedding": jax.random.normal(k_emb, (V, D), jnp.float32) * 0.02,
        "lm_head": jax.random.normal(k_lm, (D, V), jnp.float32) * 0.02,
    }

    source_ids = jax.random.randint(k_src, (B, T_SRC), 1, V).astype(jnp.int32)
    source_mask = jnp.ones((B, T_SRC), jnp.int32)

    target_ids = jax.random.randint(k_tgt, (B, T_TGT), 1, V).astype(jnp.int32)
    # pad the tail of the second sequence with -100 like prepare_data(...) does
    target_ids = target_ids.at[1, 5:].set(TARGET_PAD_ID)

    # Single fused-kernel invocation; all three return modes derived from it.
    outs = lg_forward_all(params, source_ids, source_mask, target_ids)
    jax.block_until_ready(outs)

    loss = outs["loss"]
    batch_loss = outs["batch_loss"]
    seq_scores = outs["sequence_scores"]

    assert loss.shape == ()
    assert batch_loss.shape == (B,)
    assert seq_scores.shape == (B,)
    assert bool(jnp.isfinite(loss))
    assert bool(jnp.all(jnp.isfinite(batch_loss)))
    assert bool(jnp.all(jnp.isfinite(seq_scores)))

    # Validate against the f32 pure-JAX reference (bf16 MXU operands introduce
    # only small relative error).
    ref = _reference_all(params, target_ids)
    assert bool(jnp.allclose(loss, ref["loss"], rtol=2e-2, atol=1e-3))
    assert bool(jnp.allclose(batch_loss, ref["batch_loss"], rtol=2e-2, atol=1e-3))
    assert bool(jnp.allclose(seq_scores, ref["sequence_scores"],
                             rtol=2e-2, atol=1e-4))

    print("KERNEL_OK")
</pallas_src>

<mosaic_0001>
module attributes {stable_mosaic.version = 11 : i64} {
  func.func @_fused_lm_ce_kernel(%arg0: i32, %arg1: i32, %arg2: memref<1x256xi32, #tpu.memory_space<vmem>>, %arg3: memref<128x256xbf16, #tpu.memory_space<vmem>>, %arg4: memref<512x128xbf16, #tpu.memory_space<vmem>>, %arg5: memref<1x256xf32, #tpu.memory_space<vmem>>, %arg6: memref<1x256xf32, #tpu.memory_space<vmem>>, %arg7: memref<1x256xf32, #tpu.memory_space<vmem>>, %arg8: memref<1x256xf32, #tpu.memory_space<vmem>>, %arg9: memref<1x256xf32, #tpu.memory_space<vmem>>) attributes {dimension_semantics = [#tpu.dimension_semantics<parallel>, #tpu.dimension_semantics<arbitrary>], iteration_bounds = array<i64: 1, 2>, scalar_prefetch = 0 : i64, scratch_operands = 3 : i64, tpu.core_type = #tpu.core_type<tc>, window_params = [{transform_indices = @transform_0, window_bounds = array<i64: 1, 256>}, {transform_indices = @transform_1, window_bounds = array<i64: 128, 256>}, {transform_indices = @transform_2, window_bounds = array<i64: 512, 128>}, {transform_indices = @transform_3, window_bounds = array<i64: 1, 256>}, {transform_indices = @transform_4, window_bounds = array<i64: 1, 256>}]} {
    %c0_i32 = arith.constant 0 : i32
    %0 = arith.cmpi eq, %arg1, %c0_i32 : i32
    %1 = arith.extui %0 : i1 to i32
    %c0_i32_0 = arith.constant 0 : i32
    %2 = arith.cmpi ne, %1, %c0_i32_0 : i32
    scf.if %2 {
      %cst_22 = arith.constant 0xFF800000 : f32
      %41 = vector.broadcast %cst_22 : f32 to vector<1x256xf32>
      %c0_23 = arith.constant 0 : index
      %c0_24 = arith.constant 0 : index
      %42 = vector.load %arg7[%c0_23, %c0_24] : memref<1x256xf32, #tpu.memory_space<vmem>>, vector<1x256xf32>
      tpu.vector_store %arg7[%c0_23, %c0_24], %41 {strides = array<i32>} : memref<1x256xf32, #tpu.memory_space<vmem>>, vector<1x256xf32>,
      %cst_25 = arith.constant 0.000000e+00 : f32
      %43 = vector.broadcast %cst_25 : f32 to vector<1x256xf32>
      %c0_26 = arith.constant 0 : index
      %c0_27 = arith.constant 0 : index
      %44 = vector.load %arg8[%c0_26, %c0_27] : memref<1x256xf32, #tpu.memory_space<vmem>>, vector<1x256xf32>
      tpu.vector_store %arg8[%c0_26, %c0_27], %43 {strides = array<i32>} : memref<1x256xf32, #tpu.memory_space<vmem>>, vector<1x256xf32>,
      %cst_28 = arith.constant 0.000000e+00 : f32
      %45 = vector.broadcast %cst_28 : f32 to vector<1x256xf32>
      %c0_29 = arith.constant 0 : index
      %c0_30 = arith.constant 0 : index
      %46 = vector.load %arg9[%c0_29, %c0_30] : memref<1x256xf32, #tpu.memory_space<vmem>>, vector<1x256xf32>
      tpu.vector_store %arg9[%c0_29, %c0_30], %45 {strides = array<i32>} : memref<1x256xf32, #tpu.memory_space<vmem>>, vector<1x256xf32>,
    } else {
    }
    %c0 = arith.constant 0 : index
    %c0_1 = arith.constant 0 : index
    %3 = vector.load %arg4[%c0, %c0_1] : memref<512x128xbf16, #tpu.memory_space<vmem>>, vector<512x128xbf16>
    %c0_2 = arith.constant 0 : index
    %c0_3 = arith.constant 0 : index
    %4 = vector.load %arg3[%c0_2, %c0_3] : memref<128x256xbf16, #tpu.memory_space<vmem>>, vector<128x256xbf16>
    %cst = arith.constant dense<0.000000e+00> : vector<512x256xf32>
    %5 = tpu.matmul %3, %4, %cst {dimension_numbers = #tpu.dot_dimension_numbers<[1], [0], [0], [1], [0, 0, 1, 1], [], []>} : vector<512x128xbf16>, vector<128x256xbf16>, vector<512x256xf32> -> vector<512x256xf32>
    %c0_4 = arith.constant 0 : index
    %c0_5 = arith.constant 0 : index
    %6 = vector.load %arg7[%c0_4, %c0_5] : memref<1x256xf32, #tpu.memory_space<vmem>>, vector<1x256xf32>
    %cst_6 = arith.constant dense<0xFF800000> : vector<256xf32>
    %7 = vector.multi_reduction <maximumf>, %5, %cst_6 [0] : vector<512x256xf32> to vector<256xf32>
    %8 = vector.shape_cast %7 : vector<256xf32> to vector<1x256xf32>
    %9 = arith.maximumf %6, %8 : vector<1x256xf32>
    %10 = vector.broadcast %9 : vector<1x256xf32> to vector<512x256xf32>
    %11 = arith.subf %5, %10 : vector<512x256xf32>
    %12 = math.exp %11 : vector<512x256xf32>
    %13 = arith.subf %6, %9 : vector<1x256xf32>
    %14 = math.exp %13 : vector<1x256xf32>
    %c0_7 = arith.constant 0 : index
    %c0_8 = arith.constant 0 : index
    %15 = vector.load %arg8[%c0_7, %c0_8] : memref<1x256xf32, #tpu.memory_space<vmem>>, vector<1x256xf32>
    %16 = arith.mulf %14, %15 : vector<1x256xf32>
    %cst_9 = arith.constant dense<0.000000e+00> : vector<256xf32>
    %17 = vector.multi_reduction <add>, %12, %cst_9 [0] : vector<512x256xf32> to vector<256xf32>
    %18 = vector.shape_cast %17 : vector<256xf32> to vector<1x256xf32>
    %19 = arith.addf %16, %18 : vector<1x256xf32>
    %c0_10 = arith.constant 0 : index
    %c0_11 = arith.constant 0 : index
    %20 = vector.load %arg8[%c0_10, %c0_11] : memref<1x256xf32, #tpu.memory_space<vmem>>, vector<1x256xf32>
    tpu.vector_store %arg8[%c0_10, %c0_11], %19 {strides = array<i32>} : memref<1x256xf32, #tpu.memory_space<vmem>>, vector<1x256xf32>,
    %c0_12 = arith.constant 0 : index
    %c0_13 = arith.constant 0 : index
    %21 = vector.load %arg7[%c0_12, %c0_13] : memref<1x256xf32, #tpu.memory_space<vmem>>, vector<1x256xf32>
    tpu.vector_store %arg7[%c0_12, %c0_13], %9 {strides = array<i32>} : memref<1x256xf32, #tpu.memory_space<vmem>>, vector<1x256xf32>,
    %22 = tpu.iota {dimensions = array<i32: 0>} : vector<512x1xi32>
    %c512_i32 = arith.constant 512 : i32
    %23 = arith.muli %arg1, %c512_i32 : i32
    %24 = vector.broadcast %23 : i32 to vector<512x1xi32>
    %25 = arith.addi %22, %24 : vector<512x1xi32>
    %c0_14 = arith.constant 0 : index
    %c0_15 = arith.constant 0 : index
    %26 = vector.load %arg2[%c0_14, %c0_15] : memref<1x256xi32, #tpu.memory_space<vmem>>, vector<1x256xi32>
    %27 = vector.broadcast %25 : vector<512x1xi32> to vector<512x256xi32>
    %28 = vector.broadcast %26 : vector<1x256xi32> to vector<512x256xi32>
    %29 = arith.cmpi eq, %27, %28 : vector<512x256xi32>
    %30 = arith.extui %29 : vector<512x256xi1> to vector<512x256xi32>
    %31 = arith.sitofp %30 : vector<512x256xi32> to vector<512x256xf32>
    %c0_16 = arith.constant 0 : index
    %c0_17 = arith.constant 0 : index
    %32 = vector.load %arg9[%c0_16, %c0_17] : memref<1x256xf32, #tpu.memory_space<vmem>>, vector<1x256xf32>
    %33 = arith.mulf %31, %5 : vector<512x256xf32>
    %cst_18 = arith.constant dense<0.000000e+00> : vector<256xf32>
    %34 = vector.multi_reduction <add>, %33, %cst_18 [0] : vector<512x256xf32> to vector<256xf32>
    %35 = vector.shape_cast %34 : vector<256xf32> to vector<1x256xf32>
    %36 = arith.addf %32, %35 : vector<1x256xf32>
    %c0_19 = arith.constant 0 : index
    %c0_20 = arith.constant 0 : index
    %37 = vector.load %arg9[%c0_19, %c0_20] : memref<1x256xf32, #tpu.memory_space<vmem>>, vector<1x256xf32>
    tpu.vector_store %arg9[%c0_19, %c0_20], %36 {strides = array<i32>} : memref<1x256xf32, #tpu.memory_space<vmem>>, vector<1x256xf32>,
    %c1_i32 = arith.constant 1 : i32
    %38 = arith.cmpi eq, %arg1, %c1_i32 : i32
    %39 = arith.extui %38 : i1 to i32
    %c0_i32_21 = arith.constant 0 : i32
    %40 = arith.cmpi ne, %39, %c0_i32_21 : i32
    scf.if %40 {
      %c0_22 = arith.constant 0 : index
      %c0_23 = arith.constant 0 : index
      %41 = vector.load %arg7[%c0_22, %c0_23] : memref<1x256xf32, #tpu.memory_space<vmem>>, vector<1x256xf32>
      %c0_24 = arith.constant 0 : index
      %c0_25 = arith.constant 0 : index
      %42 = vector.load %arg8[%c0_24, %c0_25] : memref<1x256xf32, #tpu.memory_space<vmem>>, vector<1x256xf32>
      %43 = math.log %42 : vector<1x256xf32>
      %44 = arith.addf %41, %43 : vector<1x256xf32>
      %c0_26 = arith.constant 0 : index
      %c0_27 = arith.constant 0 : index
      %45 = vector.load %arg9[%c0_26, %c0_27] : memref<1x256xf32, #tpu.memory_space<vmem>>, vector<1x256xf32>
      %46 = arith.subf %44, %45 : vector<1x256xf32>
      %c0_28 = arith.constant 0 : index
      %c0_29 = arith.constant 0 : index
      %47 = vector.load %arg5[%c0_28, %c0_29] : memref<1x256xf32, #tpu.memory_space<vmem>>, vector<1x256xf32>
      tpu.vector_store %arg5[%c0_28, %c0_29], %46 {strides = array<i32>} : memref<1x256xf32, #tpu.memory_space<vmem>>, vector<1x256xf32>,
      %cst_30 = arith.constant 0.000000e+00 : f32
      %48 = vector.broadcast %cst_30 : f32 to vector<1x256xf32>
      %49 = arith.subf %48, %46 : vector<1x256xf32>
      %50 = math.exp %49 : vector<1x256xf32>
      %c0_31 = arith.constant 0 : index
      %c0_32 = arith.constant 0 : index
      %51 = vector.load %arg6[%c0_31, %c0_32] : memref<1x256xf32, #tpu.memory_space<vmem>>, vector<1x256xf32>
      tpu.vector_store %arg6[%c0_31, %c0_32], %50 {strides = array<i32>} : memref<1x256xf32, #tpu.memory_space<vmem>>, vector<1x256xf32>,
    } else {
    }
    return
  }
  func.func @transform_0(%arg0: i32, %arg1: i32) -> (i32, i32) {
    %c0_i32 = arith.constant 0 : i32
    %c0_i32_0 = arith.constant 0 : i32
    return %arg0, %c0_i32 : i32, i32
  }
  func.func @transform_1(%arg0: i32, %arg1: i32) -> (i32, i32) {
    %c0_i32 = arith.constant 0 : i32
    %c0_i32_0 = arith.constant 0 : i32
    return %c0_i32, %arg0 : i32, i32
  }
  func.func @transform_2(%arg0: i32, %arg1: i32) -> (i32, i32) {
    %c0_i32 = arith.constant 0 : i32
    %c0_i32_0 = arith.constant 0 : i32
    return %arg1, %c0_i32 : i32, i32
  }
  func.func @transform_3(%arg0: i32, %arg1: i32) -> (i32, i32) {
    %c0_i32 = arith.constant 0 : i32
    %c0_i32_0 = arith.constant 0 : i32
    return %arg0, %c0_i32 : i32, i32
  }
  func.func @transform_4(%arg0: i32, %arg1: i32) -> (i32, i32) {
    %c0_i32 = arith.constant 0 : i32
    %c0_i32_0 = arith.constant 0 : i32
    return %arg0, %c0_i32 : i32, i32
  }
}

</mosaic_0001>

<bundles_post_ra>
// kernel: lg_forward_all.1
= control target key start
LH: loop header
LB: loop body
LE: loop exit
PB: predicated region body
PF: predicated region fallthrough
CT: control target
= control target key end

     0   :  { %s3250_s15 = smov 0   ;;  %s3252_s16 = smov 0   ;;  %s5416_s0 = inlined_call_operand.vmem [shape: s32[1,256], index: 0, kind: input, shape index: {}]   ;;  %s5417_s1 = inlined_call_operand.vmem [shape: bf16[128,256], index: 1, kind: input, shape index: {}]   ;;  %s5418_s2 = inlined_call_operand.vmem [shape: bf16[1024,128], index: 2, kind: input, shape index: {}]   ;;  %s5419_s3 = inlined_call_operand.vmem [shape: f32[1,256], index: 3, kind: output, shape index: {0}]   ;;  %s5420_s4 = inlined_call_operand.vmem [shape: f32[1,256], index: 4, kind: output, shape index: {1}]  }
   0x1   :  { %s3254_s17 = smov 0  }
   0x2 LB: > { %s24_s18 = sadd.s32 1, %s3214_s16  ;;  %p2647_p0 = scmp.ge.s32.totalorder %s3218_s17, 1  ;;  %s3218_s17 = sphi %s3254_s17, %s15_s17   ;;  %s3214_s16 = sphi %s3252_s16, %s6083_s16   ;;  %s3210_s15 = sphi %s3250_s15, %s6082_s15  }
   0x3   : > { %p25_p1 = scmp.ge.s32.totalorder %s24_s18, 2  ;;  %p198_p2 = scmp.lt.s32.totalorder %s3218_s17, 3 }
   0x5   : > { %s6085_s18 = smov (%p25_p1, %s24_s18), 0  ;;  %p199_p3 = pnand %p2647_p0, %p198_p2 }
   0x7   : > { %202 = sbr.rel (%p199_p3) target bundleno = 665 (0x299), region = 32 }
   0xe   : > { %s2648_s19 = sshll.u32 %s3210_s15, 6  ;;  %p2650_p5 = scmp.ne.s32.totalorder %s3210_s15, 0 }
   0xf   : > { %p247_p4 = scmp.lt.s32.totalorder %s2648_s19, 127  ;;  %v265_v0 = vlaneseq (!%p2650_p5)  ;;  %v3220_v1 = vmov (!%p2650_p5), -inf   ;;  %v3221_v2 = vmov (!%p2650_p5), 0.0  }
  0x10   : > { %264 = sbr.rel (%p2650_p5) target bundleno = 23 (0x17), region = 36 }
  0x11   : > { %s6087_s19 = smov (!%p247_p4, %s2648_s19), 127  ;;  %vm267_vm0 = vcmp.lt.s32.totalorder (!%p2650_p5), %v265_v0, 256 }
  0x12   : > { %s2649_s20 = sshll.u32 %s6087_s19, 2  ;;  %269 = vst.msk [vmem:[#allocation2] sm:$0x3] (!%p2650_p5), %vm267_vm0, %v3220_v1  ;;  %270 = vst.msk [vmem:[#allocation3] sm:$0x3] (!%p2650_p5), %vm267_vm0, %v3221_v2 }
  0x13   : > { %s3274_s23 = scalar_lea.vmem %s5418_s2, %s2649_s20  ;;  %271 = vst.msk [vmem:[#allocation4] sm:$0x3] (!%p2650_p5), %vm267_vm0, %v3221_v2 }
  0x17 PF: > { %v2878_v3 = vld [vmem:[%s5417_s1 + $0x4] ss:$8 sps:$4 sm:$0xff]   ;;  %v2880_v4 = vld [vmem:[%s5417_s1] ss:$8 sps:$4 sm:$0xff]   ;;  %v3222_v5 = vmov 0   ;;  %v2904_v24 = vld [vmem:[%s3274_s23 + $0x10] sm:$0xff]   ;;  %v5421_v52 = vlaneseq }
  0x18   : > { %656 = vmatprep.mubr.bf16.mxu0 %v3222_v5  ;;  %816 = vmatprep.mubr.bf16.mxu1 %v3222_v5  ;;  %v2881_v6 = vld [vmem:[%s5417_s1 + $0x14] ss:$8 sps:$4 sm:$0xff]   ;;  %v2883_v7 = vld [vmem:[%s5417_s1 + $0x10] ss:$8 sps:$4 sm:$0xff]   ;;  %v2884_v8 = vld [vmem:[%s5417_s1 + $0x24] ss:$8 sps:$4 sm:$0xff]  }
  0x19   : > { %624 = vmatprep.subr.bf16.mxu0 %v2878_v3  ;;  %2833 = vmatprep.subr.bf16.mxu1 %v2878_v3  ;;  %v2886_v9 = vld [vmem:[%s5417_s1 + $0x20] ss:$8 sps:$4 sm:$0xff]   ;;  %v2887_v10 = vld [vmem:[%s5417_s1 + $0x34] ss:$8 sps:$4 sm:$0xff]   ;;  %v2889_v11 = vld [vmem:[%s5417_s1 + $0x30] ss:$8 sps:$4 sm:$0xff]  }
  0x1a   : > { %625 = vmatpush1.bf16.msra.mxu0 %v2880_v4  ;;  %2841 = vmatpush1.bf16.msra.mxu1 %v2880_v4  ;;  %v2890_v12 = vld [vmem:[%s5417_s1 + $0x44] ss:$8 sps:$4 sm:$0xff]   ;;  %v2892_v13 = vld [vmem:[%s5417_s1 + $0x40] ss:$8 sps:$4 sm:$0xff]   ;;  %v2893_v14 = vld [vmem:[%s5417_s1 + $0x54] ss:$8 sps:$4 sm:$0xff]  }
  0x1b   : > { %626 = vmatprep.subr.bf16.mxu0 %v2881_v6  ;;  %2834 = vmatprep.subr.bf16.mxu1 %v2881_v6  ;;  %v2895_v15 = vld [vmem:[%s5417_s1 + $0x50] ss:$8 sps:$4 sm:$0xff]   ;;  %v2896_v16 = vld [vmem:[%s5417_s1 + $0x64] ss:$8 sps:$4 sm:$0xff]   ;;  %v2898_v17 = vld [vmem:[%s5417_s1 + $0x60] ss:$8 sps:$4 sm:$0xff]  }
  0x1c   : > { %v2899_v18 = vld [vmem:[%s5417_s1 + $0x74] ss:$8 sps:$4 sm:$0xff]   ;;  %v2901_v19 = vld [vmem:[%s5417_s1 + $0x70] ss:$8 sps:$4 sm:$0xff]   ;;  %v2902_v20 = vld [vmem:[%s3274_s23] sm:$0xff]   ;;  %v3390_v53 = vshrl.u32 %v5421_v52, 7 }
  0x1d   : > { %v2906_v21 = vld [vmem:[%s3274_s23 + $0x80] sm:$0xff]   ;;  %v2903_v22 = vld [vmem:[%s3274_s23 + $0x8] sm:$0xff]   ;;  %v2910_v25 = vld [vmem:[%s3274_s23 + $0x90] sm:$0xff]   ;;  %s2699_s9 = sshll.u32 %s3210_s15, 9  ;;  %p2828_p6 = scmp.ne.s32.totalorder %s3210_s15, 1 }
  0x1e   : > { %627 = vmatpush1.bf16.msra.mxu0 %v2883_v7  ;;  %2842 = vmatpush1.bf16.msra.mxu1 %v2883_v7  ;;  %v2908_v23 = vld [vmem:[%s3274_s23 + $0x88] sm:$0xff]   ;;  %v2905_v26 = vld [vmem:[%s3274_s23 + $0x18] sm:$0xff]   ;;  %v2907_v28 = vld [vmem:[%s3274_s23 + $0x20] sm:$0xff]   ;;  %v5423_v54 = vsub.s32 0, %v3390_v53  ;;  %v3394_v55 = vstv %s2699_s9  ;;  %v5422_v57 = vsub.s32 1, %v3390_v53  ;;  %v1700_v60 = vadd.s32 8, %v3390_v53 }
  0x1f   : > { %628 = vmatprep.subr.bf16.mxu0 %v2884_v8  ;;  %2835 = vmatprep.subr.bf16.mxu1 %v2884_v8  ;;  %v2912_v27 = vld [vmem:[%s3274_s23 + $0x98] sm:$0xff]   ;;  %v2914_v29 = vld [vmem:[%s3274_s23 + $0xa0] sm:$0xff]   ;;  %v2909_v30 = vld [vmem:[%s3274_s23 + $0x28] sm:$0xff]   ;;  %v1765_v58 = vadd.s32 %v3394_v55, %v3390_v53  ;;  %v1701_v61 = vadd.s32 16, %v3390_v53  ;;  %v1702_v63 = vadd.s32 24, %v3390_v53  ;;  %v1703_v0 = vadd.s32 32, %v3390_v53 }
  0x20   : > { %v2916_v31 = vld [vmem:[%s3274_s23 + $0xa8] sm:$0xff]   ;;  %v2911_v32 = vld [vmem:[%s3274_s23 + $0x30] sm:$0xff]   ;;  %v2913_v34 = vld [vmem:[%s3274_s23 + $0x38] sm:$0xff]   ;;  %v1766_v1 = vadd.s32 %v3394_v55, %v1700_v60  ;;  %v1704_v4 = vadd.s32 40, %v3390_v53  ;;  %v1731_v6 = vadd.s32 256, %v3390_v53  ;;  %v1732_v7 = vadd.s32 264, %v3390_v53 }
  0x21   : > { %v2918_v33 = vld [vmem:[%s3274_s23 + $0xb0] sm:$0xff]   ;;  %v2920_v35 = vld [vmem:[%s3274_s23 + $0xb8] sm:$0xff]   ;;  %v2915_v36 = vld [vmem:[%s3274_s23 + $0x40] sm:$0xff]   ;;  %v1767_v2 = vadd.s32 %v3394_v55, %v1701_v61  ;;  %v1768_v3 = vadd.s32 %v3394_v55, %v1702_v63  ;;  %v5424_v8 = vmov 0.0  }
  0x22   : > { %629 = vmatpush1.bf16.msra.mxu0 %v2886_v9  ;;  %2843 = vmatpush1.bf16.msra.mxu1 %v2886_v9  ;;  %v2922_v37 = vld [vmem:[%s3274_s23 + $0xc0] sm:$0xff]   ;;  %v2917_v38 = vld [vmem:[%s3274_s23 + $0x48] sm:$0xff]   ;;  %v2919_v40 = vld [vmem:[%s3274_s23 + $0x50] sm:$0xff]  }
  0x23   : > { %630 = vmatprep.subr.bf16.mxu0 %v2887_v10  ;;  %2836 = vmatprep.subr.bf16.mxu1 %v2887_v10  ;;  %v2924_v39 = vld [vmem:[%s3274_s23 + $0xc8] sm:$0xff]   ;;  %v2926_v41 = vld [vmem:[%s3274_s23 + $0xd0] sm:$0xff]   ;;  %v2921_v42 = vld [vmem:[%s3274_s23 + $0x58] sm:$0xff]  }
  0x24   : > { %v2928_v43 = vld [vmem:[%s3274_s23 + $0xd8] sm:$0xff]   ;;  %v2923_v44 = vld [vmem:[%s3274_s23 + $0x60] sm:$0xff]   ;;  %v2925_v46 = vld [vmem:[%s3274_s23 + $0x68] sm:$0xff]  }
  0x25   : > { %v2930_v45 = vld [vmem:[%s3274_s23 + $0xe0] sm:$0xff]   ;;  %v2931_v47 = vld [vmem:[%s3274_s23 + $0xe8] sm:$0xff]   ;;  %v2927_v48 = vld [vmem:[%s3274_s23 + $0x70] sm:$0xff]  }
  0x26   : > { %631 = vmatpush1.bf16.msra.mxu0 %v2889_v11  ;;  %2844 = vmatpush1.bf16.msra.mxu1 %v2889_v11  ;;  %v2932_v49 = vld [vmem:[%s3274_s23 + $0xf0] sm:$0xff]   ;;  %v2929_v50 = vld [vmem:[%s3274_s23 + $0x78] sm:$0xff]   ;;  %v1829_v56 = vld [vmem:[%s5416_s0] sm:$0x3]  ;;  %v1770_v11 = vadd.s32 %v3394_v55, %v1704_v4 }
  0x27   : > { %632 = vmatprep.subr.bf16.mxu0 %v2890_v12  ;;  %2837 = vmatprep.subr.bf16.mxu1 %v2890_v12  ;;  %v2933_v51 = vld [vmem:[%s3274_s23 + $0xf8] sm:$0xff]   ;;  %v3404_v59 = vrot.slane %v1829_v56, %v5423_v54  ;;  %v3410_v62 = vrot.slane %v1829_v56, %v5422_v57  ;;  %v1797_v12 = vadd.s32 %v3394_v55, %v1731_v6 }
  0x29   : > { %vm1838_vm1 = vcmp.eq.s32.totalorder %v1765_v58, %v3404_v59  ;;  %vm1839_vm2 = vcmp.eq.s32.totalorder %v1765_v58, %v3410_v62  ;;  %vm1840_vm3 = vcmp.eq.s32.totalorder %v1766_v1, %v3404_v59  ;;  %vm1841_vm4 = vcmp.eq.s32.totalorder %v1766_v1, %v3410_v62 }
  0x2a   : > { %633 = vmatpush1.bf16.msra.mxu0 %v2892_v13  ;;  %2845 = vmatpush1.bf16.msra.mxu1 %v2892_v13  ;;  %v2700_v9 = vsel %vm1838_vm1, 1.0, %v5424_v8  ;;  %v2701_v10 = vsel %vm1839_vm2, 1.0, %v5424_v8  ;;  %vm1842_vm5 = vcmp.eq.s32.totalorder %v1767_v2, %v3404_v59  ;;  %vm1843_vm6 = vcmp.eq.s32.totalorder %v1767_v2, %v3410_v62 }
  0x2b   : > { %634 = vmatprep.subr.bf16.mxu0 %v2893_v14  ;;  %2838 = vmatprep.subr.bf16.mxu1 %v2893_v14  ;;  %vm1844_vm7 = vcmp.eq.s32.totalorder %v1768_v3, %v3404_v59  ;;  %vm1845_vm8 = vcmp.eq.s32.totalorder %v1768_v3, %v3410_v62  ;;  %v1798_v13 = vadd.s32 %v3394_v55, %v1732_v7  ;;  %v2702_v14 = vsel %vm1840_vm3, 1.0, %v5424_v8 }
  0x2c   : > { %vm1848_vm11 = vcmp.eq.s32.totalorder %v1770_v11, %v3404_v59  ;;  %vm1849_vm12 = vcmp.eq.s32.totalorder %v1770_v11, %v3410_v62  ;;  %vm1902_vm13 = vcmp.eq.s32.totalorder %v1797_v12, %v3404_v59  ;;  %vm1903_vm14 = vcmp.eq.s32.totalorder %v1797_v12, %v3410_v62 }
  0x2d   : > { %vm1904_vm15 = vcmp.eq.s32.totalorder %v1798_v13, %v3404_v59  ;;  %vm1905_vm0 = vcmp.eq.s32.totalorder %v1798_v13, %v3410_v62  ;;  %v1708_v2 = vadd.s32 72, %v3390_v53  ;;  %v1735_v11 = vadd.s32 288, %v3390_v53 }
  0x2e   : > { %635 = vmatpush1.bf16.msra.mxu0 %v2895_v15  ;;  %2846 = vmatpush1.bf16.msra.mxu1 %v2895_v15  ;;  %v2703_v15 = vsel %vm1841_vm4, 1.0, %v5424_v8 }
  0x2f   : > { %636 = vmatprep.subr.bf16.mxu0 %v2896_v16  ;;  %2839 = vmatprep.subr.bf16.mxu1 %v2896_v16  ;;  %v1705_v16 = vadd.s32 48, %v3390_v53 }
  0x32   : > { %637 = vmatpush1.bf16.msra.mxu0 %v2898_v17  ;;  %2847 = vmatpush1.bf16.msra.mxu1 %v2898_v17  ;;  %v1706_v17 = vadd.s32 56, %v3390_v53 }
  0x33   : > { %638 = vmatprep.subr.bf16.mxu0 %v2899_v18  ;;  %2840 = vmatprep.subr.bf16.mxu1 %v2899_v18  ;;  %v2704_v18 = vsel %vm1842_vm5, 1.0, %v5424_v8 }
  0x36   : > { %639 = vmatpush1.bf16.msra.mxu0 %v2901_v19  ;;  %2848 = vmatpush1.bf16.msra.mxu1 %v2901_v19  ;;  %v2705_v19 = vsel %vm1843_vm6, 1.0, %v5424_v8 }
  0x39   : > { %657 = vmatmul.mubr.bf16.vlgmr.msra.gmra.mrb[0].mxu0 %v2902_v20  ;;  %817 = vmatmul.mubr.bf16.vlgmr.msra.gmra.mrb[0].mxu1 %v2906_v21  ;;  %v2706_v20 = vsel %vm1844_vm7, 1.0, %v5424_v8  ;;  %v1733_v21 = vadd.s32 272, %v3390_v53 }
  0x3a   : > { %666 = vmatprep.mubr.bf16.mxu0 %v3222_v5  ;;  %826 = vmatprep.mubr.bf16.mxu1 %v3222_v5 }
  0x41   : > { %667 = vmatmul.mubr.bf16.gmra.mrb[4].mxu0 %v2903_v22  ;;  %827 = vmatmul.mubr.bf16.gmra.mrb[4].mxu1 %v2908_v23  ;;  %v3447_v23 = vsel %vm1845_vm8, 1.0, %v5424_v8 }
  0x42   : > { %676 = vmatprep.mubr.bf16.mxu0 %v3222_v5  ;;  %836 = vmatprep.mubr.bf16.mxu1 %v3222_v5 }
  0x49   : > { %677 = vmatmul.mubr.bf16.gmra.mrb[8].mxu0 %v2904_v24  ;;  %837 = vmatmul.mubr.bf16.gmra.mrb[8].mxu1 %v2910_v25 }
  0x4a   : > { %686 = vmatprep.mubr.bf16.mxu0 %v3222_v5  ;;  %846 = vmatprep.mubr.bf16.mxu1 %v3222_v5 }
  0x51   : > { %687 = vmatmul.mubr.bf16.gmra.mrb[12].mxu0 %v2905_v26  ;;  %847 = vmatmul.mubr.bf16.gmra.mrb[12].mxu1 %v2912_v27 }
  0x52   : > { %696 = vmatprep.mubr.bf16.mxu0 %v3222_v5  ;;  %856 = vmatprep.mubr.bf16.mxu1 %v3222_v5 }
  0x59   : > { %697 = vmatmul.mubr.bf16.gmra.mrb[16].mxu0 %v2907_v28  ;;  %857 = vmatmul.mubr.bf16.gmra.mrb[16].mxu1 %v2914_v29 }
  0x5a   : > { %706 = vmatprep.mubr.bf16.mxu0 %v3222_v5  ;;  %866 = vmatprep.mubr.bf16.mxu1 %v3222_v5 }
  0x61   : > { %707 = vmatmul.mubr.bf16.gmra.mrb[20].mxu0 %v2909_v30  ;;  %867 = vmatmul.mubr.bf16.gmra.mrb[20].mxu1 %v2916_v31  ;;  %v1771_v30 = vadd.s32 %v3394_v55, %v1705_v16  ;;  %v3470_v31 = vadd.s32 %v3394_v55, %v1706_v17 }
  0x62   : > { %716 = vmatprep.mubr.bf16.mxu0 %v3222_v5  ;;  %876 = vmatprep.mubr.bf16.mxu1 %v3222_v5 }
  0x63   : > { %vm1850_vm1 = vcmp.eq.s32.totalorder %v1771_v30, %v3404_v59  ;;  %vm1851_vm2 = vcmp.eq.s32.totalorder %v1771_v30, %v3410_v62  ;;  %vm1852_vm3 = vcmp.eq.s32.totalorder %v3470_v31, %v3404_v59  ;;  %vm1853_vm4 = vcmp.eq.s32.totalorder %v3470_v31, %v3410_v62 }
  0x69   : > { %717 = vmatmul.mubr.bf16.gmra.mrb[24].mxu0 %v2911_v32  ;;  %877 = vmatmul.mubr.bf16.gmra.mrb[24].mxu1 %v2918_v33  ;;  %v1734_v33 = vadd.s32 280, %v3390_v53 }
  0x6a   : > { %726 = vmatprep.mubr.bf16.mxu0 %v3222_v5  ;;  %886 = vmatprep.mubr.bf16.mxu1 %v3222_v5 }
  0x6b   : > { %v3525_v56 = vadd.s32 %v3394_v55, %v1734_v33  ;;  %v1736_v33 = vadd.s32 296, %v3390_v53 }
  0x6d   : > { %vm1908_vm7 = vcmp.eq.s32.totalorder %v3525_v56, %v3404_v59  ;;  %vm1909_vm8 = vcmp.eq.s32.totalorder %v3525_v56, %v3410_v62 }
  0x6e   : > { %v3610_v31 = vsel %vm1908_vm7, 1.0, %v5424_v8 }
  0x71   : > { %727 = vmatmul.mubr.bf16.gmra.mrb[28].mxu0 %v2913_v34  ;;  %887 = vmatmul.mubr.bf16.gmra.mrb[28].mxu1 %v2920_v35 }
  0x72   : > { %736 = vmatprep.mubr.bf16.mxu0 %v3222_v5  ;;  %896 = vmatprep.mubr.bf16.mxu1 %v3222_v5 }
  0x79   : > { %737 = vmatmul.mubr.bf16.gmra.mrb[32].mxu0 %v2915_v36  ;;  %897 = vmatmul.mubr.bf16.gmra.mrb[32].mxu1 %v2922_v37 }
  0x7a   : > { %746 = vmatprep.mubr.bf16.mxu0 %v3222_v5  ;;  %906 = vmatprep.mubr.bf16.mxu1 %v3222_v5 }
  0x81   : > { %747 = vmatmul.mubr.bf16.gmra.mrb[36].mxu0 %v2917_v38  ;;  %907 = vmatmul.mubr.bf16.gmra.mrb[36].mxu1 %v2924_v39  ;;  %v1799_v39 = vadd.s32 %v3394_v55, %v1733_v21 }
  0x82   : > { %756 = vmatprep.mubr.bf16.mxu0 %v3222_v5  ;;  %916 = vmatprep.mubr.bf16.mxu1 %v3222_v5 }
  0x83   : > { %vm1906_vm5 = vcmp.eq.s32.totalorder %v1799_v39, %v3404_v59  ;;  %vm1907_vm6 = vcmp.eq.s32.totalorder %v1799_v39, %v3410_v62  ;;  %v3618_v39 = vadd.s32 %v3394_v55, %v1736_v33 }
  0x84   : > { %v3596_v30 = vsel %vm1906_vm5, 1.0, %v5424_v8 }
  0x89   : > { %757 = vmatmul.mubr.bf16.gmra.mrb[40].mxu0 %v2919_v40  ;;  %917 = vmatmul.mubr.bf16.gmra.mrb[40].mxu1 %v2926_v41 }
  0x8a   : > { %766 = vmatprep.mubr.bf16.mxu0 %v3222_v5  ;;  %926 = vmatprep.mubr.bf16.mxu1 %v3222_v5 }
  0x91   : > { %767 = vmatmul.mubr.bf16.gmra.mrb[44].mxu0 %v2921_v42  ;;  %927 = vmatmul.mubr.bf16.gmra.mrb[44].mxu1 %v2928_v43  ;;  %v1707_v42 = vadd.s32 64, %v3390_v53 }
  0x92   : > { %776 = vmatprep.mubr.bf16.mxu0 %v3222_v5  ;;  %936 = vmatprep.mubr.bf16.mxu1 %v3222_v5 }
  0x93   : > { %v3532_v60 = vadd.s32 %v3394_v55, %v1707_v42  ;;  %v3591_v42 = vsel %vm1853_vm4, 1.0, %v5424_v8 }
  0x99   : > { %777 = vmatmul.mubr.bf16.gmra.mrb[48].mxu0 %v2923_v44  ;;  %937 = vmatmul.mubr.bf16.gmra.mrb[48].mxu1 %v2930_v45  ;;  %v3493_v45 = vsel %vm1848_vm11, 1.0, %v5424_v8 }
  0x9a   : > { %786 = vmatprep.mubr.bf16.mxu0 %v3222_v5  ;;  %946 = vmatprep.mubr.bf16.mxu1 %v3222_v5 }
  0xa1   : > { %787 = vmatmul.mubr.bf16.gmra.mrb[52].mxu0 %v2925_v46  ;;  %947 = vmatmul.mubr.bf16.gmra.mrb[52].mxu1 %v2931_v47  ;;  %v3498_v46 = vsel %vm1902_vm13, 1.0, %v5424_v8  ;;  %v3503_v47 = vsel %vm1903_vm14, 1.0, %v5424_v8 }
  0xa2   : > { %796 = vmatprep.mubr.bf16.mxu0 %v3222_v5  ;;  %956 = vmatprep.mubr.bf16.mxu1 %v3222_v5 }
  0xa9   : > { %797 = vmatmul.mubr.bf16.gmra.mrb[56].mxu0 %v2927_v48  ;;  %957 = vmatmul.mubr.bf16.gmra.mrb[56].mxu1 %v2932_v49  ;;  %v3508_v49 = vsel %vm1849_vm12, 1.0, %v5424_v8 }
  0xaa   : > { %806 = vmatprep.mubr.bf16.mxu0 %v3222_v5  ;;  %966 = vmatprep.mubr.bf16.mxu1 %v3222_v5  ;;  %v1769_v5 = vadd.s32 %v3394_v55, %v1703_v0 }
  0xac   : > { %vm1846_vm9 = vcmp.eq.s32.totalorder %v1769_v5, %v3404_v59  ;;  %vm1847_vm10 = vcmp.eq.s32.totalorder %v1769_v5, %v3410_v62 }
  0xad   : > { %v3450_v24 = vsel %vm1846_vm9, 1.0, %v5424_v8  ;;  %v3453_v25 = vsel %vm1847_vm10, 1.0, %v5424_v8  ;;  %vm1854_vm9 = vcmp.eq.s32.totalorder %v3532_v60, %v3404_v59  ;;  %vm1855_vm10 = vcmp.eq.s32.totalorder %v3532_v60, %v3410_v62 }
  0xb1   : > { %807 = vmatmul.mubr.bf16.gmra.mrb[60].mxu0 %v2929_v50  ;;  %967 = vmatmul.mubr.bf16.gmra.mrb[60].mxu1 %v2933_v51  ;;  %v3513_v50 = vsel %vm1904_vm15, 1.0, %v5424_v8  ;;  %v3518_v51 = vsel %vm1905_vm0, 1.0, %v5424_v8  ;;  %vm1912_vm15 = vcmp.eq.s32.totalorder %v3618_v39, %v3404_v59  ;;  %vm1913_vm0 = vcmp.eq.s32.totalorder %v3618_v39, %v3410_v62 }
 0x10c   : > { %v3444_v22 = vpop.f32.mrb[0].mxu0  ;;  %v3456_v26 = vpop.f32.mrb[0].mxu1 }
 0x10d   : > { %5625 = vst [vmem:[#allocation5_spill] sm:$0xff] %v3444_v22  ;;  %5626 = vst [vmem:[#allocation6_spill] sm:$0xff] %v3456_v26  ;;  %v3458_v27 = vpop.f32.mrb[1].mxu0  ;;  %v3462_v28 = vpop.f32.mrb[1].mxu1  ;;  %v2223_v34 = vmul.f32 %v2700_v9, %v3444_v22 }
 0x10e   : > { %5627 = vst [vmem:[#allocation7_spill] sm:$0xff] %v3458_v27  ;;  %5628 = vst [vmem:[#allocation8_spill] sm:$0xff] %v3462_v28  ;;  %v3466_v29 = vpop.f32.mrb[2].mxu0  ;;  %v3472_v32 = vpop.f32.mrb[2].mxu1  ;;  %v2224_v40 = vmul.f32 %v2701_v10, %v3458_v27 }
 0x10f   : > { %5629 = vst [vmem:[#allocation9_spill] sm:$0xff] %v3466_v29  ;;  %v2225_v35 = vmul.f32 %v2702_v14, %v3466_v29  ;;  %v3478_v36 = vpop.f32.mrb[3].mxu0  ;;  %v1008_v37 = vmax.f32 %v3472_v32, %v3456_v26  ;;  %v3482_v38 = vpop.f32.mrb[3].mxu1 }
 0x110   : > { %5630 = vst [vmem:[#allocation10_spill] sm:$0xff] %v3478_v36  ;;  %v2226_v41 = vmul.f32 %v2703_v15, %v3478_v36  ;;  %v1077_v43 = vmax.f32 %v3482_v38, %v3462_v28 }
 0x111   : > { %v2351_v44 = vadd.f32 %v2225_v35, %v2223_v34 }
 0x112   : > { %v2420_v48 = vadd.f32 %v2226_v41, %v2224_v40  ;;  %v2713_v40 = vsel %vm1851_vm2, 1.0, %v5424_v8  ;;  %v3585_v41 = vadd.s32 %v3394_v55, %v1708_v2 }
 0x114   : > { %v3527_v58 = vpop.f32.mrb[4].mxu0  ;;  %v3534_v61 = vpop.f32.mrb[4].mxu1  ;;  %vm1856_vm11 = vcmp.eq.s32.totalorder %v3585_v41, %v3404_v59  ;;  %vm1857_vm12 = vcmp.eq.s32.totalorder %v3585_v41, %v3410_v62 }
 0x115   : > { %5631 = vst [vmem:[#allocation11_spill] sm:$0xff] %v3527_v58  ;;  %v978_v63 = vmax.f32 %v3444_v22, %v3527_v58  ;;  %v2227_v0 = vmul.f32 %v2704_v18, %v3527_v58  ;;  %v3541_v1 = vpop.f32.mrb[5].mxu0  ;;  %v1010_v3 = vmax.f32 %v1008_v37, %v3534_v61  ;;  %v3545_v4 = vpop.f32.mrb[5].mxu1  ;;  %v3681_v56 = vsel %vm1856_vm11, 1.0, %v5424_v8 }
 0x116   : > { %5632 = vst [vmem:[#allocation12_spill] sm:$0xff] %v3541_v1  ;;  %v1047_v5 = vmax.f32 %v3458_v27, %v3541_v1  ;;  %v2228_v6 = vmul.f32 %v2705_v19, %v3541_v1  ;;  %v3550_v7 = vpop.f32.mrb[6].mxu0  ;;  %v1079_v9 = vmax.f32 %v1077_v43, %v3545_v4  ;;  %v3553_v10 = vpop.f32.mrb[6].mxu1  ;;  %v3601_v43 = vsel %vm1907_vm6, 1.0, %v5424_v8 }
 0x117   : > { %5633 = vst [vmem:[#allocation13_spill] sm:$0xff] %v3550_v7  ;;  %v2352_v12 = vadd.f32 %v2351_v44, %v2227_v0  ;;  %v979_v13 = vmax.f32 %v3466_v29, %v3550_v7  ;;  %v2229_v14 = vmul.f32 %v2706_v20, %v3550_v7  ;;  %v3559_v15 = vpop.f32.mrb[7].mxu0  ;;  %v1012_v16 = vmax.f32 %v1010_v3, %v3553_v10  ;;  %v3562_v17 = vpop.f32.mrb[7].mxu1 }
 0x118   : > { %5634 = vst [vmem:[#allocation14_spill] sm:$0xff] %v3559_v15  ;;  %5635 = vst [vmem:[#allocation15_spill] sm:$0xff] %v3562_v17  ;;  %v2421_v18 = vadd.f32 %v2420_v48, %v2228_v6  ;;  %v1048_v19 = vmax.f32 %v3478_v36, %v3559_v15  ;;  %v2230_v21 = vmul.f32 %v3447_v23, %v3559_v15  ;;  %v2712_v20 = vsel %vm1850_vm1, 1.0, %v5424_v8 }
 0x119   : > { %v2353_v34 = vadd.f32 %v2352_v12, %v2229_v14  ;;  %v1081_v35 = vmax.f32 %v1079_v9, %v3562_v17  ;;  %v3582_v23 = vsel %vm1852_vm3, 1.0, %v5424_v8  ;;  %v3615_v0 = vadd.s32 %v3394_v55, %v1735_v11 }
 0x11a   : > { %v2422_v37 = vadd.f32 %v2421_v18, %v2230_v21 }
 0x11b   : > { %vm1910_vm13 = vcmp.eq.s32.totalorder %v3615_v0, %v3404_v59  ;;  %vm1911_vm14 = vcmp.eq.s32.totalorder %v3615_v0, %v3410_v62 }
 0x11c   : > { %v3605_v44 = vpop.f32.mrb[8].mxu0  ;;  %v3612_v48 = vpop.f32.mrb[8].mxu1 }
 0x11d   : > { %5636 = vst [vmem:[#allocation16_spill] sm:$0xff] %v3605_v44  ;;  %5637 = vst [vmem:[#allocation17_spill] sm:$0xff] %v3612_v48  ;;  %v3621_v2 = vmax.f32 %v978_v63, %v3605_v44  ;;  %v2231_v3 = vmul.f32 %v3450_v24, %v3605_v44  ;;  %v3625_v6 = vpop.f32.mrb[9].mxu0  ;;  %v1014_v9 = vmax.f32 %v1012_v16, %v3612_v48  ;;  %v3630_v12 = vpop.f32.mrb[9].mxu1 }
 0x11e   : > { %5638 = vst [vmem:[#allocation18_spill] sm:$0xff] %v3625_v6  ;;  %5639 = vst [vmem:[#allocation19_spill] sm:$0xff] %v3630_v12  ;;  %v3633_v11 = vmax.f32 %v1047_v5, %v3625_v6  ;;  %v2232_v14 = vmul.f32 %v3453_v25, %v3625_v6  ;;  %v3637_v63 = vpop.f32.mrb[10].mxu0  ;;  %v1083_v24 = vmax.f32 %v1081_v35, %v3630_v12  ;;  %v3642_v18 = vpop.f32.mrb[10].mxu1 }
 0x11f   : > { %5640 = vst [vmem:[#allocation20_spill] sm:$0xff] %v3637_v63  ;;  %5641 = vst [vmem:[#allocation21_spill] sm:$0xff] %v3642_v18  ;;  %v2354_v21 = vadd.f32 %v2353_v34, %v2231_v3  ;;  %v3645_v16 = vmax.f32 %v979_v13, %v3637_v63  ;;  %v2233_v5 = vmul.f32 %v3493_v45, %v3637_v63  ;;  %v3649_v33 = vpop.f32.mrb[11].mxu0  ;;  %v3652_v52 = vpop.f32.mrb[11].mxu1  ;;  %v1709_v34 = vadd.s32 80, %v3390_v53 }
 0x120   : > { %5642 = vst [vmem:[#allocation22_spill] sm:$0xff] %v3649_v33  ;;  %v1016_v25 = vmax.f32 %v1014_v9, %v3642_v18  ;;  %5643 = vst [vmem:[#allocation23_spill] sm:$0xff] %v3652_v52  ;;  %v2423_v57 = vadd.f32 %v2422_v37, %v2232_v14  ;;  %v3655_v54 = vmax.f32 %v1048_v19, %v3649_v33  ;;  %v3664_v45 = vsel %vm1909_vm8, 1.0, %v5424_v8 }
 0x121   : > { %v2234_v35 = vmul.f32 %v3508_v49, %v3649_v33  ;;  %v2355_v13 = vadd.f32 %v2354_v21, %v2233_v5  ;;  %v1710_v3 = vadd.s32 88, %v3390_v53  ;;  %v1085_v9 = vmax.f32 %v1083_v24, %v3652_v52 }
 0x122   : > { %v2716_v19 = vsel %vm1854_vm9, 1.0, %v5424_v8  ;;  %v2717_v49 = vsel %vm1855_vm10, 1.0, %v5424_v8  ;;  %v1737_v14 = vadd.s32 304, %v3390_v53  ;;  %v3692_v60 = vadd.s32 %v3394_v55, %v1709_v34 }
 0x123   : > { %v2424_v37 = vadd.f32 %v2423_v57, %v2234_v35  ;;  %v1738_v21 = vadd.s32 312, %v3390_v53  ;;  %v3707_v34 = vadd.s32 %v3394_v55, %v1710_v3 }
 0x124   : > { %v3689_v57 = vpop.f32.mrb[12].mxu0  ;;  %v3698_v24 = vpop.f32.mrb[12].mxu1  ;;  %vm1858_vm1 = vcmp.eq.s32.totalorder %v3692_v60, %v3404_v59  ;;  %vm1859_vm2 = vcmp.eq.s32.totalorder %v3692_v60, %v3410_v62 }
 0x125   : > { %5644 = vst [vmem:[#allocation24_spill] sm:$0xff] %v3689_v57  ;;  %5645 = vst [vmem:[#allocation25_spill] sm:$0xff] %v3698_v24  ;;  %v982_v5 = vmax.f32 %v3621_v2, %v3689_v57  ;;  %v2235_v35 = vmul.f32 %v2712_v20, %v3689_v57  ;;  %v3704_v8 = vpop.f32.mrb[13].mxu0  ;;  %v1018_v33 = vmax.f32 %v1016_v25, %v3698_v24  ;;  %v3710_v63 = vpop.f32.mrb[13].mxu1 }
 0x126   : > { %5646 = vst [vmem:[#allocation26_spill] sm:$0xff] %v3704_v8  ;;  %5647 = vst [vmem:[#allocation27_spill] sm:$0xff] %v3710_v63  ;;  %v1051_v6 = vmax.f32 %v3633_v11, %v3704_v8  ;;  %v2236_v44 = vmul.f32 %v2713_v40, %v3704_v8  ;;  %v3715_v15 = vpop.f32.mrb[14].mxu0  ;;  %v3718_v2 = vadd.s32 %v3394_v55, %v1737_v14  ;;  %v3721_v57 = vpop.f32.mrb[14].mxu1 }
 0x127   : > { %5648 = vst [vmem:[#allocation28_spill] sm:$0xff] %v3715_v15  ;;  %v1087_v20 = vmax.f32 %v1085_v9, %v3710_v63  ;;  %5649 = vst [vmem:[#allocation29_spill] sm:$0xff] %v3721_v57  ;;  %v2356_v3 = vadd.f32 %v2355_v13, %v2235_v35  ;;  %v983_v25 = vmax.f32 %v3645_v16, %v3715_v15  ;;  %v3727_v1 = vpop.f32.mrb[15].mxu0  ;;  %v3730_v11 = vpop.f32.mrb[15].mxu1  ;;  %v5652_v35 = vmov 0.0  }
 0x128   : > { %v2237_v7 = vmul.f32 %v3582_v23, %v3715_v15  ;;  %5650 = vst [vmem:[#allocation30_spill] sm:$0xff] %v3727_v1  ;;  %v1009_v40 = vmax.f32 %v3721_v57, %v1018_v33  ;;  %5651 = vst [vmem:[#allocation31_spill] sm:$0xff] %v3730_v11  ;;  %v2425_v8 = vadd.f32 %v2424_v37, %v2236_v44  ;;  %v3743_v23 = vsel %vm1910_vm13, 1.0, %v5652_v35 }
 0x129   : > { %v1052_v14 = vmax.f32 %v3655_v54, %v3727_v1  ;;  %v2238_v9 = vmul.f32 %v3591_v42, %v3727_v1  ;;  %v3737_v13 = vadd.s32 %v3394_v55, %v1738_v21  ;;  %v1711_v33 = vadd.s32 96, %v3390_v53 }
 0x12a   : > { %v2357_v16 = vadd.f32 %v2356_v3, %v2237_v7  ;;  %v1076_v44 = vmax.f32 %v3730_v11, %v1087_v20  ;;  %v2719_v54 = vsel %vm1857_vm12, 1.0, %v5652_v35  ;;  %v3755_v7 = vsel %vm1911_vm14, 1.0, %v5652_v35 }
 0x12b   : > { %v2426_v37 = vadd.f32 %v2425_v8, %v2238_v9  ;;  %5653 = vst [vmem:[#allocation32_spill] sm:$0xff] %v3755_v7  ;;  %v3761_v42 = vsel %vm1912_vm15, 1.0, %v5652_v35  ;;  %vm1860_vm3 = vcmp.eq.s32.totalorder %v3707_v34, %v3404_v59  ;;  %v3773_v8 = vsel %vm1913_vm0, 1.0, %v5652_v35 }
 0x12c   : > { %5654 = vst [vmem:[#allocation33_spill] sm:$0xff] %v3761_v42  ;;  %5655 = vst [vmem:[#allocation34_spill] sm:$0xff] %v3773_v8  ;;  %v3775_v41 = vpop.f32.mrb[16].mxu0  ;;  %vm1861_vm4 = vcmp.eq.s32.totalorder %v3707_v34, %v3410_v62  ;;  %vm1914_vm5 = vcmp.eq.s32.totalorder %v3718_v2, %v3404_v59  ;;  %vm1915_vm6 = vcmp.eq.s32.totalorder %v3718_v2, %v3410_v62  ;;  %v3785_v0 = vpop.f32.mrb[16].mxu1 }
 0x12d   : > { %5656 = vst [vmem:[#allocation35_spill] sm:$0xff] %v3775_v41  ;;  %vm1916_vm7 = vcmp.eq.s32.totalorder %v3737_v13, %v3404_v59  ;;  %5657 = vst [vmem:[#allocation36_spill] sm:$0xff] %v3785_v0  ;;  %v3788_v39 = vmax.f32 %v982_v5, %v3775_v41  ;;  %v2239_v21 = vmul.f32 %v2716_v19, %v3775_v41  ;;  %v3791_v20 = vpop.f32.mrb[17].mxu0  ;;  %v3797_v1 = vpop.f32.mrb[17].mxu1  ;;  %v1712_v5 = vadd.s32 104, %v3390_v53 }
 0x12e   : > { %5658 = vst [vmem:[#allocation37_spill] sm:$0xff] %v3791_v20  ;;  %v3794_v3 = vadd.s32 %v3394_v55, %v1711_v33  ;;  %v1011_v9 = vmax.f32 %v1009_v40, %v3785_v0  ;;  %5659 = vst [vmem:[#allocation38_spill] sm:$0xff] %v3797_v1  ;;  %v3800_v15 = vmax.f32 %v1051_v6, %v3791_v20  ;;  %v3803_v36 = vpop.f32.mrb[18].mxu0  ;;  %v3807_v41 = vpop.f32.mrb[18].mxu1  ;;  %v2723_v60 = vsel %vm1861_vm4, 1.0, %v5652_v35 }
 0x12f   : > { %v2240_v58 = vmul.f32 %v2717_v49, %v3791_v20  ;;  %5660 = vst [vmem:[#allocation39_spill] sm:$0xff] %v3803_v36  ;;  %v1078_v19 = vmax.f32 %v1076_v44, %v3797_v1  ;;  %5661 = vst [vmem:[#allocation40_spill] sm:$0xff] %v3807_v41  ;;  %v2358_v29 = vadd.f32 %v2357_v16, %v2239_v21  ;;  %v3814_v27 = vpop.f32.mrb[19].mxu0  ;;  %v3817_v49 = vpop.f32.mrb[19].mxu1  ;;  %v1739_v16 = vadd.s32 320, %v3390_v53 }
 0x130   : > { %v3810_v33 = vmax.f32 %v983_v25, %v3803_v36  ;;  %v2241_v40 = vmul.f32 %v3681_v56, %v3803_v36  ;;  %5662 = vst [vmem:[#allocation41_spill] sm:$0xff] %v3814_v27  ;;  %v1013_v6 = vmax.f32 %v1011_v9, %v3807_v41  ;;  %5663 = vst [vmem:[#allocation42_spill] sm:$0xff] %v3817_v49  ;;  %v2720_v56 = vsel %vm1858_vm1, 1.0, %v5652_v35 }
 0x131   : > { %v2427_v20 = vadd.f32 %v2426_v37, %v2240_v58  ;;  %v3820_v22 = vmax.f32 %v1052_v14, %v3814_v27  ;;  %v2242_v44 = vmul.f32 %v2719_v54, %v3814_v27  ;;  %v2721_v25 = vsel %vm1859_vm2, 1.0, %v5652_v35 }
 0x132   : > { %v2359_v21 = vadd.f32 %v2358_v29, %v2241_v40  ;;  %v1080_v58 = vmax.f32 %v1078_v19, %v3817_v49  ;;  %v2722_v14 = vsel %vm1860_vm3, 1.0, %v5652_v35  ;;  %v3841_v29 = vsel %vm1914_vm5, 1.0, %v5652_v35 }
 0x133   : > { %v2428_v37 = vadd.f32 %v2427_v20, %v2242_v44  ;;  %5664 = vst [vmem:[#allocation43_spill] sm:$0xff] %v3841_v29  ;;  %v1713_v54 = vadd.s32 112, %v3390_v53  ;;  %v3852_v20 = vsel %vm1915_vm6, 1.0, %v5652_v35  ;;  %v3858_v9 = vsel %vm1916_vm7, 1.0, %v5652_v35 }
 0x134   : > { %5665 = vst [vmem:[#allocation44_spill] sm:$0xff] %v3852_v20  ;;  %5666 = vst [vmem:[#allocation45_spill] sm:$0xff] %v3858_v9  ;;  %vm1917_vm8 = vcmp.eq.s32.totalorder %v3737_v13, %v3410_v62  ;;  %v3862_v19 = vpop.f32.mrb[20].mxu0  ;;  %vm1862_vm9 = vcmp.eq.s32.totalorder %v3794_v3, %v3404_v59  ;;  %v1778_v34 = vadd.s32 %v3394_v55, %v1712_v5  ;;  %v1740_v40 = vadd.s32 328, %v3390_v53  ;;  %v3871_v44 = vpop.f32.mrb[20].mxu1 }
 0x135   : > { %5667 = vst [vmem:[#allocation46_spill] sm:$0xff] %v3862_v19  ;;  %v3868_v2 = vadd.s32 %v3394_v55, %v1739_v16  ;;  %5668 = vst [vmem:[#allocation47_spill] sm:$0xff] %v3871_v44  ;;  %v986_v27 = vmax.f32 %v3788_v39, %v3862_v19  ;;  %v2243_v36 = vmul.f32 %v2720_v56, %v3862_v19  ;;  %v3876_v49 = vpop.f32.mrb[21].mxu0  ;;  %v3881_v5 = vpop.f32.mrb[21].mxu1 }
 0x136   : > { %5669 = vst [vmem:[#allocation48_spill] sm:$0xff] %v3876_v49  ;;  %vm1863_vm10 = vcmp.eq.s32.totalorder %v3794_v3, %v3410_v62  ;;  %v1015_v41 = vmax.f32 %v1013_v6, %v3871_v44  ;;  %5670 = vst [vmem:[#allocation49_spill] sm:$0xff] %v3881_v5  ;;  %v1055_v16 = vmax.f32 %v3800_v15, %v3876_v49  ;;  %v3886_v0 = vpop.f32.mrb[22].mxu0  ;;  %v3890_v19 = vpop.f32.mrb[22].mxu1 }
 0x137   : > { %v2244_v1 = vmul.f32 %v2721_v25, %v3876_v49  ;;  %5671 = vst [vmem:[#allocation50_spill] sm:$0xff] %v3886_v0  ;;  %v1779_v39 = vadd.s32 %v3394_v55, %v1713_v54  ;;  %v1082_v56 = vmax.f32 %v1080_v58, %v3881_v5  ;;  %5672 = vst [vmem:[#allocation51_spill] sm:$0xff] %v3890_v19  ;;  %v3895_v44 = vpop.f32.mrb[23].mxu0  ;;  %v3898_v57 = vpop.f32.mrb[23].mxu1  ;;  %v1714_v49 = vadd.s32 120, %v3390_v53 }
 0x138   : > { %v2360_v11 = vadd.f32 %v2359_v21, %v2243_v36  ;;  %v987_v9 = vmax.f32 %v3810_v33, %v3886_v0  ;;  %v2245_v6 = vmul.f32 %v2722_v14, %v3886_v0  ;;  %5673 = vst [vmem:[#allocation52_spill] sm:$0xff] %v3895_v44  ;;  %v1017_v15 = vmax.f32 %v1015_v41, %v3890_v19 }
 0x139   : > { %5674 = vst [vmem:[#allocation53_spill] sm:$0xff] %v3898_v57  ;;  %v2429_v25 = vadd.f32 %v2428_v37, %v2244_v1  ;;  %v1056_v54 = vmax.f32 %v3820_v22, %v3895_v44  ;;  %v2246_v58 = vmul.f32 %v2723_v60, %v3895_v44  ;;  %vm1864_vm11 = vcmp.eq.s32.totalorder %v1778_v34, %v3404_v59 }
 0x13a   : > { %v2361_v36 = vadd.f32 %v2360_v11, %v2245_v6  ;;  %vm1865_vm12 = vcmp.eq.s32.totalorder %v1778_v34, %v3410_v62  ;;  %v1084_v33 = vmax.f32 %v1082_v56, %v3898_v57  ;;  %v2724_v1 = vsel %vm1862_vm9, 1.0, %v5652_v35 }
 0x13b   : > { %v2430_v21 = vadd.f32 %v2429_v25, %v2246_v58  ;;  %v3915_v22 = vsel %vm1917_vm8, 1.0, %v5652_v35  ;;  %v1715_v11 = vadd.s32 128, %v3390_v53  ;;  %v2725_v41 = vsel %vm1863_vm10, 1.0, %v5652_v35 }
 0x13c   : > { %5675 = vst [vmem:[#allocation54_spill] sm:$0xff] %v3915_v22  ;;  %vm1918_vm13 = vcmp.eq.s32.totalorder %v3868_v2, %v3404_v59  ;;  %vm1919_vm14 = vcmp.eq.s32.totalorder %v3868_v2, %v3410_v62  ;;  %v3927_v37 = vadd.s32 %v3394_v55, %v1740_v40  ;;  %v3929_v14 = vpop.f32.mrb[24].mxu0  ;;  %v2726_v13 = vsel %vm1864_vm11, 1.0, %v5652_v35  ;;  %v3935_v34 = vpop.f32.mrb[24].mxu1 }
 0x13d   : > { %5676 = vst [vmem:[#allocation55_spill] sm:$0xff] %v3929_v14  ;;  %v2727_v60 = vsel %vm1865_vm12, 1.0, %v5652_v35  ;;  %vm1866_vm15 = vcmp.eq.s32.totalorder %v1779_v39, %v3404_v59  ;;  %v1780_v3 = vadd.s32 %v3394_v55, %v1714_v49  ;;  %5677 = vst [vmem:[#allocation56_spill] sm:$0xff] %v3935_v34  ;;  %v3938_v56 = vmax.f32 %v986_v27, %v3929_v14  ;;  %v3941_v25 = vpop.f32.mrb[25].mxu0  ;;  %v3945_v58 = vpop.f32.mrb[25].mxu1 }
 0x13e   : > { %v2247_v6 = vmul.f32 %v2724_v1, %v3929_v14  ;;  %5678 = vst [vmem:[#allocation57_spill] sm:$0xff] %v3941_v25  ;;  %vm1867_vm0 = vcmp.eq.s32.totalorder %v1779_v39, %v3410_v62  ;;  %v1019_v40 = vmax.f32 %v1017_v15, %v3935_v34  ;;  %5679 = vst [vmem:[#allocation58_spill] sm:$0xff] %v3945_v58  ;;  %v3951_v0 = vpop.f32.mrb[26].mxu0  ;;  %v3957_v14 = vpop.f32.mrb[26].mxu1 }
 0x13f   : > { %v3948_v44 = vmax.f32 %v1055_v16, %v3941_v25  ;;  %v2248_v49 = vmul.f32 %v2725_v41, %v3941_v25  ;;  %5680 = vst [vmem:[#allocation59_spill] sm:$0xff] %v3951_v0  ;;  %v3954_v27 = vadd.s32 %v3394_v55, %v1715_v11  ;;  %v1086_v1 = vmax.f32 %v1084_v33, %v3945_v58  ;;  %v3963_v34 = vpop.f32.mrb[27].mxu0  ;;  %v3966_v41 = vpop.f32.mrb[27].mxu1 }
 0x140   : > { %5681 = vst [vmem:[#allocation60_spill] sm:$0xff] %v3957_v14  ;;  %v2362_v57 = vadd.f32 %v2361_v36, %v2247_v6  ;;  %v3960_v19 = vmax.f32 %v987_v9, %v3951_v0  ;;  %v2249_v15 = vmul.f32 %v2726_v13, %v3951_v0  ;;  %5682 = vst [vmem:[#allocation61_spill] sm:$0xff] %v3963_v34  ;;  %v1716_v58 = vadd.s32 136, %v3390_v53 }
 0x141   : > { %v1020_v16 = vmax.f32 %v3957_v14, %v1019_v40  ;;  %5683 = vst [vmem:[#allocation62_spill] sm:$0xff] %v3966_v41  ;;  %v2431_v25 = vadd.f32 %v2430_v21, %v2248_v49  ;;  %v3969_v11 = vmax.f32 %v1056_v54, %v3963_v34  ;;  %v2250_v33 = vmul.f32 %v2727_v60, %v3963_v34 }
 0x142   : > { %v2363_v36 = vadd.f32 %v2362_v57, %v2249_v15  ;;  %vm1868_vm1 = vcmp.eq.s32.totalorder %v1780_v3, %v3404_v59  ;;  %vm1869_vm2 = vcmp.eq.s32.totalorder %v1780_v3, %v3410_v62  ;;  %v1088_v9 = vmax.f32 %v1086_v1, %v3966_v41 }
 0x143   : > { %v2432_v13 = vadd.f32 %v2431_v25, %v2250_v33  ;;  %v2728_v6 = vsel %vm1866_vm15, 1.0, %v5652_v35  ;;  %v3983_v54 = vsel %vm1918_vm13, 1.0, %v5652_v35  ;;  %v1717_v21 = vadd.s32 144, %v3390_v53 }
 0x144   : > { %5684 = vst [vmem:[#allocation63_spill] sm:$0xff] %v3983_v54  ;;  %v2729_v57 = vsel %vm1867_vm0, 1.0, %v5652_v35  ;;  %v3993_v60 = vsel %vm1919_vm14, 1.0, %v5652_v35  ;;  %vm1920_vm3 = vcmp.eq.s32.totalorder %v3927_v37, %v3404_v59  ;;  %v1741_v3 = vadd.s32 336, %v3390_v53  ;;  %v3998_v25 = vpop.f32.mrb[28].mxu0  ;;  %v4005_v1 = vpop.f32.mrb[28].mxu1 }
 0x145   : > { %5685 = vst [vmem:[#allocation64_spill] sm:$0xff] %v3993_v60  ;;  %5686 = vst [vmem:[#allocation65_spill] sm:$0xff] %v3998_v25  ;;  %v2730_v40 = vsel %vm1868_vm1, 1.0, %v5652_v35  ;;  %v2731_v49 = vsel %vm1869_vm2, 1.0, %v5652_v35  ;;  %vm1870_vm4 = vcmp.eq.s32.totalorder %v3954_v27, %v3404_v59  ;;  %v1782_v39 = vadd.s32 %v3394_v55, %v1716_v58  ;;  %v4010_v33 = vpop.f32.mrb[29].mxu0  ;;  %v4015_v0 = vpop.f32.mrb[29].mxu1 }
 0x146   : > { %5687 = vst [vmem:[#allocation66_spill] sm:$0xff] %v4005_v1  ;;  %v990_v2 = vmax.f32 %v3938_v56, %v3998_v25  ;;  %v2251_v15 = vmul.f32 %v2728_v6, %v3998_v25  ;;  %5688 = vst [vmem:[#allocation67_spill] sm:$0xff] %v4010_v33  ;;  %vm1871_vm5 = vcmp.eq.s32.totalorder %v3954_v27, %v3410_v62  ;;  %v4020_v14 = vpop.f32.mrb[30].mxu0  ;;  %v4026_v25 = vpop.f32.mrb[30].mxu1 }
 0x147   : > { %v1022_v34 = vmax.f32 %v1020_v16, %v4005_v1  ;;  %5689 = vst [vmem:[#allocation68_spill] sm:$0xff] %v4015_v0  ;;  %v1059_v41 = vmax.f32 %v3948_v44, %v4010_v33  ;;  %v2252_v58 = vmul.f32 %v2729_v57, %v4010_v33  ;;  %5690 = vst [vmem:[#allocation69_spill] sm:$0xff] %v4020_v14  ;;  %v4031_v60 = vpop.f32.mrb[31].mxu0  ;;  %v4034_v57 = vpop.f32.mrb[31].mxu1 }
 0x148   : > { %v4023_v56 = vadd.s32 %v3394_v55, %v1717_v21  ;;  %v1089_v6 = vmax.f32 %v4015_v0, %v1088_v9  ;;  %5691 = vst [vmem:[#allocation70_spill] sm:$0xff] %v4026_v25  ;;  %v2364_v5 = vadd.f32 %v2363_v36, %v2251_v15  ;;  %v991_v16 = vmax.f32 %v3960_v19, %v4020_v14 }
 0x149   : > { %v2253_v1 = vmul.f32 %v2730_v40, %v4020_v14  ;;  %5692 = vst [vmem:[#allocation71_spill] sm:$0xff] %v4031_v60  ;;  %v1024_v44 = vmax.f32 %v1022_v34, %v4026_v25  ;;  %5693 = vst [vmem:[#allocation72_spill] sm:$0xff] %v4034_v57  ;;  %v2433_v33 = vadd.f32 %v2432_v13, %v2252_v58  ;;  %v1718_v0 = vadd.s32 152, %v3390_v53 }
 0x14a   : > { %v1060_v21 = vmax.f32 %v3969_v11, %v4031_v60  ;;  %v2254_v9 = vmul.f32 %v2731_v49, %v4031_v60  ;;  %vm1872_vm6 = vcmp.eq.s32.totalorder %v1782_v39, %v3404_v59  ;;  %vm1873_vm7 = vcmp.eq.s32.totalorder %v1782_v39, %v3410_v62 }
 0x14b   : > { %v2365_v36 = vadd.f32 %v2364_v5, %v2253_v1  ;;  %v1091_v19 = vmax.f32 %v1089_v6, %v4034_v57  ;;  %v2732_v34 = vsel %vm1870_vm4, 1.0, %v5652_v35  ;;  %vm1921_vm8 = vcmp.eq.s32.totalorder %v3927_v37, %v3410_v62 }
 0x14c   : > { %v2434_v40 = vadd.f32 %v2433_v33, %v2254_v9  ;;  %v1719_v11 = vadd.s32 160, %v3390_v53  ;;  %v4054_v5 = vsel %vm1920_vm3, 1.0, %v5652_v35  ;;  %v2733_v13 = vsel %vm1871_vm5, 1.0, %v5652_v35  ;;  %v4064_v1 = vpop.f32.mrb[32].mxu0  ;;  %v4071_v6 = vpop.f32.mrb[32].mxu1 }
 0x14d   : > { %5694 = vst [vmem:[#allocation73_spill] sm:$0xff] %v4054_v5  ;;  %v4061_v49 = vadd.s32 %v3394_v55, %v1741_v3  ;;  %v1742_v39 = vadd.s32 344, %v3390_v53  ;;  %5695 = vst [vmem:[#allocation74_spill] sm:$0xff] %v4064_v1  ;;  %v2734_v15 = vsel %vm1872_vm6, 1.0, %v5652_v35  ;;  %v2735_v33 = vsel %vm1873_vm7, 1.0, %v5652_v35  ;;  %v4077_v9 = vpop.f32.mrb[33].mxu0 }
 0x14e   : > { %vm1874_vm9 = vcmp.eq.s32.totalorder %v4023_v56, %v3404_v59  ;;  %v1784_v58 = vadd.s32 %v3394_v55, %v1718_v0  ;;  %5696 = vst [vmem:[#allocation75_spill] sm:$0xff] %v4071_v6  ;;  %v4074_v27 = vmax.f32 %v990_v2, %v4064_v1  ;;  %v2255_v3 = vmul.f32 %v2732_v34, %v4064_v1  ;;  %v4082_v14 = vpop.f32.mrb[33].mxu1  ;;  %v4088_v25 = vpop.f32.mrb[34].mxu0 }
 0x14f   : > { %5697 = vst [vmem:[#allocation76_spill] sm:$0xff] %v4077_v9  ;;  %vm1875_vm10 = vcmp.eq.s32.totalorder %v4023_v56, %v3410_v62  ;;  %v1026_v60 = vmax.f32 %v1024_v44, %v4071_v6  ;;  %5698 = vst [vmem:[#allocation77_spill] sm:$0xff] %v4082_v14  ;;  %v4085_v57 = vmax.f32 %v1059_v41, %v4077_v9  ;;  %v4094_v1 = vpop.f32.mrb[34].mxu1  ;;  %v4100_v6 = vpop.f32.mrb[35].mxu0 }
 0x150   : > { %v2256_v0 = vmul.f32 %v2733_v13, %v4077_v9  ;;  %5699 = vst [vmem:[#allocation78_spill] sm:$0xff] %v4088_v25  ;;  %v4091_v2 = vadd.s32 %v3394_v55, %v1719_v11  ;;  %v1093_v34 = vmax.f32 %v1091_v19, %v4082_v14  ;;  %5700 = vst [vmem:[#allocation79_spill] sm:$0xff] %v4094_v1  ;;  %v4103_v13 = vpop.f32.mrb[35].mxu1  ;;  %v1720_v14 = vadd.s32 168, %v3390_v53 }
 0x151   : > { %v2366_v5 = vadd.f32 %v2365_v36, %v2255_v3  ;;  %v4097_v54 = vmax.f32 %v991_v16, %v4088_v25  ;;  %v2257_v44 = vmul.f32 %v2734_v15, %v4088_v25  ;;  %5701 = vst [vmem:[#allocation80_spill] sm:$0xff] %v4100_v6  ;;  %v1028_v41 = vmax.f32 %v1026_v60, %v4094_v1 }
 0x152   : > { %5702 = vst [vmem:[#allocation81_spill] sm:$0xff] %v4103_v13  ;;  %v2435_v9 = vadd.f32 %v2434_v40, %v2256_v0  ;;  %v4106_v11 = vmax.f32 %v1060_v21, %v4100_v6  ;;  %v2258_v19 = vmul.f32 %v2735_v33, %v4100_v6  ;;  %vm1876_vm11 = vcmp.eq.s32.totalorder %v1784_v58, %v3404_v59 }
 0x153   : > { %v2367_v36 = vadd.f32 %v2366_v5, %v2257_v44  ;;  %vm1877_vm12 = vcmp.eq.s32.totalorder %v1784_v58, %v3410_v62  ;;  %v1095_v16 = vmax.f32 %v1093_v34, %v4103_v13  ;;  %v4117_v60 = vsel %vm1921_vm8, 1.0, %v5652_v35 }
 0x154   : > { %5703 = vst [vmem:[#allocation82_spill] sm:$0xff] %v4117_v60  ;;  %v2436_v40 = vadd.f32 %v2435_v9, %v2258_v19  ;;  %v2736_v21 = vsel %vm1874_vm9, 1.0, %v5652_v35  ;;  %v1721_v5 = vadd.s32 176, %v3390_v53  ;;  %vm1922_vm13 = vcmp.eq.s32.totalorder %v4061_v49, %v3404_v59  ;;  %v4134_v58 = vpop.f32.mrb[36].mxu0 }
 0x155   : > { %v4127_v15 = vadd.s32 %v3394_v55, %v1742_v39  ;;  %v2737_v37 = vsel %vm1875_vm10, 1.0, %v5652_v35  ;;  %v1743_v33 = vadd.s32 352, %v3390_v53  ;;  %5704 = vst [vmem:[#allocation83_spill] sm:$0xff] %v4134_v58  ;;  %v2738_v3 = vsel %vm1876_vm11, 1.0, %v5652_v35  ;;  %v4141_v39 = vpop.f32.mrb[36].mxu1  ;;  %v4146_v44 = vpop.f32.mrb[37].mxu0 }
 0x156   : > { %v2739_v9 = vsel %vm1877_vm12, 1.0, %v5652_v35  ;;  %vm1878_vm14 = vcmp.eq.s32.totalorder %v4091_v2, %v3404_v59  ;;  %v1786_v0 = vadd.s32 %v3394_v55, %v1720_v14  ;;  %5705 = vst [vmem:[#allocation84_spill] sm:$0xff] %v4141_v39  ;;  %v994_v34 = vmax.f32 %v4074_v27, %v4134_v58  ;;  %5706 = vst [vmem:[#allocation85_spill] sm:$0xff] %v4146_v44  ;;  %v4151_v6 = vpop.f32.mrb[37].mxu1  ;;  %v4156_v13 = vpop.f32.mrb[38].mxu0 }
 0x157   : > { %v2259_v56 = vmul.f32 %v2736_v21, %v4134_v58  ;;  %vm1879_vm15 = vcmp.eq.s32.totalorder %v4091_v2, %v3410_v62  ;;  %v1030_v19 = vmax.f32 %v1028_v41, %v4141_v39  ;;  %5707 = vst [vmem:[#allocation86_spill] sm:$0xff] %v4151_v6  ;;  %v1063_v25 = vmax.f32 %v4085_v57, %v4146_v44  ;;  %v4162_v58 = vpop.f32.mrb[38].mxu1  ;;  %v4167_v60 = vpop.f32.mrb[39].mxu0 }
 0x158   : > { %v2260_v14 = vmul.f32 %v2737_v37, %v4146_v44  ;;  %5708 = vst [vmem:[#allocation87_spill] sm:$0xff] %v4156_v13  ;;  %v4159_v27 = vadd.s32 %v3394_v55, %v1721_v5  ;;  %v1097_v21 = vmax.f32 %v1095_v16, %v4151_v6  ;;  %5709 = vst [vmem:[#allocation88_spill] sm:$0xff] %v4162_v58  ;;  %v4170_v37 = vpop.f32.mrb[39].mxu1  ;;  %v1722_v6 = vadd.s32 184, %v3390_v53 }
 0x159   : > { %v2368_v1 = vadd.f32 %v2367_v36, %v2259_v56  ;;  %v995_v41 = vmax.f32 %v4097_v54, %v4156_v13  ;;  %v2261_v39 = vmul.f32 %v2738_v3, %v4156_v13  ;;  %5710 = vst [vmem:[#allocation89_spill] sm:$0xff] %v4167_v60  ;;  %v1032_v57 = vmax.f32 %v1030_v19, %v4162_v58 }
 0x15a   : > { %5711 = vst [vmem:[#allocation90_spill] sm:$0xff] %v4170_v37  ;;  %v2437_v44 = vadd.f32 %v2436_v40, %v2260_v14  ;;  %v1064_v5 = vmax.f32 %v4106_v11, %v4167_v60  ;;  %v2262_v16 = vmul.f32 %v2739_v9, %v4167_v60  ;;  %vm1880_vm0 = vcmp.eq.s32.totalorder %v1786_v0, %v3404_v59 }
 0x15b   : > { %v2369_v36 = vadd.f32 %v2368_v1, %v2261_v39  ;;  %vm1881_vm1 = vcmp.eq.s32.totalorder %v1786_v0, %v3410_v62  ;;  %v1099_v54 = vmax.f32 %v1097_v21, %v4170_v37  ;;  %v4183_v3 = vsel %vm1922_vm13, 1.0, %v5652_v35 }
 0x15c   : > { %5712 = vst [vmem:[#allocation91_spill] sm:$0xff] %v4183_v3  ;;  %vm1923_vm2 = vcmp.eq.s32.totalorder %v4061_v49, %v3410_v62  ;;  %v2438_v11 = vadd.f32 %v2437_v44, %v2262_v16  ;;  %v2740_v1 = vsel %vm1878_vm14, 1.0, %v5652_v35  ;;  %vm1924_vm3 = vcmp.eq.s32.totalorder %v4127_v15, %v3404_v59  ;;  %v4201_v39 = vpop.f32.mrb[40].mxu0 }
 0x15d   : > { %v4194_v40 = vadd.s32 %v3394_v55, %v1743_v33  ;;  %v1744_v9 = vadd.s32 360, %v3390_v53  ;;  %v2741_v0 = vsel %vm1879_vm15, 1.0, %v5652_v35  ;;  %5713 = vst [vmem:[#allocation92_spill] sm:$0xff] %v4201_v39  ;;  %v2742_v56 = vsel %vm1880_vm0, 1.0, %v5652_v35  ;;  %v4208_v33 = vpop.f32.mrb[40].mxu1  ;;  %v4214_v2 = vpop.f32.mrb[41].mxu0 }
 0x15e   : > { %v2743_v44 = vsel %vm1881_vm1, 1.0, %v5652_v35  ;;  %vm1882_vm4 = vcmp.eq.s32.totalorder %v4159_v27, %v3404_v59  ;;  %v1788_v19 = vadd.s32 %v3394_v55, %v1722_v6  ;;  %5714 = vst [vmem:[#allocation93_spill] sm:$0xff] %v4208_v33  ;;  %v4211_v14 = vmax.f32 %v994_v34, %v4201_v39  ;;  %5715 = vst [vmem:[#allocation94_spill] sm:$0xff] %v4214_v2  ;;  %v4219_v60 = vpop.f32.mrb[41].mxu1  ;;  %v4225_v37 = vpop.f32.mrb[42].mxu0 }
 0x15f   : > { %v2263_v21 = vmul.f32 %v2740_v1, %v4201_v39  ;;  %vm1883_vm5 = vcmp.eq.s32.totalorder %v4159_v27, %v3410_v62  ;;  %v1021_v16 = vmax.f32 %v4208_v33, %v1032_v57  ;;  %5716 = vst [vmem:[#allocation95_spill] sm:$0xff] %v4219_v60  ;;  %v4222_v13 = vmax.f32 %v1063_v25, %v4214_v2  ;;  %v4231_v39 = vpop.f32.mrb[42].mxu1  ;;  %v4237_v33 = vpop.f32.mrb[43].mxu0 }
 0x160   : > { %v2264_v6 = vmul.f32 %v2741_v0, %v4214_v2  ;;  %5717 = vst [vmem:[#allocation96_spill] sm:$0xff] %v4225_v37  ;;  %v1723_v34 = vadd.s32 192, %v3390_v53  ;;  %v4229_v1 = vmax.f32 %v1099_v54, %v4219_v60  ;;  %5718 = vst [vmem:[#allocation97_spill] sm:$0xff] %v4231_v39  ;;  %v4234_v3 = vmax.f32 %v995_v41, %v4225_v37  ;;  %v4240_v0 = vpop.f32.mrb[43].mxu1 }
 0x161   : > { %v2370_v58 = vadd.f32 %v2369_v36, %v2263_v21  ;;  %v2265_v57 = vmul.f32 %v2742_v56, %v4225_v37  ;;  %5719 = vst [vmem:[#allocation98_spill] sm:$0xff] %v4237_v33  ;;  %v1023_v25 = vmax.f32 %v1021_v16, %v4231_v39  ;;  %5720 = vst [vmem:[#allocation99_spill] sm:$0xff] %v4240_v0  ;;  %v1724_v41 = vadd.s32 200, %v3390_v53 }
 0x162   : > { %v2439_v2 = vadd.f32 %v2438_v11, %v2264_v6  ;;  %v4243_v22 = vmax.f32 %v1064_v5, %v4237_v33  ;;  %v2266_v54 = vmul.f32 %v2743_v44, %v4237_v33  ;;  %vm1884_vm6 = vcmp.eq.s32.totalorder %v1788_v19, %v3404_v59 }
 0x163   : > { %v2371_v36 = vadd.f32 %v2370_v58, %v2265_v57  ;;  %vm1885_vm7 = vcmp.eq.s32.totalorder %v1788_v19, %v3410_v62  ;;  %v4255_v11 = vsel %vm1923_vm2, 1.0, %v5652_v35  ;;  %v2744_v44 = vsel %vm1882_vm4, 1.0, %v5652_v35 }
 0x164   : > { %5721 = vst [vmem:[#allocation100_spill] sm:$0xff] %v4255_v11  ;;  %v2440_v5 = vadd.f32 %v2439_v2, %v2266_v54  ;;  %v1789_v58 = vadd.s32 %v3394_v55, %v1723_v34  ;;  %v4266_v21 = vsel %vm1924_vm3, 1.0, %v5652_v35  ;;  %vm1925_vm8 = vcmp.eq.s32.totalorder %v4127_v15, %v3410_v62  ;;  %v4281_v16 = vpop.f32.mrb[44].mxu0  ;;  %v4287_v34 = vpop.f32.mrb[44].mxu1 }
 0x165   : > { %5722 = vst [vmem:[#allocation101_spill] sm:$0xff] %v4266_v21  ;;  %v4271_v49 = vadd.s32 %v3394_v55, %v1744_v9  ;;  %v2745_v2 = vsel %vm1883_vm5, 1.0, %v5652_v35  ;;  %vm1926_vm9 = vcmp.eq.s32.totalorder %v4194_v40, %v3404_v59  ;;  %vm1927_vm10 = vcmp.eq.s32.totalorder %v4194_v40, %v3410_v62  ;;  %5723 = vst [vmem:[#allocation102_spill] sm:$0xff] %v4281_v16  ;;  %v4292_v54 = vpop.f32.mrb[45].mxu0  ;;  %v4298_v37 = vpop.f32.mrb[45].mxu1 }
 0x166   : > { %v2746_v6 = vsel %vm1884_vm6, 1.0, %v5652_v35  ;;  %v2747_v9 = vsel %vm1885_vm7, 1.0, %v5652_v35  ;;  %5724 = vst [vmem:[#allocation103_spill] sm:$0xff] %v4287_v34  ;;  %v998_v27 = vmax.f32 %v4211_v14, %v4281_v16  ;;  %v2267_v57 = vmul.f32 %v2744_v44, %v4281_v16  ;;  %5725 = vst [vmem:[#allocation104_spill] sm:$0xff] %v4292_v54  ;;  %v4303_v60 = vpop.f32.mrb[46].mxu0  ;;  %v4307_v44 = vpop.f32.mrb[46].mxu1 }
 0x167   : > { %v1790_v56 = vadd.s32 %v3394_v55, %v1724_v41  ;;  %v4296_v33 = vmax.f32 %v1023_v25, %v4287_v34  ;;  %5726 = vst [vmem:[#allocation105_spill] sm:$0xff] %v4298_v37  ;;  %v1067_v19 = vmax.f32 %v4222_v13, %v4292_v54  ;;  %v2268_v39 = vmul.f32 %v2745_v2, %v4292_v54  ;;  %v4312_v34 = vpop.f32.mrb[47].mxu0  ;;  %v4316_v2 = vpop.f32.mrb[47].mxu1 }
 0x168   : > { %5727 = vst [vmem:[#allocation106_spill] sm:$0xff] %v4303_v60  ;;  %vm1886_vm11 = vcmp.eq.s32.totalorder %v1789_v58, %v3404_v59  ;;  %v1725_v14 = vadd.s32 208, %v3390_v53  ;;  %5728 = vst [vmem:[#allocation107_spill] sm:$0xff] %v4307_v44  ;;  %v2372_v16 = vadd.f32 %v2371_v36, %v2267_v57  ;;  %v999_v25 = vmax.f32 %v4234_v3, %v4303_v60 }
 0x169   : > { %v2269_v41 = vmul.f32 %v2746_v6, %v4303_v60  ;;  %5729 = vst [vmem:[#allocation108_spill] sm:$0xff] %v4312_v34  ;;  %5730 = vst [vmem:[#allocation109_spill] sm:$0xff] %v4316_v2  ;;  %v2441_v54 = vadd.f32 %v2440_v5, %v2268_v39  ;;  %v1068_v21 = vmax.f32 %v4243_v22, %v4312_v34  ;;  %v4326_v3 = vsel %vm1925_vm8, 1.0, %v5652_v35 }
 0x16a   : > { %v2270_v11 = vmul.f32 %v2747_v9, %v4312_v34  ;;  %vm1887_vm12 = vcmp.eq.s32.totalorder %v1789_v58, %v3410_v62  ;;  %5731 = vst [vmem:[#allocation110_spill] sm:$0xff] %v4326_v3  ;;  %vm1888_vm13 = vcmp.eq.s32.totalorder %v1790_v56, %v3404_v59  ;;  %v1726_v6 = vadd.s32 216, %v3390_v53 }
 0x16b   : > { %v2373_v36 = vadd.f32 %v2372_v16, %v2269_v41  ;;  %v1745_v39 = vadd.s32 368, %v3390_v53  ;;  %v2748_v22 = vsel %vm1886_vm11, 1.0, %v5652_v35  ;;  %vm1889_vm14 = vcmp.eq.s32.totalorder %v1790_v56, %v3410_v62 }
 0x16c   : > { %v2442_v5 = vadd.f32 %v2441_v54, %v2270_v11  ;;  %v4339_v15 = vsel %vm1926_vm9, 1.0, %v5652_v35  ;;  %v4345_v16 = vsel %vm1927_vm10, 1.0, %v5652_v35  ;;  %v2749_v11 = vsel %vm1887_vm12, 1.0, %v5652_v35  ;;  %v4354_v58 = vpop.f32.mrb[48].mxu0  ;;  %v4357_v54 = vpop.f32.mrb[48].mxu1 }
 0x16d   : > { %5732 = vst [vmem:[#allocation111_spill] sm:$0xff] %v4339_v15  ;;  %5733 = vst [vmem:[#allocation112_spill] sm:$0xff] %v4345_v16  ;;  %v1791_v9 = vadd.s32 %v3394_v55, %v1725_v14  ;;  %vm1928_vm15 = vcmp.eq.s32.totalorder %v4271_v49, %v3404_v59  ;;  %vm1929_vm0 = vcmp.eq.s32.totalorder %v4271_v49, %v3410_v62  ;;  %v1746_v56 = vadd.s32 376, %v3390_v53  ;;  %v4363_v14 = vpop.f32.mrb[49].mxu0  ;;  %v4367_v60 = vpop.f32.mrb[49].mxu1 }
 0x16e   : > { %5734 = vst [vmem:[#allocation113_spill] sm:$0xff] %v4354_v58  ;;  %v2750_v57 = vsel %vm1888_vm13, 1.0, %v5652_v35  ;;  %5735 = vst [vmem:[#allocation114_spill] sm:$0xff] %v4357_v54  ;;  %v4360_v40 = vmax.f32 %v998_v27, %v4354_v58  ;;  %v2271_v41 = vmul.f32 %v2748_v22, %v4354_v58  ;;  %v2751_v13 = vsel %vm1889_vm14, 1.0, %v5652_v35  ;;  %v4376_v27 = vpop.f32.mrb[50].mxu0  ;;  %v4379_v58 = vpop.f32.mrb[50].mxu1 }
 0x16f   : > { %5736 = vst [vmem:[#allocation115_spill] sm:$0xff] %v4363_v14  ;;  %v1792_v34 = vadd.s32 %v3394_v55, %v1726_v6  ;;  %5737 = vst [vmem:[#allocation116_spill] sm:$0xff] %v4367_v60  ;;  %v4370_v16 = vadd.s32 %v3394_v55, %v1745_v39  ;;  %v4373_v15 = vmax.f32 %v1067_v19, %v4363_v14  ;;  %v1727_v22 = vadd.s32 224, %v3390_v53  ;;  %v4385_v29 = vpop.f32.mrb[51].mxu0  ;;  %v4388_v19 = vpop.f32.mrb[51].mxu1 }
 0x170   : > { %v2272_v3 = vmul.f32 %v2749_v11, %v4363_v14  ;;  %5738 = vst [vmem:[#allocation117_spill] sm:$0xff] %v4376_v27  ;;  %5739 = vst [vmem:[#allocation118_spill] sm:$0xff] %v4379_v58  ;;  %v2374_v20 = vadd.f32 %v2373_v36, %v2271_v41  ;;  %v4382_v63 = vmax.f32 %v999_v25, %v4376_v27  ;;  %v1747_v36 = vadd.s32 384, %v3390_v53 }
 0x171   : > { %v2273_v6 = vmul.f32 %v2750_v57, %v4376_v27  ;;  %5740 = vst [vmem:[#allocation119_spill] sm:$0xff] %v4385_v29  ;;  %vm1890_vm1 = vcmp.eq.s32.totalorder %v1791_v9, %v3404_v59  ;;  %5741 = vst [vmem:[#allocation120_spill] sm:$0xff] %v4388_v19  ;;  %v4391_v11 = vmax.f32 %v1068_v21, %v4385_v29  ;;  %v1728_v57 = vadd.s32 232, %v3390_v53 }
 0x172   : > { %v2443_v39 = vadd.f32 %v2442_v5, %v2272_v3  ;;  %v2274_v14 = vmul.f32 %v2751_v13, %v4385_v29  ;;  %vm1891_vm2 = vcmp.eq.s32.totalorder %v1791_v9, %v3410_v62  ;;  %vm1892_vm3 = vcmp.eq.s32.totalorder %v1792_v34, %v3404_v59 }
 0x173   : > { %v2375_v25 = vadd.f32 %v2374_v20, %v2273_v6  ;;  %v2752_v27 = vsel %vm1890_vm1, 1.0, %v5652_v35  ;;  %vm1893_vm4 = vcmp.eq.s32.totalorder %v1792_v34, %v3410_v62  ;;  %v1793_v3 = vadd.s32 %v3394_v55, %v1727_v22 }
 0x174   : > { %v2444_v41 = vadd.f32 %v2443_v39, %v2274_v14  ;;  %v4405_v21 = vsel %vm1928_vm15, 1.0, %v5652_v35  ;;  %v4411_v20 = vsel %vm1929_vm0, 1.0, %v5652_v35  ;;  %v4414_v13 = vadd.s32 %v3394_v55, %v1746_v56  ;;  %v4422_v9 = vpop.f32.mrb[52].mxu0  ;;  %v4425_v49 = vpop.f32.mrb[52].mxu1 }
 0x175   : > { %5742 = vst [vmem:[#allocation121_spill] sm:$0xff] %v4405_v21  ;;  %5743 = vst [vmem:[#allocation122_spill] sm:$0xff] %v4411_v20  ;;  %v2753_v5 = vsel %vm1891_vm2, 1.0, %v5652_v35  ;;  %vm1930_vm5 = vcmp.eq.s32.totalorder %v4370_v16, %v3404_v59  ;;  %vm1931_vm6 = vcmp.eq.s32.totalorder %v4370_v16, %v3410_v62  ;;  %v1748_v34 = vadd.s32 392, %v3390_v53  ;;  %v4430_v6 = vpop.f32.mrb[53].mxu0  ;;  %v4434_v20 = vpop.f32.mrb[53].mxu1 }
 0x176   : > { %5744 = vst [vmem:[#allocation123_spill] sm:$0xff] %v4422_v9  ;;  %v2754_v14 = vsel %vm1892_vm3, 1.0, %v5652_v35  ;;  %5745 = vst [vmem:[#allocation124_spill] sm:$0xff] %v4425_v49  ;;  %v1002_v56 = vmax.f32 %v4360_v40, %v4422_v9  ;;  %v2275_v22 = vmul.f32 %v2752_v27, %v4422_v9  ;;  %v2755_v39 = vsel %vm1893_vm4, 1.0, %v5652_v35  ;;  %v4442_v52 = vpop.f32.mrb[54].mxu0  ;;  %v4445_v40 = vpop.f32.mrb[54].mxu1 }
 0x177   : > { %5746 = vst [vmem:[#allocation125_spill] sm:$0xff] %v4430_v6  ;;  %v1794_v29 = vadd.s32 %v3394_v55, %v1728_v57  ;;  %5747 = vst [vmem:[#allocation126_spill] sm:$0xff] %v4434_v20  ;;  %v4437_v21 = vadd.s32 %v3394_v55, %v1747_v36  ;;  %v1071_v24 = vmax.f32 %v4373_v15, %v4430_v6  ;;  %v4450_v42 = vpop.f32.mrb[55].mxu0  ;;  %v1729_v36 = vadd.s32 240, %v3390_v53  ;;  %v4453_v18 = vpop.f32.mrb[55].mxu1 }
 0x178   : > { %v2276_v8 = vmul.f32 %v2753_v5, %v4430_v6  ;;  %5748 = vst [vmem:[#allocation127_spill] sm:$0xff] %v4442_v52  ;;  %vm1894_vm7 = vcmp.eq.s32.totalorder %v1793_v3, %v3404_v59  ;;  %5749 = vst [vmem:[#allocation128_spill] sm:$0xff] %v4445_v40  ;;  %v2376_v27 = vadd.f32 %v2375_v25, %v2275_v22  ;;  %v1730_v25 = vadd.s32 248, %v3390_v53 }
 0x179   : > { %v1003_v57 = vmax.f32 %v4382_v63, %v4442_v52  ;;  %v2277_v9 = vmul.f32 %v2754_v14, %v4442_v52  ;;  %5750 = vst [vmem:[#allocation129_spill] sm:$0xff] %v4450_v42  ;;  %5751 = vst [vmem:[#allocation130_spill] sm:$0xff] %v4453_v18  ;;  %v1072_v5 = vmax.f32 %v4391_v11, %v4450_v42  ;;  %v2756_v11 = vsel %vm1894_vm7, 1.0, %v5652_v35 }
 0x17a   : > { %v2445_v15 = vadd.f32 %v2444_v41, %v2276_v8  ;;  %v2278_v6 = vmul.f32 %v2755_v39, %v4450_v42  ;;  %vm1895_vm8 = vcmp.eq.s32.totalorder %v1793_v3, %v3410_v62  ;;  %vm1932_vm9 = vcmp.eq.s32.totalorder %v4414_v13, %v3404_v59 }
 0x17b   : > { %v2377_v63 = vadd.f32 %v2376_v27, %v2277_v9  ;;  %vm1896_vm10 = vcmp.eq.s32.totalorder %v1794_v29, %v3404_v59  ;;  %v4467_v8 = vsel %vm1930_vm5, 1.0, %v5652_v35  ;;  %vm1897_vm11 = vcmp.eq.s32.totalorder %v1794_v29, %v3410_v62 }
 0x17c   : > { %5752 = vst [vmem:[#allocation131_spill] sm:$0xff] %v4467_v8  ;;  %v2446_v41 = vadd.f32 %v2445_v15, %v2278_v6  ;;  %v4477_v9 = vsel %vm1931_vm6, 1.0, %v5652_v35  ;;  %vm1933_vm12 = vcmp.eq.s32.totalorder %v4414_v13, %v3410_v62  ;;  %v2757_v14 = vsel %vm1895_vm8, 1.0, %v5652_v35  ;;  %v4489_v3 = vpop.f32.mrb[56].mxu0  ;;  %v4492_v39 = vpop.f32.mrb[56].mxu1 }
 0x17d   : > { %5753 = vst [vmem:[#allocation132_spill] sm:$0xff] %v4477_v9  ;;  %v1795_v22 = vadd.s32 %v3394_v55, %v1729_v36  ;;  %v4484_v6 = vsel %vm1932_vm9, 1.0, %v5652_v35  ;;  %vm1934_vm13 = vcmp.eq.s32.totalorder %v4437_v21, %v3404_v59  ;;  %v1814_v29 = vadd.s32 %v3394_v55, %v1748_v34  ;;  %5755 = vst [vmem:[#allocation134_spill] sm:$0xff] %v4489_v3  ;;  %v4496_v42 = vpop.f32.mrb[57].mxu0 }
 0x17e   : > { %5754 = vst [vmem:[#allocation133_spill] sm:$0xff] %v4484_v6  ;;  %v2758_v16 = vsel %vm1896_vm10, 1.0, %v5652_v35  ;;  %5756 = vst [vmem:[#allocation135_spill] sm:$0xff] %v4492_v39  ;;  %v1004_v27 = vmax.f32 %v1002_v56, %v4489_v3  ;;  %v2279_v15 = vmul.f32 %v2756_v11, %v4489_v3  ;;  %v2759_v36 = vsel %vm1897_vm11, 1.0, %v5652_v35  ;;  %v4500_v6 = vpop.f32.mrb[57].mxu1  ;;  %v4507_v56 = vpop.f32.mrb[58].mxu0 }
 0x17f   : > { %5757 = vst [vmem:[#allocation136_spill] sm:$0xff] %v4496_v42  ;;  %v1796_v52 = vadd.s32 %v3394_v55, %v1730_v25  ;;  %5758 = vst [vmem:[#allocation137_spill] sm:$0xff] %v4500_v6  ;;  %vm1935_vm14 = vcmp.eq.s32.totalorder %v4437_v21, %v3410_v62  ;;  %v1749_v34 = vadd.s32 400, %v3390_v53  ;;  %v1073_v9 = vmax.f32 %v1071_v24, %v4496_v42  ;;  %v4509_v11 = vpop.f32.mrb[58].mxu1  ;;  %v4513_v18 = vpop.f32.mrb[59].mxu0 }
 0x180   : > { %v2280_v8 = vmul.f32 %v2757_v14, %v4496_v42  ;;  %5759 = vst [vmem:[#allocation138_spill] sm:$0xff] %v4507_v56  ;;  %5760 = vst [vmem:[#allocation139_spill] sm:$0xff] %v4509_v11  ;;  %v2378_v3 = vadd.f32 %v2377_v63, %v2279_v15  ;;  %v1005_v39 = vmax.f32 %v1003_v57, %v4507_v56  ;;  %v4516_v6 = vpop.f32.mrb[59].mxu1  ;;  %v4525_v57 = vsel %vm1933_vm12, 1.0, %v5652_v35 }
 0x181   : > { %v2281_v25 = vmul.f32 %v2758_v16, %v4507_v56  ;;  %5761 = vst [vmem:[#allocation140_spill] sm:$0xff] %v4513_v18  ;;  %vm1898_vm15 = vcmp.eq.s32.totalorder %v1795_v22, %v3404_v59  ;;  %5762 = vst [vmem:[#allocation141_spill] sm:$0xff] %v4516_v6  ;;  %v1074_v24 = vmax.f32 %v1072_v5, %v4513_v18  ;;  %v4538_v13 = vsel %vm1934_vm13, 1.0, %v5652_v35 }
 0x182   : > { %v2447_v7 = vadd.f32 %v2446_v41, %v2280_v8  ;;  %v2282_v14 = vmul.f32 %v2759_v36, %v4513_v18  ;;  %vm1899_vm0 = vcmp.eq.s32.totalorder %v1795_v22, %v3410_v62  ;;  %vm1936_vm1 = vcmp.eq.s32.totalorder %v1814_v29, %v3404_v59 }
 0x183   : > { %v2379_v63 = vadd.f32 %v2378_v3, %v2281_v25  ;;  %vm1900_vm2 = vcmp.eq.s32.totalorder %v1796_v52, %v3404_v59  ;;  %v5763_v8 = vmax.f32 %v4240_v0, %v4229_v1  ;;  %v2760_v16 = vsel %vm1898_vm15, 1.0, %v5652_v35 }
 0x184   : > { %v2448_v5 = vadd.f32 %v2447_v7, %v2282_v14  ;;  %vm1901_vm3 = vcmp.eq.s32.totalorder %v1796_v52, %v3410_v62  ;;  %v4544_v22 = vsel %vm1935_vm14, 1.0, %v5652_v35  ;;  %vm1937_vm4 = vcmp.eq.s32.totalorder %v1814_v29, %v3410_v62  ;;  %v4553_v15 = vpop.f32.mrb[60].mxu0  ;;  %v4556_v25 = vpop.f32.mrb[60].mxu1 }
 0x185   : > { %v1092_v41 = vmax.f32 %v5763_v8, %v1074_v24  ;;  %5764 = vst [vmem:[#allocation142_spill] sm:$0xff] %v4544_v22  ;;  %v2761_v7 = vsel %vm1899_vm0, 1.0, %v5652_v35  ;;  %v4549_v1 = vsel %vm1936_vm1, 1.0, %v5652_v35  ;;  %v1815_v52 = vadd.s32 %v3394_v55, %v1749_v34  ;;  %5766 = vst [vmem:[#allocation144_spill] sm:$0xff] %v4553_v15  ;;  %v4561_v14 = vpop.f32.mrb[61].mxu0  ;;  %v4564_v18 = vpop.f32.mrb[61].mxu1 }
 0x186   : > { %5765 = vst [vmem:[#allocation143_spill] sm:$0xff] %v4549_v1  ;;  %v2762_v36 = vsel %vm1900_vm2, 1.0, %v5652_v35  ;;  %5767 = vst [vmem:[#allocation145_spill] sm:$0xff] %v4556_v25  ;;  %v1750_v21 = vadd.s32 408, %v3390_v53  ;;  %v1006_v24 = vmax.f32 %v1004_v27, %v4553_v15  ;;  %v2283_v29 = vmul.f32 %v2760_v16, %v4553_v15  ;;  %v4574_v27 = vpop.f32.mrb[62].mxu1 }
 0x187   : > { %v1094_v3 = vmax.f32 %v1092_v41, %v4298_v37  ;;  %5768 = vst [vmem:[#allocation146_spill] sm:$0xff] %v4561_v14  ;;  %v2763_v8 = vsel %vm1901_vm3, 1.0, %v5652_v35  ;;  %5769 = vst [vmem:[#allocation147_spill] sm:$0xff] %v4564_v18  ;;  %v4567_v34 = vsel %vm1937_vm4, 1.0, %v5652_v35  ;;  %v1075_v56 = vmax.f32 %v1073_v9, %v4561_v14  ;;  %v4572_v37 = vpop.f32.mrb[62].mxu0 }
 0x188   : > { %5770 = vst [vmem:[#allocation148_spill] sm:$0xff] %v4567_v34  ;;  %v2284_v42 = vmul.f32 %v2761_v7, %v4561_v14  ;;  %5771 = vst [vmem:[#allocation149_spill] sm:$0xff] %v4572_v37  ;;  %v5773_v16 = vmax.f32 %v4296_v33, %v4307_v44  ;;  %v2380_v0 = vadd.f32 %v2379_v63, %v2283_v29  ;;  %v4581_v34 = vpop.f32.mrb[63].mxu0 }
 0x189   : > { %v1096_v41 = vmax.f32 %v1094_v3, %v4316_v2  ;;  %5772 = vst [vmem:[#allocation150_spill] sm:$0xff] %v4574_v27  ;;  %v1007_v1 = vmax.f32 %v1005_v39, %v4572_v37  ;;  %v2285_v22 = vmul.f32 %v2762_v36, %v4572_v37  ;;  %5774 = vst [vmem:[#allocation151_spill] sm:$0xff] %v4581_v34  ;;  %v4583_v3 = vpop.f32.mrb[63].mxu1 }
 0x18a   : > { %v1029_v15 = vmax.f32 %v5773_v16, %v1006_v24  ;;  %5775 = vst [vmem:[#allocation152_spill] sm:$0xff] %v4583_v3  ;;  %vm1938_vm5 = vcmp.eq.s32.totalorder %v1815_v52, %v3404_v59  ;;  %v2449_v7 = vadd.f32 %v2448_v5, %v2284_v42  ;;  %v2286_v14 = vmul.f32 %v2763_v8, %v4581_v34 }
 0x18b   : > { %v1098_v9 = vmax.f32 %v1096_v41, %v1075_v56  ;;  %v2287_v2 = vmul.f32 %v3498_v46, %v3456_v26  ;;  %v1816_v33 = vadd.s32 %v3394_v55, %v1750_v21  ;;  %v2381_v24 = vadd.f32 %v2380_v0, %v2285_v22 }
 0x18c   : > { %v1031_v63 = vmax.f32 %v1029_v15, %v1007_v1  ;;  %v2288_v39 = vmul.f32 %v3503_v47, %v3462_v28  ;;  %vm1939_vm6 = vcmp.eq.s32.totalorder %v1815_v52, %v3410_v62  ;;  %v2450_v29 = vadd.f32 %v2449_v7, %v2286_v14  ;;  %v5788_v28 = vld [vmem:[#allocation29_spill] sm:$0xff] }
 0x18d   : > { %v1100_v36 = vmax.f32 %v1098_v9, %v4581_v34  ;;  %v2289_v42 = vmul.f32 %v3513_v50, %v3472_v32  ;;  %v4597_v56 = vsel %vm1938_vm5, 1.0, %v5652_v35  ;;  %v2382_v5 = vadd.f32 %v2381_v24, %v2287_v2 }
 0x18e   : > { %v1033_v46 = vmax.f32 %v1031_v63, %v4357_v54  ;;  %v2290_v0 = vmul.f32 %v3518_v51, %v3482_v38  ;;  %v1751_v22 = vadd.s32 416, %v3390_v53  ;;  %v2451_v47 = vadd.f32 %v2450_v29, %v2288_v39 }
 0x18f   : > { %v1102_v1 = vmax.f32 %v1100_v36, %v4367_v60  ;;  %v2291_v52 = vmul.f32 %v3596_v30, %v3534_v61  ;;  %v4607_v15 = vsel %vm1939_vm6, 1.0, %v5652_v35  ;;  %v2383_v50 = vadd.f32 %v2382_v5, %v2289_v42  ;;  %v5776_v36 = vld [vmem:[#allocation32_spill] sm:$0xff]  ;;  %v5777_v5 = vld [vmem:[#allocation130_spill] sm:$0xff] }
 0x190   : > { %v1034_v21 = vmax.f32 %v4379_v58, %v1033_v46  ;;  %v2292_v2 = vmul.f32 %v3601_v43, %v3545_v4  ;;  %vm1940_vm7 = vcmp.eq.s32.totalorder %v1816_v33, %v3404_v59  ;;  %v2452_v51 = vadd.f32 %v2451_v47, %v2290_v0  ;;  %v5778_v0 = vld [vmem:[#allocation21_spill] sm:$0xff] }
 0x191   : > { %v1103_v14 = vmax.f32 %v4388_v19, %v1102_v1  ;;  %v2293_v8 = vmul.f32 %v3610_v31, %v3553_v10  ;;  %vm1941_vm8 = vcmp.eq.s32.totalorder %v1816_v33, %v3410_v62  ;;  %v2384_v30 = vadd.f32 %v2383_v50, %v2291_v52  ;;  %v5780_v52 = vld [vmem:[#allocation135_spill] sm:$0xff] }
 0x192   : > { %v1035_v41 = vmax.f32 %v4425_v49, %v1034_v21  ;;  %v2294_v16 = vmul.f32 %v3664_v45, %v3562_v17  ;;  %v1817_v9 = vadd.s32 %v3394_v55, %v1751_v22  ;;  %v2453_v7 = vadd.f32 %v2452_v51, %v2292_v2  ;;  %v5779_v22 = vld [vmem:[#allocation33_spill] sm:$0xff]  ;;  %v5781_v21 = vld [vmem:[#allocation23_spill] sm:$0xff]  ;;  %v5782_v2 = vld [vmem:[#allocation34_spill] sm:$0xff] }
 0x193   : > { %v1104_v43 = vmax.f32 %v4434_v20, %v1103_v14  ;;  %v2295_v63 = vmul.f32 %v3743_v23, %v3612_v48  ;;  %v4625_v24 = vsel %vm1940_vm7, 1.0, %v5652_v35  ;;  %v2385_v31 = vadd.f32 %v2384_v30, %v2293_v8  ;;  %v5783_v8 = vld [vmem:[#allocation137_spill] sm:$0xff]  ;;  %v5814_v48 = vld [vmem:[#allocation62_spill] sm:$0xff] }
 0x194   : > { %v1036_v39 = vmax.f32 %v4445_v40, %v1035_v41  ;;  %v2296_v29 = vmul.f32 %v5776_v36, %v3630_v12  ;;  %v1752_v42 = vadd.s32 424, %v3390_v53  ;;  %v2454_v45 = vadd.f32 %v2453_v7, %v2294_v16  ;;  %v5784_v41 = vld [vmem:[#allocation25_spill] sm:$0xff]  ;;  %v5785_v16 = vld [vmem:[#allocation43_spill] sm:$0xff]  ;;  %v5812_v12 = vld [vmem:[#allocation60_spill] sm:$0xff] }
 0x195   : > { %v1105_v46 = vmax.f32 %v5777_v5, %v1104_v43  ;;  %v2297_v47 = vmul.f32 %v5779_v22, %v5778_v0  ;;  %v4637_v23 = vsel %vm1941_vm8, 1.0, %v5652_v35  ;;  %v2386_v1 = vadd.f32 %v2385_v31, %v2295_v63  ;;  %v5786_v36 = vld [vmem:[#allocation27_spill] sm:$0xff]  ;;  %v5787_v63 = vld [vmem:[#allocation44_spill] sm:$0xff] }
 0x196   : > { %v1037_v50 = vmax.f32 %v5780_v52, %v1036_v39  ;;  %v2298_v51 = vmul.f32 %v5782_v2, %v5781_v21  ;;  %vm1942_vm9 = vcmp.eq.s32.totalorder %v1817_v9, %v3404_v59  ;;  %v2455_v14 = vadd.f32 %v2454_v45, %v2296_v29  ;;  %v5789_v29 = vld [vmem:[#allocation45_spill] sm:$0xff]  ;;  %v5808_v0 = vld [vmem:[#allocation56_spill] sm:$0xff] }
 0x197   : > { %v1106_v30 = vmax.f32 %v5783_v8, %v1105_v46  ;;  %v2299_v7 = vmul.f32 %v5785_v16, %v5784_v41  ;;  %vm1943_vm10 = vcmp.eq.s32.totalorder %v1817_v9, %v3410_v62  ;;  %v2387_v43 = vadd.f32 %v2386_v1, %v2297_v47  ;;  %v5790_v47 = vld [vmem:[#allocation31_spill] sm:$0xff]  ;;  %v5791_v1 = vld [vmem:[#allocation54_spill] sm:$0xff] }
 0x198   : > { %v1038_v33 = vmax.f32 %v4509_v11, %v1037_v50  ;;  %v2300_v31 = vmul.f32 %v5787_v63, %v5786_v36  ;;  %v1818_v39 = vadd.s32 %v3394_v55, %v1752_v42  ;;  %v2456_v22 = vadd.f32 %v2455_v14, %v2298_v51  ;;  %v5792_v51 = vld [vmem:[#allocation36_spill] sm:$0xff]  ;;  %v5793_v14 = vld [vmem:[#allocation63_spill] sm:$0xff]  ;;  %v5799_v36 = vld [vmem:[#allocation82_spill] sm:$0xff] }
 0x199   : > { %v1107_v2 = vmax.f32 %v4516_v6, %v1106_v30  ;;  %v2301_v45 = vmul.f32 %v5789_v29, %v5788_v28  ;;  %v4655_v46 = vsel %vm1942_vm9, 1.0, %v5652_v35  ;;  %v2388_v16 = vadd.f32 %v2387_v43, %v2299_v7  ;;  %v5794_v7 = vld [vmem:[#allocation38_spill] sm:$0xff]  ;;  %v5795_v43 = vld [vmem:[#allocation64_spill] sm:$0xff] }
 0x19a   : > { %v1039_v9 = vmax.f32 %v4556_v25, %v1038_v33  ;;  %v2302_v50 = vmul.f32 %v5791_v1, %v5790_v47  ;;  %v4661_v26 = vsel %vm1943_vm10, 1.0, %v5652_v35  ;;  %v2457_v63 = vadd.f32 %v2456_v22, %v2300_v31  ;;  %v5796_v28 = vld [vmem:[#allocation40_spill] sm:$0xff]  ;;  %v5797_v31 = vld [vmem:[#allocation73_spill] sm:$0xff] }
 0x19b   : > { %v1108_v42 = vmax.f32 %v4564_v18, %v1107_v2  ;;  %v2303_v30 = vmul.f32 %v5793_v14, %v5792_v51  ;;  %v1753_v29 = vadd.s32 432, %v3390_v53  ;;  %v2389_v34 = vadd.f32 %v2388_v16, %v2301_v45  ;;  %v5798_v51 = vld [vmem:[#allocation42_spill] sm:$0xff] }
 0x19c   : > { %v1040_v37 = vmax.f32 %v4574_v27, %v1039_v9  ;;  %v2304_v33 = vmul.f32 %v5795_v43, %v5794_v7  ;;  %vm1944_vm11 = vcmp.eq.s32.totalorder %v1818_v39, %v3404_v59  ;;  %v2458_v1 = vadd.f32 %v2457_v63, %v2302_v50  ;;  %v5800_v43 = vld [vmem:[#allocation47_spill] sm:$0xff] }
 0x19d   : > { %v1109_v47 = vmax.f32 %v4583_v3, %v1108_v42  ;;  %v2305_v22 = vmul.f32 %v5797_v31, %v5796_v28  ;;  %vm1945_vm12 = vcmp.eq.s32.totalorder %v1818_v39, %v3410_v62  ;;  %v2390_v2 = vadd.f32 %v2389_v34, %v2303_v30  ;;  %v5801_v7 = vld [vmem:[#allocation91_spill] sm:$0xff]  ;;  %v5802_v3 = vld [vmem:[#allocation49_spill] sm:$0xff]  ;;  %v5803_v31 = vld [vmem:[#allocation100_spill] sm:$0xff] }
 0x19e   : > { %v1041_v14 = vrot.slane %v1040_v37, 4  ;;  %v2306_v45 = vmul.f32 %v5799_v36, %v5798_v51  ;;  %v1754_v16 = vadd.s32 440, %v3390_v53  ;;  %v2459_v9 = vadd.f32 %v2458_v1, %v2304_v33  ;;  %v5804_v51 = vld [vmem:[#allocation51_spill] sm:$0xff]  ;;  %v5805_v33 = vld [vmem:[#allocation101_spill] sm:$0xff]  ;;  %v5811_v39 = vld [vmem:[#allocation112_spill] sm:$0xff] }
 0x19f   : > { %v1110_v41 = vrot.slane %v1109_v47, 4  ;;  %v2307_v21 = vmul.f32 %v5801_v7, %v5800_v43  ;;  %v1819_v50 = vadd.s32 %v3394_v55, %v1753_v29  ;;  %v2391_v63 = vadd.f32 %v2390_v2, %v2305_v22  ;;  %v5806_v22 = vld [vmem:[#allocation53_spill] sm:$0xff]  ;;  %v5807_v2 = vld [vmem:[#allocation110_spill] sm:$0xff] }
 0x1a0   : > { %v1042_v42 = vmax.f32 %v1040_v37, %v1041_v14  ;;  %v2308_v28 = vmul.f32 %v5803_v31, %v5802_v3  ;;  %v4686_v34 = vsel %vm1944_vm11, 1.0, %v5652_v35  ;;  %v2460_v36 = vadd.f32 %v2459_v9, %v2306_v45  ;;  %v5809_v45 = vld [vmem:[#allocation111_spill] sm:$0xff] }
 0x1a1   : > { %v1111_v30 = vmax.f32 %v1109_v47, %v1110_v41  ;;  %v2309_v1 = vmul.f32 %v5805_v33, %v5804_v51  ;;  %v4693_v7 = vsel %vm1945_vm12, 1.0, %v5652_v35  ;;  %v2392_v29 = vadd.f32 %v2391_v63, %v2307_v21  ;;  %v5810_v33 = vld [vmem:[#allocation58_spill] sm:$0xff] }
 0x1a2   : > { %v1043_v37 = vrot.slane %v1042_v42, 2  ;;  %v2310_v14 = vmul.f32 %v5807_v2, %v5806_v22  ;;  %v1820_v31 = vadd.s32 %v3394_v55, %v1754_v16  ;;  %v2461_v3 = vadd.f32 %v2460_v36, %v2308_v28  ;;  %v5813_v2 = vld [vmem:[#allocation121_spill] sm:$0xff] }
 0x1a3   : > { %v1112_v43 = vrot.slane %v1111_v30, 2  ;;  %v2311_v41 = vmul.f32 %v5809_v45, %v5808_v0  ;;  %vm1946_vm13 = vcmp.eq.s32.totalorder %v1819_v50, %v3404_v59  ;;  %v2393_v47 = vadd.f32 %v2392_v29, %v2309_v1  ;;  %v5815_v45 = vld [vmem:[#allocation122_spill] sm:$0xff] }
 0x1a4   : > { %v1044_v9 = vmax.f32 %v1042_v42, %v1043_v37  ;;  %v2312_v51 = vmul.f32 %v5811_v39, %v5810_v33  ;;  %vm1947_vm14 = vcmp.eq.s32.totalorder %v1819_v50, %v3410_v62  ;;  %v2462_v21 = vadd.f32 %v2461_v3, %v2310_v14  ;;  %v5816_v29 = vld [vmem:[#allocation66_spill] sm:$0xff]  ;;  %v5817_v37 = vld [vmem:[#allocation131_spill] sm:$0xff]  ;;  %v5818_v14 = vld [vmem:[#allocation68_spill] sm:$0xff] }
 0x1a5   : > { %v1113_v63 = vmax.f32 %v1111_v30, %v1112_v43  ;;  %v2313_v22 = vmul.f32 %v5813_v2, %v5812_v12  ;;  %v1755_v28 = vadd.s32 448, %v3390_v53  ;;  %v2394_v16 = vadd.f32 %v2393_v47, %v2311_v41  ;;  %v5819_v41 = vld [vmem:[#allocation132_spill] sm:$0xff]  ;;  %v5880_v33 = vld [vmem:[#allocation10_spill] sm:$0xff]  ;;  %v5901_v12 = vld [vmem:[#allocation55_spill] sm:$0xff] }
 0x1a6   : > { %v1045_v36 = vrot.slane %v1044_v9, 1  ;;  %v2314_v0 = vmul.f32 %v5815_v45, %v5814_v48  ;;  %v2463_v17 = vadd.f32 %v2462_v21, %v2312_v51  ;;  %v1756_v42 = vadd.s32 456, %v3390_v53  ;;  %v5820_v45 = vld [vmem:[#allocation70_spill] sm:$0xff] }
 0x1a7   : > { %v1114_v1 = vrot.slane %v1113_v63, 1  ;;  %v2315_v39 = vmul.f32 %v5817_v37, %v5816_v29  ;;  %v4715_v3 = vsel %vm1946_vm13, 1.0, %v5652_v35  ;;  %v2395_v43 = vadd.f32 %v2394_v16, %v2313_v22  ;;  %v5821_v37 = vld [vmem:[#allocation133_spill] sm:$0xff]  ;;  %v5822_v16 = vld [vmem:[#allocation72_spill] sm:$0xff] }
 0x1a8   : > { %v4717_v30 = vmax.f32 %v1044_v9, %v1045_v36  ;;  %v2316_v47 = vmul.f32 %v5819_v41, %v5818_v14  ;;  %v4724_v51 = vsel %vm1947_vm14, 1.0, %v5652_v35  ;;  %v2464_v21 = vadd.f32 %v2463_v17, %v2314_v0  ;;  %v5823_v17 = vld [vmem:[#allocation75_spill] sm:$0xff] }
 0x1a9   : > { %v4726_v2 = vmax.f32 %v1113_v63, %v1114_v1  ;;  %v2317_v29 = vmul.f32 %v5821_v37, %v5820_v45  ;;  %vm1948_vm15 = vcmp.eq.s32.totalorder %v1820_v31, %v3404_v59  ;;  %v1821_v22 = vadd.s32 %v3394_v55, %v1755_v28  ;;  %v5824_v37 = vld [vmem:[#allocation77_spill] sm:$0xff]  ;;  %v5825_v45 = vld [vmem:[#allocation142_spill] sm:$0xff] }
 0x1aa   : > { %v2396_v9 = vadd.f32 %v2395_v43, %v2315_v39  ;;  %v2318_v36 = vmul.f32 %v4525_v57, %v5822_v16  ;;  %v2465_v41 = vadd.f32 %v2464_v21, %v2316_v47  ;;  %v1822_v14 = vadd.s32 %v3394_v55, %v1756_v42  ;;  %v5826_v39 = vld [vmem:[#allocation79_spill] sm:$0xff]  ;;  %v5879_v16 = vld [vmem:[#allocation9_spill] sm:$0xff] }
 0x1ab   : > { %v2319_v0 = vmul.f32 %v4538_v13, %v5823_v17  ;;  %v1757_v1 = vadd.s32 464, %v3390_v53  ;;  %v2320_v48 = vmul.f32 %v5825_v45, %v5824_v37  ;;  %v2810_v28 = vsel %vm1948_vm15, 1.0, %v5652_v35  ;;  %v5827_v43 = vld [vmem:[#allocation143_spill] sm:$0xff]  ;;  %v5828_v13 = vld [vmem:[#allocation81_spill] sm:$0xff]  ;;  %v5830_v37 = vld [vmem:[#allocation84_spill] sm:$0xff] }
 0x1ac   : > { %v2397_v63 = vadd.f32 %v2396_v9, %v2317_v29  ;;  %vm1949_vm0 = vcmp.eq.s32.totalorder %v1820_v31, %v3410_v62  ;;  %v2466_v57 = vadd.f32 %v2465_v41, %v2318_v36  ;;  %v2321_v42 = vmul.f32 %v5827_v43, %v5826_v39  ;;  %v5829_v29 = vld [vmem:[#allocation148_spill] sm:$0xff]  ;;  %v5831_v39 = vld [vmem:[#allocation86_spill] sm:$0xff] }
 0x1ad   : > { %vm1950_vm1 = vcmp.eq.s32.totalorder %v1821_v22, %v3404_v59  ;;  %vm1951_vm2 = vcmp.eq.s32.totalorder %v1821_v22, %v3410_v62  ;;  %v2322_v21 = vmul.f32 %v5829_v29, %v5828_v13  ;;  %vm1952_vm3 = vcmp.eq.s32.totalorder %v1822_v14, %v3404_v59  ;;  %v5832_v29 = vld [vmem:[#allocation88_spill] sm:$0xff] }
 0x1ae   : > { %v2398_v47 = vadd.f32 %v2397_v63, %v2319_v0  ;;  %v2467_v9 = vadd.f32 %v2466_v57, %v2320_v48  ;;  %v3224_v45 = vmov 1966171168   ;;  %v2323_v17 = vmul.f32 %v4597_v56, %v5830_v37  ;;  %v5877_v37 = vld [vmem:[#allocation5_spill] sm:$0xff] }
 0x1af   : > { %v1120_v50 = vunpack.c.l.s4 %v3224_v45  ;;  %v1823_v41 = vadd.s32 %v3394_v55, %v1757_v1  ;;  %v1758_v43 = vadd.s32 472, %v3390_v53  ;;  %v2324_v0 = vmul.f32 %v4607_v15, %v5831_v39  ;;  %v5833_v1 = vld [vmem:[#allocation90_spill] sm:$0xff]  ;;  %v5878_v39 = vld [vmem:[#allocation7_spill] sm:$0xff] }
 0x1b0   : > { %v2399_v36 = vadd.f32 %v2398_v47, %v2321_v42  ;;  %v2811_v63 = vsel %vm1949_vm0, 1.0, %v5652_v35  ;;  %v2812_v48 = vsel %vm1950_vm1, 1.0, %v5652_v35  ;;  %v2468_v57 = vadd.f32 %v2467_v9, %v2322_v21  ;;  %v5834_v21 = vld [vmem:[#allocation93_spill] sm:$0xff] }
 0x1b1   : > { %v2325_v45 = vmul.f32 %v4625_v24, %v5832_v29  ;;  %v2813_v56 = vsel %vm1951_vm2, 1.0, %v5652_v35  ;;  %vm1953_vm4 = vcmp.eq.s32.totalorder %v1822_v14, %v3410_v62  ;;  %v2326_v15 = vmul.f32 %v4637_v23, %v5833_v1  ;;  %v5902_v1 = vld [vmem:[#allocation57_spill] sm:$0xff] }
 0x1b2   : > { %v2400_v13 = vadd.f32 %v2399_v36, %v2323_v17  ;;  %v2469_v42 = vadd.f32 %v2468_v57, %v2324_v0  ;;  %v2814_v31 = vsel %vm1952_vm3, 1.0, %v5652_v35  ;;  %v1121_v47 = vunpack.c.0.s8 %v1120_v50  ;;  %v5835_v17 = vld [vmem:[#allocation95_spill] sm:$0xff]  ;;  %v5836_v0 = vld [vmem:[#allocation97_spill] sm:$0xff] }
 0x1b3   : > { %v2327_v9 = vmul.f32 %v4655_v46, %v5834_v21  ;;  %vm1954_vm5 = vcmp.eq.s32.totalorder %v1823_v41, %v3404_v59  ;;  %v1824_v22 = vadd.s32 %v3394_v55, %v1758_v43  ;;  %v2328_v36 = vmul.f32 %v4661_v26, %v5835_v17 }
 0x1b4   : > { %v2401_v24 = vadd.f32 %v2400_v13, %v2325_v45  ;;  %v2470_v29 = vadd.f32 %v2469_v42, %v2326_v15  ;;  %vm1955_vm6 = vcmp.eq.s32.totalorder %v1823_v41, %v3410_v62  ;;  %v1759_v23 = vadd.s32 480, %v3390_v53  ;;  %v5837_v13 = vld [vmem:[#allocation99_spill] sm:$0xff] }
 0x1b5   : > { %v2329_v14 = vmul.f32 %v4686_v34, %v5836_v0  ;;  %v2815_v57 = vsel %vm1953_vm4, 1.0, %v5652_v35  ;;  %v1760_v46 = vadd.s32 488, %v3390_v53  ;;  %v2330_v45 = vmul.f32 %v4693_v7, %v5837_v13  ;;  %v5838_v41 = vld [vmem:[#allocation103_spill] sm:$0xff] }
 0x1b6   : > { %v2402_v50 = vadd.f32 %v2401_v24, %v2327_v9  ;;  %v2471_v43 = vadd.f32 %v2470_v29, %v2328_v36  ;;  %v2816_v21 = vsel %vm1954_vm5, 1.0, %v5652_v35  ;;  %v4788_v26 = vsub.s32 %v1121_v47, %v3390_v53  ;;  %v5839_v9 = vld [vmem:[#allocation105_spill] sm:$0xff] }
 0x1b7   : > { %v2331_v15 = vmul.f32 %v4715_v3, %v5838_v41  ;;  %v2817_v34 = vsel %vm1955_vm6, 1.0, %v5652_v35  ;;  %vm1956_vm7 = vcmp.eq.s32.totalorder %v1824_v22, %v3404_v59  ;;  %v2332_v24 = vmul.f32 %v4724_v51, %v5839_v9 }
 0x1b8   : > { %v2403_v42 = vadd.f32 %v2402_v50, %v2329_v14  ;;  %v2472_v0 = vadd.f32 %v2471_v43, %v2330_v45  ;;  %vm1957_vm8 = vcmp.eq.s32.totalorder %v1824_v22, %v3410_v62  ;;  %v1825_v7 = vadd.s32 %v3394_v55, %v1759_v23  ;;  %v5840_v14 = vld [vmem:[#allocation109_spill] sm:$0xff] }
 0x1b9   : > { %v2333_v29 = vmul.f32 %v2810_v28, %v4307_v44  ;;  %v1826_v36 = vadd.s32 %v3394_v55, %v1760_v46  ;;  %v1761_v3 = vadd.s32 496, %v3390_v53  ;;  %v2334_v50 = vmul.f32 %v2811_v63, %v5840_v14  ;;  %v5892_v14 = vld [vmem:[#allocation30_spill] sm:$0xff] }
 0x1ba   : > { %v2404_v47 = vadd.f32 %v2403_v42, %v2331_v15  ;;  %v2473_v41 = vadd.f32 %v2472_v0, %v2332_v24  ;;  %v1762_v13 = vadd.s32 504, %v3390_v53  ;;  %v5841_v51 = vcombine.low %v4717_v30, %v4726_v2 }
 0x1bb   : > { %v2335_v22 = vmul.f32 %v2812_v48, %v4357_v54  ;;  %v2818_v28 = vsel %vm1956_vm7, 1.0, %v5652_v35  ;;  %v2819_v43 = vsel %vm1957_vm8, 1.0, %v5652_v35  ;;  %v2336_v46 = vmul.f32 %v2813_v56, %v4367_v60  ;;  %v5889_v60 = vld [vmem:[#allocation24_spill] sm:$0xff]  ;;  %v5890_v54 = vld [vmem:[#allocation26_spill] sm:$0xff] }
 0x1bc   : > { %v1125_v45 = vrot.slane %v5841_v51, %v4788_v26  ;;  %v2405_v23 = vadd.f32 %v2404_v47, %v2333_v29  ;;  %v2474_v15 = vadd.f32 %v2473_v41, %v2334_v50  ;;  %vm1958_vm9 = vcmp.eq.s32.totalorder %v1825_v7, %v3404_v59 }
 0x1bd   : > { %vm1959_vm10 = vcmp.eq.s32.totalorder %v1825_v7, %v3410_v62  ;;  %v2337_v0 = vmul.f32 %v2814_v31, %v4379_v58  ;;  %vm1960_vm11 = vcmp.eq.s32.totalorder %v1826_v36, %v3404_v59  ;;  %v1827_v30 = vadd.s32 %v3394_v55, %v1761_v3  ;;  %v4824_v31 = vld [vmem:[#allocation2] sm:$0x3] }
 0x1be   : > { %v2406_v63 = vadd.f32 %v2405_v23, %v2335_v22  ;;  %v2475_v2 = vadd.f32 %v2474_v15, %v2336_v46  ;;  %v2338_v48 = vmul.f32 %v2815_v57, %v4388_v19  ;;  %v4818_v42 = vadd.s32 %v3394_v55, %v1762_v13  ;;  %5842 = vst [vmem:[#allocation32_spill] sm:$0xff] %v4824_v31 }
 0x1bf   : > { %v1132_v56 = vrot.slane %v1125_v45, %v4788_v26  ;;  %v2339_v24 = vmul.f32 %v2816_v21, %v4425_v49  ;;  %v2820_v7 = vsel %vm1958_vm9, 1.0, %v5652_v35  ;;  %v2821_v29 = vsel %vm1959_vm10, 1.0, %v5652_v35 }
 0x1c0   : > { %v2407_v41 = vadd.f32 %v2406_v63, %v2337_v0  ;;  %v2476_v47 = vadd.f32 %v2475_v2, %v2338_v48  ;;  %v2340_v3 = vmul.f32 %v2817_v34, %v4434_v20  ;;  %v2822_v50 = vsel %vm1960_vm11, 1.0, %v5652_v35 }
 0x1c1   : > { %vm1961_vm12 = vcmp.eq.s32.totalorder %v1826_v36, %v3410_v62  ;;  %v2341_v57 = vmul.f32 %v2818_v28, %v4445_v40  ;;  %vm1962_vm13 = vcmp.eq.s32.totalorder %v1827_v30, %v3404_v59  ;;  %vm1963_vm14 = vcmp.eq.s32.totalorder %v1827_v30, %v3410_v62 }
 0x1c2   : > { %v2408_v55 = vadd.f32 %v2407_v41, %v2339_v24  ;;  %v2477_v21 = vadd.f32 %v2476_v47, %v2340_v3  ;;  %v2342_v13 = vmul.f32 %v2819_v43, %v5777_v5  ;;  %vm1964_vm15 = vcmp.eq.s32.totalorder %v4818_v42, %v3404_v59 }
 0x1c3   : > { %v4836_v51 = vmax.f32 %v4824_v31, %v1132_v56  ;;  %v2343_v45 = vmul.f32 %v2820_v7, %v5780_v52  ;;  %v2823_v36 = vsel %vm1961_vm12, 1.0, %v5652_v35  ;;  %v2344_v23 = vmul.f32 %v2821_v29, %v5783_v8  ;;  %v5882_v52 = vld [vmem:[#allocation12_spill] sm:$0xff] }
 0x1c4   : > { %v2409_v34 = vadd.f32 %v2408_v55, %v2341_v57  ;;  %v2478_v22 = vadd.f32 %v2477_v21, %v2342_v13  ;;  %v2824_v28 = vsel %vm1962_vm13, 1.0, %v5652_v35  ;;  %v2345_v15 = vmul.f32 %v2822_v50, %v4509_v11 }
 0x1c5   : > { %v2825_v43 = vsel %vm1963_vm14, 1.0, %v5652_v35  ;;  %v2826_v59 = vsel %vm1964_vm15, 1.0, %v5652_v35  ;;  %v2346_v0 = vmul.f32 %v2823_v36, %v4516_v6  ;;  %v5843_v30 = vsub.s32 0, %v3390_v53  ;;  %v5905_v36 = vld [vmem:[#allocation65_spill] sm:$0xff] }
 0x1c6   : > { %v2410_v46 = vadd.f32 %v2409_v34, %v2343_v45  ;;  %v2479_v63 = vadd.f32 %v2478_v22, %v2344_v23  ;;  %v5844_v48 = vsub.s32 1, %v3390_v53  ;;  %v2347_v24 = vmul.f32 %v2824_v28, %v4556_v25  ;;  %v5845_v45 = vld [vmem:[#allocation15_spill] sm:$0xff]  ;;  %v5846_v22 = vld [vmem:[#allocation17_spill] sm:$0xff] }
 0x1c7   : > { %v4849_v2 = vrot.slane %v4836_v51, %v5843_v30  ;;  %v2348_v29 = vmul.f32 %v2825_v43, %v4564_v18  ;;  %v2349_v3 = vmul.f32 %v2826_v59, %v4574_v27  ;;  %v5881_v18 = vld [vmem:[#allocation11_spill] sm:$0xff]  ;;  %v5918_v28 = vlaneseq }
 0x1c8   : > { %v4854_v56 = vrot.slane %v4836_v51, %v5844_v48  ;;  %v2411_v41 = vadd.f32 %v2410_v46, %v2345_v15  ;;  %v2480_v7 = vadd.f32 %v2479_v63, %v2346_v0  ;;  %v5895_v46 = vld [vmem:[#allocation39_spill] sm:$0xff]  ;;  %v5917_v48 = vld [vmem:[#allocation92_spill] sm:$0xff]  ;;  %vm1965_vm1 = vcmp.eq.s32.totalorder %v4818_v42, %v3410_v62 }
 0x1c9   : > { %v1146_v8 = vsub.f32 %v5877_v37, %v4849_v2  ;;  %v1148_v6 = vsub.f32 %v5879_v16, %v4849_v2  ;;  %v1150_v13 = vsub.f32 %v5881_v18, %v4849_v2  ;;  %v5883_v37 = vld [vmem:[#allocation13_spill] sm:$0xff]  ;;  %v5885_v16 = vld [vmem:[#allocation16_spill] sm:$0xff]  ;;  %v5913_v43 = vld [vmem:[#allocation83_spill] sm:$0xff]  ;;  %vm5072_vm0 = vcmp.lt.s32.totalorder %v5918_v28, 256 }
 0x1ca   : > { %v2412_v47 = vadd.f32 %v2411_v41, %v2347_v24  ;;  %v4859_v50 = vadd.f32 %v2480_v7, %v2348_v29  ;;  %v5876_v7 = vld [vmem:[#allocation152_spill] sm:$0xff]  ;;  %v1147_v11 = vsub.f32 %v5878_v39, %v4854_v56  ;;  %v1149_v25 = vsub.f32 %v5880_v33, %v4854_v56  ;;  %v5884_v39 = vld [vmem:[#allocation14_spill] sm:$0xff]  ;;  %v5915_v29 = vld [vmem:[#allocation87_spill] sm:$0xff]  ;;  %1697 = vst.msk [vmem:[#allocation2] sm:$0x3] %vm5072_vm0, %v4836_v51 }
 0x1cb   : > { %v1274_v5 = vmul.f32 1.442695, %v1146_v8  ;;  %v1278_v27 = vmul.f32 1.442695, %v1148_v6  ;;  %v1151_v40 = vsub.f32 %v5882_v52, %v4854_v56  ;;  %v1152_v20 = vsub.f32 %v5883_v37, %v4849_v2  ;;  %v5886_v8 = vld [vmem:[#allocation18_spill] sm:$0xff]  ;;  %v5887_v33 = vld [vmem:[#allocation20_spill] sm:$0xff] }
 0x1cc   : > { %v4867_v21 = vadd.f32 %v2412_v47, %v2349_v3  ;;  %v1276_v34 = vmul.f32 1.442695, %v1147_v11  ;;  %v1153_v49 = vsub.f32 %v5884_v39, %v4854_v56  ;;  %v1280_v19 = vmul.f32 1.442695, %v1149_v25  ;;  %v5888_v6 = vld [vmem:[#allocation22_spill] sm:$0xff]  ;;  %v5891_v25 = vld [vmem:[#allocation28_spill] sm:$0xff] }
 0x1cd   : > { %v1154_v58 = vsub.f32 %v5885_v16, %v4849_v2  ;;  %v1155_v11 = vsub.f32 %v5886_v8, %v4854_v56  ;;  %v1156_v18 = vsub.f32 %v5887_v33, %v4849_v2  ;;  %2934 = vpow2.f32 %v1274_v5  ;;  %v5893_v5 = vld [vmem:[#allocation35_spill] sm:$0xff]  ;;  %v5910_v41 = vld [vmem:[#allocation76_spill] sm:$0xff] }
 0x1ce   : > { %v1157_v52 = vsub.f32 %v5888_v6, %v4854_v56  ;;  %v1158_v37 = vsub.f32 %v5889_v60, %v4849_v2  ;;  %v1159_v39 = vsub.f32 %v5890_v54, %v4854_v56  ;;  %2936 = vpow2.f32 %v1276_v34  ;;  %v5894_v6 = vld [vmem:[#allocation37_spill] sm:$0xff] }
 0x1cf   : > { %v1160_v16 = vsub.f32 %v5891_v25, %v4849_v2  ;;  %v1161_v8 = vsub.f32 %v5892_v14, %v4854_v56  ;;  %2938 = vpow2.f32 %v1278_v27  ;;  %v1282_v44 = vmul.f32 1.442695, %v1150_v13  ;;  %v5896_v34 = vld [vmem:[#allocation41_spill] sm:$0xff]  ;;  %v5897_v25 = vld [vmem:[#allocation46_spill] sm:$0xff]  ;;  %v5898_v27 = vld [vmem:[#allocation48_spill] sm:$0xff] }
 0x1d0   : > { %v1162_v33 = vsub.f32 %v5893_v5, %v4849_v2  ;;  %v1163_v9 = vsub.f32 %v5894_v6, %v4854_v56  ;;  %2940 = vpow2.f32 %v1280_v19  ;;  %v1284_v60 = vmul.f32 1.442695, %v1151_v40  ;;  %v5899_v5 = vld [vmem:[#allocation50_spill] sm:$0xff]  ;;  %v5900_v6 = vld [vmem:[#allocation52_spill] sm:$0xff]  ;;  %v5904_v13 = vld [vmem:[#allocation61_spill] sm:$0xff] }
 0x1d1   : > { %v1164_v54 = vsub.f32 %v5895_v46, %v4849_v2  ;;  %v1165_v47 = vsub.f32 %v5896_v34, %v4854_v56  ;;  %v1166_v57 = vsub.f32 %v5897_v25, %v4849_v2  ;;  %v1286_v14 = vmul.f32 1.442695, %v1152_v20  ;;  %v5903_v20 = vld [vmem:[#allocation59_spill] sm:$0xff]  ;;  %v5907_v34 = vld [vmem:[#allocation69_spill] sm:$0xff] }
 0x1d2   : > { %v1288_v40 = vmul.f32 1.442695, %v1153_v49  ;;  %2942 = vpow2.f32 %v1282_v44  ;;  %v1290_v31 = vmul.f32 1.442695, %v1154_v58  ;;  %v1292_v17 = vmul.f32 1.442695, %v1155_v11 }
 0x1d3   : > { %2944 = vpow2.f32 %v1284_v60  ;;  %v5906_v49 = vld [vmem:[#allocation67_spill] sm:$0xff]  ;;  %v1294_v46 = vmul.f32 1.442695, %v1156_v18  ;;  %v1296_v25 = vmul.f32 1.442695, %v1157_v52  ;;  %v5909_v60 = vld [vmem:[#allocation74_spill] sm:$0xff]  ;;  %v5922_v42 = vsub.f32 %v5899_v5, %v4849_v2 }
 0x1d4   : > { %2946 = vpow2.f32 %v1286_v14  ;;  %v5908_v58 = vld [vmem:[#allocation71_spill] sm:$0xff]  ;;  %v1298_v30 = vmul.f32 1.442695, %v1158_v37  ;;  %v2414_v18 = vrot.slane %v4867_v21, 4  ;;  %v5911_v14 = vld [vmem:[#allocation78_spill] sm:$0xff]  ;;  %v5912_v52 = vld [vmem:[#allocation80_spill] sm:$0xff] }
 0x1d5   : > { %2948 = vpow2.f32 %v1288_v40  ;;  %v1300_v63 = vmul.f32 1.442695, %v1159_v39  ;;  %v1302_v3 = vmul.f32 1.442695, %v1160_v16  ;;  %v1304_v44 = vmul.f32 1.442695, %v1161_v8 }
 0x1d6   : > { %2950 = vpow2.f32 %v1290_v31  ;;  %v5914_v31 = vld [vmem:[#allocation85_spill] sm:$0xff]  ;;  %v1186_v40 = vsub.f32 %v5917_v48, %v4849_v2  ;;  %v1306_v0 = vmul.f32 1.442695, %v1162_v33  ;;  %v1308_v16 = vmul.f32 1.442695, %v1163_v9 }
 0x1d7   : > { %v2935_v23 = vpop.eup %2934  ;;  %2952 = vpow2.f32 %v1292_v17  ;;  %v5916_v17 = vld [vmem:[#allocation89_spill] sm:$0xff]  ;;  %v1310_v11 = vmul.f32 1.442695, %v1164_v54  ;;  %v1312_v37 = vmul.f32 1.442695, %v1165_v47 }
 0x1d8   : > { %v2937_v55 = vpop.eup %2936  ;;  %2954 = vpow2.f32 %v1294_v46  ;;  %v2415_v46 = vadd.f32 %v2414_v18, %v4867_v21  ;;  %v1314_v8 = vmul.f32 1.442695, %v1166_v57 }
 0x1d9   : > { %v2939_v53 = vpop.eup %2938  ;;  %2956 = vpow2.f32 %v1296_v25 }
 0x1da   : > { %v2941_v19 = vpop.eup %2940  ;;  %2958 = vpow2.f32 %v1298_v30  ;;  %v1535_v15 = vadd.f32 %v2939_v53, %v2935_v23  ;;  %v2416_v57 = vrot.slane %v2415_v46, 2  ;;  %v5921_v23 = vsub.f32 %v5898_v27, %v4854_v56 }
 0x1db   : > { %2960 = vpow2.f32 %v1300_v63  ;;  %v1604_v24 = vadd.f32 %v2941_v19, %v2937_v55  ;;  %v2827_v55 = vsel %vm1965_vm1, 1.0, %v5652_v35  ;;  %v5923_v35 = vld [vmem:[#allocation94_spill] sm:$0xff]  ;;  %v5925_v19 = vsub.f32 %v5901_v12, %v4849_v2 }
 0x1dc   : > { %v2943_v59 = vpop.eup %2942  ;;  %2962 = vpow2.f32 %v1302_v3  ;;  %v1316_v28 = vmul.f32 1.442695, %v5921_v23  ;;  %v2350_v30 = vmul.f32 %v2827_v55, %v5876_v7  ;;  %v1187_v47 = vsub.f32 %v5923_v35, %v4854_v56  ;;  %v5928_v55 = vld [vmem:[#allocation96_spill] sm:$0xff] }
 0x1dd   : > { %v2945_v25 = vpop.eup %2944  ;;  %2964 = vpow2.f32 %v1304_v44  ;;  %v1536_v9 = vadd.f32 %v2943_v59, %v1535_v15  ;;  %v1318_v15 = vmul.f32 1.442695, %v5922_v42  ;;  %v5924_v3 = vsub.f32 %v5900_v6, %v4854_v56 }
 0x1de   : > { %v2947_v21 = vpop.eup %2946  ;;  %2966 = vpow2.f32 %v1306_v0  ;;  %v1605_v63 = vadd.f32 %v2945_v25, %v1604_v24  ;;  %v2482_v54 = vadd.f32 %v4859_v50, %v2350_v30  ;;  %v1322_v5 = vmul.f32 1.442695, %v5925_v19  ;;  %v5933_v19 = vld [vmem:[#allocation98_spill] sm:$0xff] }
 0x1df   : > { %v2949_v53 = vpop.eup %2948  ;;  %2968 = vpow2.f32 %v1308_v16  ;;  %v1537_v59 = vadd.f32 %v2947_v21, %v1536_v9  ;;  %v1320_v33 = vmul.f32 1.442695, %v5924_v3  ;;  %v2417_v16 = vadd.f32 %v2416_v57, %v2415_v46 }
 0x1e0   : > { %v2951_v62 = vpop.eup %2950  ;;  %2970 = vpow2.f32 %v1310_v11  ;;  %v1606_v0 = vadd.f32 %v2949_v53, %v1605_v63  ;;  %v2483_v21 = vrot.slane %v2482_v54, 4  ;;  %v5927_v50 = vsub.f32 %v5903_v20, %v4849_v2 }
 0x1e1   : > { %v2953_v24 = vpop.eup %2952  ;;  %2972 = vpow2.f32 %v1312_v37  ;;  %v1538_v44 = vadd.f32 %v2951_v62, %v1537_v59  ;;  %v5926_v37 = vsub.f32 %v5902_v1, %v4854_v56  ;;  %v1188_v53 = vsub.f32 %v5928_v55, %v4849_v2  ;;  %v5949_v55 = vld [vmem:[#allocation117_spill] sm:$0xff] }
 0x1e2   : > { %v2955_v27 = vpop.eup %2954  ;;  %2974 = vpow2.f32 %v1314_v8  ;;  %v1607_v11 = vadd.f32 %v2953_v24, %v1606_v0  ;;  %v1326_v8 = vmul.f32 1.442695, %v5927_v50  ;;  %v5929_v46 = vsub.f32 %v5904_v13, %v4854_v56 }
 0x1e3   : > { %v2957_v18 = vpop.eup %2956  ;;  %2976 = vpow2.f32 %v1316_v28  ;;  %v1324_v25 = vmul.f32 1.442695, %v5926_v37  ;;  %v1539_v9 = vadd.f32 %v2955_v27, %v1538_v44  ;;  %v2484_v1 = vadd.f32 %v2483_v21, %v2482_v54 }
 0x1e4   : > { %v2959_v6 = vpop.eup %2958  ;;  %2978 = vpow2.f32 %v1318_v15  ;;  %v1608_v63 = vadd.f32 %v2957_v18, %v1607_v11  ;;  %v1328_v57 = vmul.f32 1.442695, %v5929_v46  ;;  %v5930_v28 = vsub.f32 %v5905_v36, %v4849_v2 }
 0x1e5   : > { %v2961_v12 = vpop.eup %2960  ;;  %2980 = vpow2.f32 %v1320_v33  ;;  %v1540_v20 = vadd.f32 %v2959_v6, %v1539_v9  ;;  %v2418_v15 = vrot.slane %v2417_v16, 1  ;;  %v5931_v59 = vsub.f32 %v5906_v49, %v4854_v56 }
 0x1e6   : > { %v2963_v23 = vpop.eup %2962  ;;  %2982 = vpow2.f32 %v1322_v5  ;;  %v1330_v30 = vmul.f32 1.442695, %v5930_v28  ;;  %v1609_v62 = vadd.f32 %v2961_v12, %v1608_v63  ;;  %v2485_v24 = vrot.slane %v2484_v1, 2 }
 0x1e7   : > { %v2965_v42 = vpop.eup %2964  ;;  %2984 = vpow2.f32 %v1324_v25  ;;  %v1332_v0 = vmul.f32 1.442695, %v5931_v59  ;;  %v5932_v13 = vsub.f32 %v5907_v34, %v4849_v2  ;;  %v1541_v54 = vadd.f32 %v2963_v23, %v1540_v20  ;;  %v5938_v23 = vld [vmem:[#allocation102_spill] sm:$0xff] }
 0x1e8   : > { %v2967_v3 = vpop.eup %2966  ;;  %2986 = vpow2.f32 %v1326_v8  ;;  %v1610_v27 = vadd.f32 %v2965_v42, %v1609_v62  ;;  %v1189_v5 = vsub.f32 %v5933_v19, %v4854_v56  ;;  %v5934_v44 = vsub.f32 %v5908_v58, %v4854_v56 }
 0x1e9   : > { %v1334_v33 = vmul.f32 1.442695, %v5932_v13  ;;  %v2969_v36 = vpop.eup %2968  ;;  %2988 = vpow2.f32 %v1328_v57  ;;  %v2486_v49 = vadd.f32 %v2485_v24, %v2484_v1  ;;  %v5935_v37 = vsub.f32 %v5909_v60, %v4849_v2 }
 0x1ea   : > { %v1336_v11 = vmul.f32 1.442695, %v5934_v44  ;;  %v2971_v18 = vpop.eup %2970  ;;  %2990 = vpow2.f32 %v1330_v30  ;;  %v1542_v34 = vadd.f32 %v2967_v3, %v1541_v54  ;;  %v1611_v21 = vadd.f32 %v2969_v36, %v1610_v27  ;;  %v5944_v44 = vld [vmem:[#allocation106_spill] sm:$0xff] }
 0x1eb   : > { %v1338_v25 = vmul.f32 1.442695, %v5935_v37  ;;  %v2973_v6 = vpop.eup %2972  ;;  %v2419_v50 = vadd.f32 %v2418_v15, %v2417_v16  ;;  %2992 = vpow2.f32 %v1332_v0  ;;  %v5936_v8 = vsub.f32 %v5910_v41, %v4854_v56  ;;  %v5941_v0 = vld [vmem:[#allocation104_spill] sm:$0xff] }
 0x1ec   : > { %v2487_v63 = vrot.slane %v2486_v49, 1  ;;  %v2975_v12 = vpop.eup %2974  ;;  %2994 = vpow2.f32 %v1334_v33  ;;  %v5937_v58 = vsub.f32 %v5911_v14, %v4849_v2  ;;  %v1543_v57 = vadd.f32 %v2971_v18, %v1542_v34 }
 0x1ed   : > { %v1340_v9 = vmul.f32 1.442695, %v5936_v8  ;;  %v1612_v1 = vadd.f32 %v2973_v6, %v1611_v21  ;;  %v2977_v60 = vpop.eup %2976  ;;  %v1190_v28 = vsub.f32 %v5938_v23, %v4849_v2  ;;  %2996 = vpow2.f32 %v1336_v11  ;;  %v2222_v21 = vld [vmem:[#allocation4] sm:$0x3] }
 0x1ee   : > { %v1342_v46 = vmul.f32 1.442695, %v5937_v58  ;;  %v5939_v16 = vsub.f32 %v5912_v52, %v4854_v56  ;;  %v2488_v41 = vadd.f32 %v2487_v63, %v2486_v49  ;;  %v2979_v20 = vpop.eup %2978  ;;  %2998 = vpow2.f32 %v1338_v25 }
 0x1ef   : > { %v5940_v62 = vsub.f32 %v5913_v43, %v4849_v2  ;;  %v1544_v14 = vadd.f32 %v2975_v12, %v1543_v57  ;;  %v1613_v15 = vadd.f32 %v2977_v60, %v1612_v1  ;;  %v2981_v59 = vpop.eup %2980  ;;  %v1191_v24 = vsub.f32 %v5941_v0, %v4854_v56 }
 0x1f0   : > { %v1344_v30 = vmul.f32 1.442695, %v5939_v16  ;;  %3000 = vpow2.f32 %v1340_v9  ;;  %v5942_v3 = vsub.f32 %v5914_v31, %v4854_v56  ;;  %v2491_v52 = vcombine.low %v2419_v50, %v2488_v41  ;;  %v2983_v33 = vpop.eup %2982  ;;  %v5946_v50 = vld [vmem:[#allocation108_spill] sm:$0xff]  ;;  %v5948_v41 = vld [vmem:[#allocation115_spill] sm:$0xff] }
 0x1f1   : > { %v1346_v42 = vmul.f32 1.442695, %v5940_v62  ;;  %3002 = vpow2.f32 %v1342_v46  ;;  %v5943_v54 = vsub.f32 %v5915_v29, %v4849_v2  ;;  %v1545_v43 = vadd.f32 %v2979_v20, %v1544_v14  ;;  %v2985_v19 = vpop.eup %2984  ;;  %v5947_v46 = vld [vmem:[#allocation113_spill] sm:$0xff] }
 0x1f2   : > { %v1348_v13 = vmul.f32 1.442695, %v5942_v3  ;;  %v1614_v36 = vadd.f32 %v2981_v59, %v1613_v15  ;;  %v1192_v11 = vsub.f32 %v5944_v44, %v4849_v2  ;;  %3004 = vpow2.f32 %v1344_v30  ;;  %v2987_v37 = vpop.eup %2986  ;;  %v5950_v59 = vld [vmem:[#allocation119_spill] sm:$0xff] }
 0x1f3   : > { %v1350_v27 = vmul.f32 1.442695, %v5943_v54  ;;  %v5945_v49 = vsub.f32 %v5916_v17, %v4854_v56  ;;  %v2498_v31 = vrot.slane %v2491_v52, %v4788_v26  ;;  %3006 = vpow2.f32 %v1346_v42  ;;  %v2989_v6 = vpop.eup %2988  ;;  %v5951_v3 = vld [vmem:[#allocation123_spill] sm:$0xff] }
 0x1f4   : > { %v1354_v29 = vmul.f32 1.442695, %v1186_v40  ;;  %v1546_v25 = vadd.f32 %v2983_v33, %v1545_v43  ;;  %v1615_v34 = vadd.f32 %v2985_v19, %v1614_v36  ;;  %v1193_v8 = vsub.f32 %v5946_v50, %v4854_v56  ;;  %v2991_v63 = vpop.eup %2990  ;;  %v5952_v36 = vld [vmem:[#allocation125_spill] sm:$0xff]  ;;  %v5953_v44 = vld [vmem:[#allocation127_spill] sm:$0xff] }
 0x1f5   : > { %v1352_v18 = vmul.f32 1.442695, %v5945_v49  ;;  %3008 = vpow2.f32 %v1348_v13  ;;  %v1356_v17 = vmul.f32 1.442695, %v1187_v47  ;;  %v2505_v9 = vrot.slane %v2498_v31, %v4788_v26  ;;  %v2993_v58 = vpop.eup %2992 }
 0x1f6   : > { %3010 = vpow2.f32 %v1350_v27  ;;  %v1358_v48 = vmul.f32 1.442695, %v1188_v53  ;;  %v1547_v40 = vadd.f32 %v2987_v37, %v1546_v25  ;;  %v1616_v12 = vadd.f32 %v2989_v6, %v1615_v34  ;;  %v2995_v23 = vpop.eup %2994  ;;  %v5954_v34 = vld [vmem:[#allocation129_spill] sm:$0xff]  ;;  %v5955_v6 = vld [vmem:[#allocation134_spill] sm:$0xff] }
 0x1f7   : > { %v1194_v57 = vsub.f32 %v5947_v46, %v4849_v2  ;;  %3012 = vpow2.f32 %v1352_v18  ;;  %v1360_v1 = vmul.f32 1.442695, %v1189_v5  ;;  %v2507_v60 = vadd.f32 %v2505_v9, %v2222_v21  ;;  %v2997_v30 = vpop.eup %2996  ;;  %v5957_v46 = vld [vmem:[#allocation138_spill] sm:$0xff] }
 0x1f8   : > { %3014 = vpow2.f32 %v1354_v29  ;;  %v1362_v35 = vmul.f32 1.442695, %v1190_v28  ;;  %v1548_v47 = vadd.f32 %v2991_v63, %v1547_v40  ;;  %v1617_v16 = vadd.f32 %v2993_v58, %v1616_v12  ;;  %v2999_v42 = vpop.eup %2998  ;;  %v5956_v12 = vld [vmem:[#allocation136_spill] sm:$0xff] }
 0x1f9   : > { %v1195_v20 = vsub.f32 %v5948_v41, %v4854_v56  ;;  %v1196_v53 = vsub.f32 %v5949_v55, %v4849_v2  ;;  %3016 = vpow2.f32 %v1356_v17  ;;  %v1364_v62 = vmul.f32 1.442695, %v1191_v24  ;;  %2508 = vst.msk [vmem:[#allocation4] sm:$0x3] %vm5072_vm0, %v2507_v60 }
 0x1fa   : > { %3018 = vpow2.f32 %v1358_v48  ;;  %v1366_v5 = vmul.f32 1.442695, %v1192_v11  ;;  %v1549_v14 = vadd.f32 %v2995_v23, %v1548_v47  ;;  %v1618_v15 = vadd.f32 %v2997_v30, %v1617_v16  ;;  %v3001_v28 = vpop.eup %3000  ;;  %v5958_v30 = vld [vmem:[#allocation140_spill] sm:$0xff] }
 0x1fb   : > { %v1197_v0 = vsub.f32 %v5950_v59, %v4854_v56  ;;  %v1198_v13 = vsub.f32 %v5951_v3, %v4849_v2  ;;  %3020 = vpow2.f32 %v1360_v1  ;;  %v1368_v52 = vmul.f32 1.442695, %v1193_v8  ;;  %v3003_v33 = vpop.eup %3002 }
 0x1fc   : > { %3022 = vpow2.f32 %v1362_v35  ;;  %v1370_v24 = vmul.f32 1.442695, %v1194_v57  ;;  %v1550_v54 = vadd.f32 %v2999_v42, %v1549_v14  ;;  %v1619_v27 = vadd.f32 %v3001_v28, %v1618_v15  ;;  %v3005_v43 = vpop.eup %3004  ;;  %v5960_v28 = vld [vmem:[#allocation146_spill] sm:$0xff] }
 0x1fd   : > { %v1199_v19 = vsub.f32 %v5952_v36, %v4854_v56  ;;  %v1200_v11 = vsub.f32 %v5953_v44, %v4849_v2  ;;  %3024 = vpow2.f32 %v1364_v62  ;;  %v1372_v49 = vmul.f32 1.442695, %v1195_v20  ;;  %v3007_v18 = vpop.eup %3006  ;;  %v5959_v20 = vld [vmem:[#allocation144_spill] sm:$0xff] }
 0x1fe   : > { %3026 = vpow2.f32 %v1366_v5  ;;  %v1374_v31 = vmul.f32 1.442695, %v1196_v53  ;;  %v1551_v37 = vadd.f32 %v3003_v33, %v1550_v54  ;;  %v1620_v29 = vadd.f32 %v3005_v43, %v1619_v27  ;;  %v5962_v43 = vld [vmem:[#allocation151_spill] sm:$0xff] }
 0x1ff   : > { %v3009_v25 = vpop.eup %3008  ;;  %v1201_v21 = vsub.f32 %v5954_v34, %v4854_v56  ;;  %v1202_v50 = vsub.f32 %v5955_v6, %v4849_v2  ;;  %3028 = vpow2.f32 %v1368_v52  ;;  %v1376_v8 = vmul.f32 1.442695, %v1197_v0  ;;  %v5961_v0 = vld [vmem:[#allocation149_spill] sm:$0xff] }
 0x200   : > { %v3011_v17 = vpop.eup %3010  ;;  %3030 = vpow2.f32 %v1370_v24  ;;  %v1378_v9 = vmul.f32 1.442695, %v1198_v13  ;;  %v1552_v63 = vadd.f32 %v3007_v18, %v1551_v37  ;;  %v1621_v48 = vadd.f32 %v3009_v25, %v1620_v29  ;;  %v5964_v25 = vld [vmem:[#allocation8_spill] sm:$0xff] }
 0x201   : > { %v3013_v40 = vpop.eup %3012  ;;  %v1203_v58 = vsub.f32 %v5956_v12, %v4854_v56  ;;  %v1204_v57 = vsub.f32 %v5957_v46, %v4849_v2  ;;  %3032 = vpow2.f32 %v1372_v49  ;;  %v1380_v1 = vmul.f32 1.442695, %v1199_v19  ;;  %v5963_v19 = vld [vmem:[#allocation6_spill] sm:$0xff] }
 0x202   : > { %v3015_v60 = vpop.eup %3014  ;;  %3034 = vpow2.f32 %v1374_v31  ;;  %v1382_v23 = vmul.f32 1.442695, %v1200_v11  ;;  %v1553_v35 = vadd.f32 %v3011_v17, %v1552_v63  ;;  %v1622_v47 = vadd.f32 %v3013_v40, %v1621_v48 }
 0x203   : > { %v3017_v16 = vpop.eup %3016  ;;  %v1205_v41 = vsub.f32 %v5958_v30, %v4854_v56  ;;  %v1206_v55 = vsub.f32 %v5959_v20, %v4849_v2  ;;  %3036 = vpow2.f32 %v1376_v8  ;;  %v1384_v53 = vmul.f32 1.442695, %v1201_v21 }
 0x204   : > { %v3019_v62 = vpop.eup %3018  ;;  %3038 = vpow2.f32 %v1378_v9  ;;  %v1386_v42 = vmul.f32 1.442695, %v1202_v50  ;;  %v1554_v5 = vadd.f32 %v3015_v60, %v1553_v35  ;;  %v1623_v14 = vadd.f32 %v3017_v16, %v1622_v47 }
 0x205   : > { %v3021_v15 = vpop.eup %3020  ;;  %v1207_v59 = vsub.f32 %v5960_v28, %v4854_v56  ;;  %v1208_v3 = vsub.f32 %v5961_v0, %v4849_v2  ;;  %3040 = vpow2.f32 %v1380_v1  ;;  %v1388_v13 = vmul.f32 1.442695, %v1203_v58 }
 0x206   : > { %v3023_v52 = vpop.eup %3022  ;;  %3042 = vpow2.f32 %v1382_v23  ;;  %v1390_v33 = vmul.f32 1.442695, %v1204_v57  ;;  %v1555_v24 = vadd.f32 %v3019_v62, %v1554_v5  ;;  %v1624_v54 = vadd.f32 %v3021_v15, %v1623_v14 }
 0x207   : > { %v3025_v27 = vpop.eup %3024  ;;  %v1209_v36 = vsub.f32 %v5962_v43, %v4854_v56  ;;  %v1210_v44 = vsub.f32 %v5963_v19, %v4849_v2  ;;  %3044 = vpow2.f32 %v1384_v53  ;;  %v1392_v11 = vmul.f32 1.442695, %v1205_v41 }
 0x208   : > { %v3027_v49 = vpop.eup %3026  ;;  %3046 = vpow2.f32 %v1386_v42  ;;  %v1394_v18 = vmul.f32 1.442695, %v1206_v55  ;;  %v1556_v31 = vadd.f32 %v3023_v52, %v1555_v24  ;;  %v1625_v37 = vadd.f32 %v3025_v27, %v1624_v54 }
 0x209   : > { %v3029_v29 = vpop.eup %3028  ;;  %v1211_v34 = vsub.f32 %v5964_v25, %v4854_v56  ;;  %3048 = vpow2.f32 %v1388_v13  ;;  %v1396_v21 = vmul.f32 1.442695, %v1207_v59  ;;  %v1398_v50 = vmul.f32 1.442695, %v1208_v3 }
 0x20a   : > { %v3031_v6 = vpop.eup %3030  ;;  %3050 = vpow2.f32 %v1390_v33  ;;  %v1557_v8 = vadd.f32 %v3027_v49, %v1556_v31  ;;  %v1626_v17 = vadd.f32 %v3029_v29, %v1625_v37  ;;  %v1400_v63 = vmul.f32 1.442695, %v1209_v36 }
 0x20b   : > { %v3033_v9 = vpop.eup %3032  ;;  %3052 = vpow2.f32 %v1392_v11  ;;  %v1402_v40 = vmul.f32 1.442695, %v1210_v44  ;;  %v1404_v57 = vmul.f32 1.442695, %v1211_v34  ;;  %v5965_v60 = vsub.f32 %v3472_v32, %v4849_v2  ;;  %v5974_v44 = vld [vmem:[#allocation21_spill] sm:$0xff] }
 0x20c   : > { %v3035_v48 = vpop.eup %3034  ;;  %3054 = vpow2.f32 %v1394_v18  ;;  %v1558_v12 = vadd.f32 %v3031_v6, %v1557_v8  ;;  %v1627_v58 = vadd.f32 %v3033_v9, %v1626_v17  ;;  %v5966_v30 = vsub.f32 %v3482_v38, %v4854_v56  ;;  %v5978_v34 = vld [vmem:[#allocation25_spill] sm:$0xff]  ;;  %v5980_v9 = vld [vmem:[#allocation27_spill] sm:$0xff] }
 0x20d   : > { %v3037_v46 = vpop.eup %3036  ;;  %3056 = vpow2.f32 %v1396_v21  ;;  %v1406_v23 = vmul.f32 1.442695, %v5965_v60  ;;  %v5967_v55 = vsub.f32 %v3534_v61, %v4849_v2  ;;  %v5968_v32 = vsub.f32 %v3545_v4, %v4854_v56 }
 0x20e   : > { %v3039_v1 = vpop.eup %3038  ;;  %3058 = vpow2.f32 %v1398_v50  ;;  %v1559_v35 = vadd.f32 %v3035_v48, %v1558_v12  ;;  %v1628_v47 = vadd.f32 %v3037_v46, %v1627_v58  ;;  %v1408_v41 = vmul.f32 1.442695, %v5966_v30  ;;  %v5982_v12 = vld [vmem:[#allocation29_spill] sm:$0xff]  ;;  %v5986_v30 = vld [vmem:[#allocation36_spill] sm:$0xff] }
 0x20f   : > { %v3041_v16 = vpop.eup %3040  ;;  %3060 = vpow2.f32 %v1400_v63  ;;  %v1410_v53 = vmul.f32 1.442695, %v5967_v55  ;;  %v1412_v14 = vmul.f32 1.442695, %v5968_v32  ;;  %v5969_v38 = vsub.f32 %v3553_v10, %v4849_v2  ;;  %v5972_v10 = vld [vmem:[#allocation19_spill] sm:$0xff] }
 0x210   : > { %v3043_v20 = vpop.eup %3042  ;;  %3062 = vpow2.f32 %v1402_v40  ;;  %v1560_v62 = vadd.f32 %v3039_v1, %v1559_v35  ;;  %v1629_v42 = vadd.f32 %v3041_v16, %v1628_v47  ;;  %v5970_v61 = vsub.f32 %v5845_v45, %v4854_v56 }
 0x211   : > { %v3045_v5 = vpop.eup %3044  ;;  %3064 = vpow2.f32 %v1404_v57  ;;  %v1414_v28 = vmul.f32 1.442695, %v5969_v38  ;;  %v5971_v4 = vsub.f32 %v5846_v22, %v4849_v2  ;;  %v5973_v43 = vsub.f32 %v5972_v10, %v4854_v56  ;;  %v5976_v22 = vld [vmem:[#allocation23_spill] sm:$0xff] }
 0x212   : > { %v3047_v15 = vpop.eup %3046  ;;  %3066 = vpow2.f32 %v1406_v23  ;;  %v1561_v59 = vadd.f32 %v3043_v20, %v1560_v62  ;;  %v1630_v0 = vadd.f32 %v3045_v5, %v1629_v42  ;;  %v1416_v13 = vmul.f32 1.442695, %v5970_v61  ;;  %v5984_v23 = vld [vmem:[#allocation31_spill] sm:$0xff]  ;;  %v5988_v42 = vld [vmem:[#allocation38_spill] sm:$0xff] }
 0x213   : > { %v3049_v3 = vpop.eup %3048  ;;  %3068 = vpow2.f32 %v1408_v41  ;;  %v1418_v33 = vmul.f32 1.442695, %v5971_v4  ;;  %v1420_v36 = vmul.f32 1.442695, %v5973_v43  ;;  %v5975_v45 = vsub.f32 %v5974_v44, %v4849_v2  ;;  %v5992_v61 = vld [vmem:[#allocation42_spill] sm:$0xff] }
 0x214   : > { %v3051_v52 = vpop.eup %3050  ;;  %3070 = vpow2.f32 %v1410_v53  ;;  %v1562_v24 = vadd.f32 %v3047_v15, %v1561_v59  ;;  %v1631_v54 = vadd.f32 %v3049_v3, %v1630_v0  ;;  %v5977_v37 = vsub.f32 %v5976_v22, %v4854_v56  ;;  %v5990_v15 = vld [vmem:[#allocation40_spill] sm:$0xff] }
 0x215   : > { %v3053_v27 = vpop.eup %3052  ;;  %3072 = vpow2.f32 %v1412_v14  ;;  %v1422_v11 = vmul.f32 1.442695, %v5975_v45  ;;  %v5979_v21 = vsub.f32 %v5978_v34, %v4849_v2  ;;  %v5981_v63 = vsub.f32 %v5980_v9, %v4854_v56 }
 0x216   : > { %v3055_v19 = vpop.eup %3054  ;;  %3074 = vpow2.f32 %v1414_v28  ;;  %v1563_v49 = vadd.f32 %v3051_v52, %v1562_v24  ;;  %v1632_v18 = vadd.f32 %v3053_v27, %v1631_v54  ;;  %v1424_v29 = vmul.f32 1.442695, %v5977_v37 }
 0x217   : > { %v3057_v31 = vpop.eup %3056  ;;  %3076 = vpow2.f32 %v1416_v13  ;;  %v1426_v6 = vmul.f32 1.442695, %v5979_v21  ;;  %v1428_v48 = vmul.f32 1.442695, %v5981_v63  ;;  %v5983_v58 = vsub.f32 %v5982_v12, %v4849_v2 }
 0x218   : > { %v3059_v25 = vpop.eup %3058  ;;  %3078 = vpow2.f32 %v1418_v33  ;;  %v1564_v50 = vadd.f32 %v3055_v19, %v1563_v49  ;;  %v1633_v8 = vadd.f32 %v3057_v31, %v1632_v18  ;;  %v5985_v35 = vsub.f32 %v5984_v23, %v4854_v56  ;;  %v5994_v33 = vld [vmem:[#allocation47_spill] sm:$0xff] }
 0x219   : > { %v3061_v17 = vpop.eup %3060  ;;  %3080 = vpow2.f32 %v1420_v36  ;;  %v1430_v46 = vmul.f32 1.442695, %v5983_v58  ;;  %v5987_v41 = vsub.f32 %v5986_v30, %v4849_v2  ;;  %v5989_v5 = vsub.f32 %v5988_v42, %v4854_v56  ;;  %v5996_v36 = vld [vmem:[#allocation49_spill] sm:$0xff] }
 0x21a   : > { %v3063_v40 = vpop.eup %3062  ;;  %3082 = vpow2.f32 %v1422_v11  ;;  %v1565_v57 = vadd.f32 %v3059_v25, %v1564_v50  ;;  %v1634_v1 = vadd.f32 %v3061_v17, %v1633_v8  ;;  %v1432_v47 = vmul.f32 1.442695, %v5985_v35  ;;  %v5998_v11 = vld [vmem:[#allocation51_spill] sm:$0xff] }
 0x21b   : > { %v3065_v60 = vpop.eup %3064  ;;  %3084 = vpow2.f32 %v1424_v29  ;;  %v1434_v20 = vmul.f32 1.442695, %v5987_v41  ;;  %v1436_v32 = vmul.f32 1.442695, %v5989_v5  ;;  %v5991_v38 = vsub.f32 %v5990_v15, %v4849_v2  ;;  %v6000_v29 = vld [vmem:[#allocation53_spill] sm:$0xff] }
 0x21c   : > { %v3067_v16 = vpop.eup %3066  ;;  %3086 = vpow2.f32 %v1426_v6  ;;  %v1566_v55 = vadd.f32 %v3063_v40, %v1565_v57  ;;  %v1635_v53 = vadd.f32 %v3065_v60, %v1634_v1  ;;  %v5993_v13 = vsub.f32 %v5992_v61, %v4854_v56  ;;  %v6002_v6 = vld [vmem:[#allocation56_spill] sm:$0xff] }
 0x21d   : > { %v3069_v62 = vpop.eup %3068  ;;  %3088 = vpow2.f32 %v1428_v48  ;;  %v1438_v28 = vmul.f32 1.442695, %v5991_v38  ;;  %v5995_v24 = vsub.f32 %v5994_v33, %v4849_v2  ;;  %v5997_v19 = vsub.f32 %v5996_v36, %v4854_v56  ;;  %v6004_v48 = vld [vmem:[#allocation58_spill] sm:$0xff] }
 0x21e   : > { %v3071_v14 = vpop.eup %3070  ;;  %3090 = vpow2.f32 %v1430_v46  ;;  %v1567_v59 = vadd.f32 %v3067_v16, %v1566_v55  ;;  %v1636_v0 = vadd.f32 %v3069_v62, %v1635_v53  ;;  %v1440_v52 = vmul.f32 1.442695, %v5993_v13  ;;  %v6006_v46 = vld [vmem:[#allocation60_spill] sm:$0xff] }
 0x21f   : > { %v3073_v3 = vpop.eup %3072  ;;  %3092 = vpow2.f32 %v1432_v47  ;;  %v1442_v54 = vmul.f32 1.442695, %v5995_v24  ;;  %v1444_v44 = vmul.f32 1.442695, %v5997_v19  ;;  %v5999_v49 = vsub.f32 %v5998_v11, %v4849_v2  ;;  %v6008_v47 = vld [vmem:[#allocation62_spill] sm:$0xff] }
 0x220   : > { %v3075_v4 = vpop.eup %3074  ;;  %3094 = vpow2.f32 %v1434_v20  ;;  %v1568_v27 = vadd.f32 %v3071_v14, %v1567_v59  ;;  %v1637_v10 = vadd.f32 %v3073_v3, %v1636_v0  ;;  %v6001_v25 = vsub.f32 %v6000_v29, %v4854_v56  ;;  %v6010_v20 = vld [vmem:[#allocation66_spill] sm:$0xff] }
 0x221   : > { %v3077_v43 = vpop.eup %3076  ;;  %3096 = vpow2.f32 %v1436_v32  ;;  %v1446_v18 = vmul.f32 1.442695, %v5999_v49  ;;  %v6003_v50 = vsub.f32 %v6002_v6, %v4849_v2  ;;  %v6005_v40 = vsub.f32 %v6004_v48, %v4854_v56  ;;  %v6012_v32 = vld [vmem:[#allocation68_spill] sm:$0xff] }
 0x222   : > { %v3079_v45 = vpop.eup %3078  ;;  %3098 = vpow2.f32 %v1438_v28  ;;  %v1569_v31 = vadd.f32 %v3075_v4, %v1568_v27  ;;  %v1638_v22 = vadd.f32 %v3077_v43, %v1637_v10  ;;  %v1448_v34 = vmul.f32 1.442695, %v6001_v25  ;;  %v6014_v28 = vld [vmem:[#allocation70_spill] sm:$0xff] }
 0x223   : > { %v3081_v37 = vpop.eup %3080  ;;  %3100 = vpow2.f32 %v1440_v52  ;;  %v1450_v8 = vmul.f32 1.442695, %v6003_v50  ;;  %v1452_v12 = vmul.f32 1.442695, %v6005_v40  ;;  %v6007_v57 = vsub.f32 %v6006_v46, %v4849_v2  ;;  %v6016_v52 = vld [vmem:[#allocation72_spill] sm:$0xff] }
 0x224   : > { %v3083_v21 = vpop.eup %3082  ;;  %3102 = vpow2.f32 %v1442_v54  ;;  %v1570_v17 = vadd.f32 %v3079_v45, %v1569_v31  ;;  %v1639_v9 = vadd.f32 %v3081_v37, %v1638_v22  ;;  %v6009_v16 = vsub.f32 %v6008_v47, %v4854_v56  ;;  %v6018_v54 = vld [vmem:[#allocation75_spill] sm:$0xff] }
 0x225   : > { %v3085_v63 = vpop.eup %3084  ;;  %3104 = vpow2.f32 %v1444_v44  ;;  %v1454_v1 = vmul.f32 1.442695, %v6007_v57  ;;  %v6011_v55 = vsub.f32 %v6010_v20, %v4849_v2  ;;  %v6013_v14 = vsub.f32 %v6012_v32, %v4854_v56  ;;  %v6020_v44 = vld [vmem:[#allocation77_spill] sm:$0xff] }
 0x226   : > { %v3087_v58 = vpop.eup %3086  ;;  %3106 = vpow2.f32 %v1446_v18  ;;  %v1571_v60 = vadd.f32 %v3083_v21, %v1570_v17  ;;  %v1640_v23 = vadd.f32 %v3085_v63, %v1639_v9  ;;  %v1456_v30 = vmul.f32 1.442695, %v6009_v16  ;;  %v6022_v18 = vld [vmem:[#allocation79_spill] sm:$0xff] }
 0x227   : > { %v3089_v35 = vpop.eup %3088  ;;  %3108 = vpow2.f32 %v1448_v34  ;;  %v1458_v53 = vmul.f32 1.442695, %v6011_v55  ;;  %v1460_v15 = vmul.f32 1.442695, %v6013_v14  ;;  %v6015_v59 = vsub.f32 %v6014_v28, %v4849_v2  ;;  %v6024_v34 = vld [vmem:[#allocation81_spill] sm:$0xff] }
 0x228   : > { %v3091_v41 = vpop.eup %3090  ;;  %3110 = vpow2.f32 %v1450_v8  ;;  %v1572_v62 = vadd.f32 %v3087_v58, %v1571_v60  ;;  %v1641_v42 = vadd.f32 %v3089_v35, %v1640_v23  ;;  %v6017_v4 = vsub.f32 %v6016_v52, %v4854_v56  ;;  %v6026_v8 = vld [vmem:[#allocation84_spill] sm:$0xff] }
 0x229   : > { %v3093_v5 = vpop.eup %3092  ;;  %3112 = vpow2.f32 %v1452_v12  ;;  %v1462_v0 = vmul.f32 1.442695, %v6015_v59  ;;  %v6019_v27 = vsub.f32 %v6018_v54, %v4849_v2  ;;  %v6021_v45 = vsub.f32 %v6020_v44, %v4854_v56  ;;  %v6028_v12 = vld [vmem:[#allocation86_spill] sm:$0xff] }
 0x22a   : > { %v3095_v38 = vpop.eup %3094  ;;  %3114 = vpow2.f32 %v1454_v1  ;;  %v1573_v3 = vadd.f32 %v3091_v41, %v1572_v62  ;;  %v1642_v61 = vadd.f32 %v3093_v5, %v1641_v42  ;;  %v1464_v33 = vmul.f32 1.442695, %v6017_v4  ;;  %v6030_v1 = vld [vmem:[#allocation88_spill] sm:$0xff] }
 0x22b   : > { %v3097_v13 = vpop.eup %3096  ;;  %3116 = vpow2.f32 %v1456_v30  ;;  %v1466_v10 = vmul.f32 1.442695, %v6019_v27  ;;  %v1468_v11 = vmul.f32 1.442695, %v6021_v45  ;;  %v6023_v31 = vsub.f32 %v6022_v18, %v4849_v2  ;;  %v6032_v30 = vld [vmem:[#allocation90_spill] sm:$0xff] }
 0x22c   : > { %v3099_v24 = vpop.eup %3098  ;;  %3118 = vpow2.f32 %v1458_v53  ;;  %v1574_v43 = vadd.f32 %v3095_v38, %v1573_v3  ;;  %v1643_v36 = vadd.f32 %v3097_v13, %v1642_v61  ;;  %v6025_v21 = vsub.f32 %v6024_v34, %v4854_v56  ;;  %v6034_v53 = vld [vmem:[#allocation93_spill] sm:$0xff] }
 0x22d   : > { %v3101_v19 = vpop.eup %3100  ;;  %3120 = vpow2.f32 %v1460_v15  ;;  %v1470_v22 = vmul.f32 1.442695, %v6023_v31  ;;  %v6027_v17 = vsub.f32 %v6026_v8, %v4849_v2  ;;  %v6029_v58 = vsub.f32 %v6028_v12, %v4854_v56  ;;  %v6036_v15 = vld [vmem:[#allocation95_spill] sm:$0xff] }
 0x22e   : > { %v3103_v49 = vpop.eup %3102  ;;  %3122 = vpow2.f32 %v1462_v0  ;;  %v1575_v37 = vadd.f32 %v3099_v24, %v1574_v43  ;;  %v1644_v29 = vadd.f32 %v3101_v19, %v1643_v36  ;;  %v1472_v6 = vmul.f32 1.442695, %v6025_v21  ;;  %v6038_v0 = vld [vmem:[#allocation97_spill] sm:$0xff] }
 0x22f   : > { %v3105_v25 = vpop.eup %3104  ;;  %3124 = vpow2.f32 %v1464_v33  ;;  %v1474_v9 = vmul.f32 1.442695, %v6027_v17  ;;  %v1476_v46 = vmul.f32 1.442695, %v6029_v58  ;;  %v6031_v60 = vsub.f32 %v6030_v1, %v4849_v2  ;;  %v6040_v33 = vld [vmem:[#allocation99_spill] sm:$0xff] }
 0x230   : > { %v3107_v50 = vpop.eup %3106  ;;  %3126 = vpow2.f32 %v1466_v10  ;;  %v1576_v63 = vadd.f32 %v3103_v49, %v1575_v37  ;;  %v1645_v48 = vadd.f32 %v3105_v25, %v1644_v29  ;;  %v6033_v41 = vsub.f32 %v6032_v30, %v4854_v56  ;;  %v6042_v10 = vld [vmem:[#allocation103_spill] sm:$0xff] }
 0x231   : > { %v3109_v40 = vpop.eup %3108  ;;  %3128 = vpow2.f32 %v1468_v11  ;;  %v1478_v23 = vmul.f32 1.442695, %v6031_v60  ;;  %v6035_v62 = vsub.f32 %v6034_v53, %v4849_v2  ;;  %v6037_v38 = vsub.f32 %v6036_v15, %v4854_v56  ;;  %v6044_v11 = vld [vmem:[#allocation105_spill] sm:$0xff] }
 0x232   : > { %v3111_v57 = vpop.eup %3110  ;;  %3130 = vpow2.f32 %v1470_v22  ;;  %v1577_v35 = vadd.f32 %v3107_v50, %v1576_v63  ;;  %v1646_v47 = vadd.f32 %v3109_v40, %v1645_v48  ;;  %v1480_v20 = vmul.f32 1.442695, %v6033_v41  ;;  %v6046_v22 = vld [vmem:[#allocation107_spill] sm:$0xff] }
 0x233   : > { %v3113_v16 = vpop.eup %3112  ;;  %3132 = vpow2.f32 %v1472_v6  ;;  %v1482_v42 = vmul.f32 1.442695, %v6035_v62  ;;  %v1484_v28 = vmul.f32 1.442695, %v6037_v38  ;;  %v6039_v3 = vsub.f32 %v6038_v0, %v4849_v2  ;;  %v6048_v6 = vld [vmem:[#allocation109_spill] sm:$0xff] }
 0x234   : > { %v3115_v55 = vpop.eup %3114  ;;  %3134 = vpow2.f32 %v1474_v9  ;;  %v1578_v5 = vadd.f32 %v3111_v57, %v1577_v35  ;;  %v1647_v32 = vadd.f32 %v3113_v16, %v1646_v47  ;;  %v6041_v24 = vsub.f32 %v6040_v33, %v4854_v56  ;;  %v6050_v9 = vld [vmem:[#allocation114_spill] sm:$0xff] }
 0x235   : > { %v3117_v14 = vpop.eup %3116  ;;  %3136 = vpow2.f32 %v1476_v46  ;;  %v1486_v61 = vmul.f32 1.442695, %v6039_v3  ;;  %v6043_v43 = vsub.f32 %v6042_v10, %v4849_v2  ;;  %v6045_v49 = vsub.f32 %v6044_v11, %v4854_v56  ;;  %v6052_v46 = vld [vmem:[#allocation116_spill] sm:$0xff] }
 0x236   : > { %v3119_v59 = vpop.eup %3118  ;;  %3138 = vpow2.f32 %v1478_v23  ;;  %v1579_v13 = vadd.f32 %v3115_v55, %v1578_v5  ;;  %v1648_v52 = vadd.f32 %v3117_v14, %v1647_v32  ;;  %v1488_v54 = vmul.f32 1.442695, %v6041_v24  ;;  %v6054_v23 = vld [vmem:[#allocation118_spill] sm:$0xff] }
 0x237   : > { %v3121_v4 = vpop.eup %3120  ;;  %3140 = vpow2.f32 %v1480_v20  ;;  %v1490_v36 = vmul.f32 1.442695, %v6043_v43  ;;  %v1492_v18 = vmul.f32 1.442695, %v6045_v49  ;;  %v6047_v37 = vsub.f32 %v6046_v22, %v4849_v2  ;;  %v6056_v20 = vld [vmem:[#allocation120_spill] sm:$0xff] }
 0x238   : > { %v3123_v27 = vpop.eup %3122  ;;  %3142 = vpow2.f32 %v1482_v42  ;;  %v1580_v19 = vadd.f32 %v3119_v59, %v1579_v13  ;;  %v1649_v44 = vadd.f32 %v3121_v4, %v1648_v52  ;;  %v6049_v50 = vsub.f32 %v6048_v6, %v4854_v56  ;;  %v6058_v42 = vld [vmem:[#allocation124_spill] sm:$0xff] }
 0x239   : > { %v3125_v45 = vpop.eup %3124  ;;  %3144 = vpow2.f32 %v1484_v28  ;;  %v1494_v29 = vmul.f32 1.442695, %v6047_v37  ;;  %v6051_v63 = vsub.f32 %v6050_v9, %v4849_v2  ;;  %v6053_v57 = vsub.f32 %v6052_v46, %v4854_v56  ;;  %v6060_v28 = vld [vmem:[#allocation126_spill] sm:$0xff] }
 0x23a   : > { %v3127_v31 = vpop.eup %3126  ;;  %3146 = vpow2.f32 %v1486_v61  ;;  %v1581_v25 = vadd.f32 %v3123_v27, %v1580_v19  ;;  %v1650_v34 = vadd.f32 %v3125_v45, %v1649_v44  ;;  %v1496_v8 = vmul.f32 1.442695, %v6049_v50  ;;  %v6062_v61 = vld [vmem:[#allocation128_spill] sm:$0xff] }
 0x23b   : > { %v3129_v21 = vpop.eup %3128  ;;  %3148 = vpow2.f32 %v1488_v54  ;;  %v1498_v48 = vmul.f32 1.442695, %v6051_v63  ;;  %v1500_v1 = vmul.f32 1.442695, %v6053_v57  ;;  %v6055_v35 = vsub.f32 %v6054_v23, %v4849_v2  ;;  %v6064_v54 = vld [vmem:[#allocation130_spill] sm:$0xff] }
 0x23c   : > { %v3131_v17 = vpop.eup %3130  ;;  %3150 = vpow2.f32 %v1490_v36  ;;  %v1582_v40 = vadd.f32 %v3127_v31, %v1581_v25  ;;  %v1651_v12 = vadd.f32 %v3129_v21, %v1650_v34  ;;  %v6057_v55 = vsub.f32 %v6056_v20, %v4854_v56  ;;  %v6066_v36 = vld [vmem:[#allocation135_spill] sm:$0xff] }
 0x23d   : > { %v3133_v58 = vpop.eup %3132  ;;  %3152 = vpow2.f32 %v1492_v18  ;;  %v1502_v47 = vmul.f32 1.442695, %v6055_v35  ;;  %v6059_v5 = vsub.f32 %v6058_v42, %v4849_v2  ;;  %v6061_v59 = vsub.f32 %v6060_v28, %v4854_v56  ;;  %v6068_v18 = vld [vmem:[#allocation137_spill] sm:$0xff] }
 0x23e   : > { %v3135_v60 = vpop.eup %3134  ;;  %3154 = vpow2.f32 %v1494_v29  ;;  %v1583_v16 = vadd.f32 %v3131_v17, %v1582_v40  ;;  %v1652_v30 = vadd.f32 %v3133_v58, %v1651_v12  ;;  %v1504_v53 = vmul.f32 1.442695, %v6057_v55  ;;  %v6070_v29 = vld [vmem:[#allocation139_spill] sm:$0xff] }
 0x23f   : > { %v3137_v41 = vpop.eup %3136  ;;  %3156 = vpow2.f32 %v1496_v8  ;;  %v1506_v32 = vmul.f32 1.442695, %v6059_v5  ;;  %v1508_v0 = vmul.f32 1.442695, %v6061_v59  ;;  %v6063_v13 = vsub.f32 %v6062_v61, %v4849_v2  ;;  %v6072_v8 = vld [vmem:[#allocation141_spill] sm:$0xff] }
 0x240   : > { %v3139_v62 = vpop.eup %3138  ;;  %3158 = vpow2.f32 %v1498_v48  ;;  %v1584_v14 = vadd.f32 %v3135_v60, %v1583_v16  ;;  %v1653_v15 = vadd.f32 %v3137_v41, %v1652_v30  ;;  %v6065_v27 = vsub.f32 %v6064_v54, %v4854_v56  ;;  %v6074_v48 = vld [vmem:[#allocation145_spill] sm:$0xff] }
 0x241   : > { %v3141_v38 = vpop.eup %3140  ;;  %3160 = vpow2.f32 %v1500_v1  ;;  %v1510_v52 = vmul.f32 1.442695, %v6063_v13  ;;  %v6067_v19 = vsub.f32 %v6066_v36, %v4849_v2  ;;  %v6069_v31 = vsub.f32 %v6068_v18, %v4854_v56  ;;  %v6076_v1 = vld [vmem:[#allocation147_spill] sm:$0xff] }
 0x242   : > { %v3143_v3 = vpop.eup %3142  ;;  %3162 = vpow2.f32 %v1502_v47  ;;  %v1585_v4 = vadd.f32 %v3139_v62, %v1584_v14  ;;  %v1654_v33 = vadd.f32 %v3141_v38, %v1653_v15  ;;  %v1512_v10 = vmul.f32 1.442695, %v6065_v27  ;;  %v6078_v47 = vld [vmem:[#allocation150_spill] sm:$0xff] }
 0x243   : > { %v3145_v24 = vpop.eup %3144  ;;  %3164 = vpow2.f32 %v1504_v53  ;;  %v1514_v44 = vmul.f32 1.442695, %v6067_v19  ;;  %v1516_v22 = vmul.f32 1.442695, %v6069_v31  ;;  %v6071_v25 = vsub.f32 %v6070_v29, %v4849_v2  ;;  %v6081_v19 = vld [vmem:[#allocation32_spill] sm:$0xff] }
 0x244   : > { %v3147_v43 = vpop.eup %3146  ;;  %3166 = vpow2.f32 %v1506_v32  ;;  %v1586_v45 = vadd.f32 %v3143_v3, %v1585_v4  ;;  %v1655_v11 = vadd.f32 %v3145_v24, %v1654_v33  ;;  %v6073_v17 = vsub.f32 %v6072_v8, %v4854_v56 }
 0x245   : > { %v3149_v49 = vpop.eup %3148  ;;  %3168 = vpow2.f32 %v1508_v0  ;;  %v1518_v34 = vmul.f32 1.442695, %v6071_v25  ;;  %v6075_v40 = vsub.f32 %v6074_v48, %v4849_v2  ;;  %v6077_v60 = vsub.f32 %v6076_v1, %v4854_v56 }
 0x246   : > { %v3151_v37 = vpop.eup %3150  ;;  %3170 = vpow2.f32 %v1510_v52  ;;  %v1587_v21 = vadd.f32 %v3147_v43, %v1586_v45  ;;  %v1656_v6 = vadd.f32 %v3149_v49, %v1655_v11  ;;  %v1520_v9 = vmul.f32 1.442695, %v6073_v17 }
 0x247   : > { %v3153_v50 = vpop.eup %3152  ;;  %3172 = vpow2.f32 %v1512_v10  ;;  %v1522_v12 = vmul.f32 1.442695, %v6075_v40  ;;  %v1524_v23 = vmul.f32 1.442695, %v6077_v60  ;;  %v6079_v16 = vsub.f32 %v6078_v47, %v4849_v2  ;;  %v2513_v47 = vld [vmem:[#allocation2] sm:$0x3] (!%p2828_p6) }
 0x248   : > { %v3155_v63 = vpop.eup %3154  ;;  %3174 = vpow2.f32 %v1514_v44  ;;  %v1588_v58 = vadd.f32 %v3151_v37, %v1587_v21  ;;  %v1657_v46 = vadd.f32 %v3153_v50, %v1656_v6  ;;  %v6080_v53 = vsub.f32 %v5876_v7, %v4854_v56 }
 0x249   : > { %v3157_v57 = vpop.eup %3156  ;;  %3176 = vpow2.f32 %v1516_v22  ;;  %v1526_v30 = vmul.f32 1.442695, %v6079_v16  ;;  %v1530_v44 = vsub.f32 %v6081_v19, %v4836_v51 }
 0x24a   : > { %v3159_v35 = vpop.eup %3158  ;;  %3178 = vpow2.f32 %v1518_v34  ;;  %v1589_v41 = vadd.f32 %v3155_v63, %v1588_v58  ;;  %v1658_v20 = vadd.f32 %v3157_v57, %v1657_v46  ;;  %v1528_v62 = vmul.f32 1.442695, %v6080_v53  ;;  %v1533_v58 = vld [vmem:[#allocation3] sm:$0x3] }
 0x24b   : > { %v3161_v55 = vpop.eup %3160  ;;  %3180 = vpow2.f32 %v1520_v9  ;;  %v1531_v37 = vmul.f32 1.442695, %v1530_v44 }
 0x24c   : > { %v3163_v42 = vpop.eup %3162  ;;  %3182 = vpow2.f32 %v1522_v12  ;;  %v1590_v5 = vadd.f32 %v3159_v35, %v1589_v41  ;;  %v1659_v32 = vadd.f32 %v3161_v55, %v1658_v20 }
 0x24d   : > { %v3165_v14 = vpop.eup %3164  ;;  %3184 = vpow2.f32 %v1524_v23 }
 0x24e   : > { %v3167_v15 = vpop.eup %3166  ;;  %3186 = vpow2.f32 %v1526_v30  ;;  %v1591_v38 = vadd.f32 %v3163_v42, %v1590_v5  ;;  %v1660_v28 = vadd.f32 %v3165_v14, %v1659_v32  ;;  %v2518_v30 = vld [vmem:[#allocation4] sm:$0x3] (!%p2828_p6) }
 0x24f   : > { %v3169_v2 = vpop.eup %3168  ;;  %3188 = vpow2.f32 %v1528_v62 }
 0x250   : > { %v3171_v59 = vpop.eup %3170  ;;  %v1592_v0 = vadd.f32 %v3167_v15, %v1591_v38  ;;  %v1661_v3 = vadd.f32 %v3169_v2, %v1660_v28  ;;  %3190 = vpow2.f32 %v1531_v37 }
 0x251   : > { %v3173_v61 = vpop.eup %3172 }
 0x252   : > { %v3175_v13 = vpop.eup %3174  ;;  %v1593_v52 = vadd.f32 %v3171_v59, %v1592_v0  ;;  %v1662_v56 = vadd.f32 %v3173_v61, %v1661_v3 }
 0x253   : > { %v3177_v7 = vpop.eup %3176 }
 0x254   : > { %v3179_v4 = vpop.eup %3178  ;;  %v1594_v33 = vadd.f32 %v3175_v13, %v1593_v52  ;;  %v1663_v24 = vadd.f32 %v3177_v7, %v1662_v56 }
 0x255   : > { %v3181_v54 = vpop.eup %3180 }
 0x256   : > { %v3183_v27 = vpop.eup %3182  ;;  %v1595_v10 = vadd.f32 %v3179_v4, %v1594_v33  ;;  %v1664_v43 = vadd.f32 %v3181_v54, %v1663_v24 }
 0x257   : > { %v3185_v36 = vpop.eup %3184 }
 0x258   : > { %v3187_v45 = vpop.eup %3186  ;;  %v1596_v11 = vadd.f32 %v3183_v27, %v1595_v10  ;;  %v1665_v49 = vadd.f32 %v3185_v36, %v1664_v43 }
 0x259   : > { %v3189_v18 = vpop.eup %3188 }
 0x25a   : > { %v1597_v31 = vadd.f32 %v3187_v45, %v1596_v11  ;;  %v1666_v22 = vadd.f32 %v3189_v18, %v1665_v49  ;;  %v3191_v12 = vpop.eup %3190 }
 0x25b   : > { %v1534_v57 = vmul.f32 %v3191_v12, %v1533_v58 }
 0x25c   : > { %v1598_v29 = vrot.slane %v1597_v31, 4  ;;  %v1667_v25 = vrot.slane %v1666_v22, 4 }
 0x25e   : > { %v1599_v34 = vadd.f32 %v1598_v29, %v1597_v31  ;;  %v1668_v21 = vadd.f32 %v1667_v25, %v1666_v22 }
 0x260   : > { %v1600_v6 = vrot.slane %v1599_v34, 2  ;;  %v1669_v50 = vrot.slane %v1668_v21, 2 }
 0x262   : > { %v1601_v8 = vadd.f32 %v1600_v6, %v1599_v34  ;;  %v1670_v17 = vadd.f32 %v1669_v50, %v1668_v21 }
 0x264   : > { %v1602_v9 = vrot.slane %v1601_v8, 1  ;;  %v1671_v63 = vrot.slane %v1670_v17, 1 }
 0x266   : > { %v1603_v48 = vadd.f32 %v1602_v9, %v1601_v8  ;;  %v1672_v51 = vadd.f32 %v1671_v63, %v1670_v17 }
 0x268   : > { %v1675_v40 = vcombine.low %v1603_v48, %v1672_v51 }
 0x26a   : > { %v1682_v46 = vrot.slane %v1675_v40, %v4788_v26  ;;  %2512 = sbr.rel (%p2828_p6) target bundleno = 665 (0x299), region = 40 }
 0x26c   : > { %v1689_v1 = vrot.slane %v1682_v46, %v4788_v26 }
 0x26e   : > { %v1691_v60 = vadd.f32 %v1689_v1, %v1534_v57 }
 0x270   : > { %1696 = vst.msk [vmem:[#allocation3] sm:$0x3] %vm5072_vm0, %v1691_v60 }
 0x277   : > { %v2514_v23 = vld [vmem:[#allocation3] sm:$0x3] }
 0x278   : > { %3192 = vlog2.f32 %v2514_v23 }
 0x282   : > { %v3193_v35 = vpop.eup %3192 }
 0x283   : > { %v2516_v16 = vmul.f32 0.6931472, %v3193_v35 }
 0x285   : > { %v2517_v41 = vadd.f32 %v2516_v16, %v2513_v47 }
 0x287   : > { %v2519_v20 = vsub.f32 %v2517_v41, %v2518_v30 }
 0x289   : > { %2520 = vst.msk [vmem:[%s5419_s3] sm:$0x3] %vm5072_vm0, %v2519_v20  ;;  %v2521_v26 = vsub.f32 0.0, %v2519_v20 }
 0x28b   : > { %v2522_v55 = vmul.f32 1.442695, %v2521_v26 }
 0x28d   : > { %3194 = vpow2.f32 %v2522_v55 }
 0x297   : > { %v3195_v53 = vpop.eup %3194 }
 0x298   : > { %2524 = vst.msk [vmem:[%s5420_s4] sm:$0x3] %vm5072_vm0, %v3195_v53 }
 0x299 PF: > { %s15_s17 = sadd.s32 1, %s3218_s17   ;;  %s6082_s15 = smov %s3214_s16 }
 0x29a   : > { %p12_p7 = scmp.ge.s32.totalorder %s15_s17, 4   ;;  %s6083_s16 = smov %s6085_s18 }
 0x29c   :  { %14 = sbr.rel (!%p12_p7) target bundleno = 2 (0x2), region = 88 }

</bundles_post_ra>
